<compile_context>
chip_gen: v6e
topology: v6e:2x2x1
jax: 0.10.0
libtpu: 0.0.40
codegen_flags: <defaults>
</compile_context>

<pallas_src>
import numpy as np
import jax
import jax.numpy as jnp
from jax.experimental import pallas as pl
from jax.experimental.pallas import tpu as pltpu

# ---------------- model config (small synthetic Whisper encoder) -------------
B = 2            # batch
N_MELS = 8       # mel channels
T_IN = 16        # mel time frames
D_MODEL = 32     # hidden width
N_HEADS = 4
D_HEAD = D_MODEL // N_HEADS
D_FF = 4 * D_MODEL
N_LAYERS = 2
SEQ = T_IN // 2  # frames after the stride-2 conv
KSIZE = 3        # conv kernel size

_VMEM = pl.BlockSpec(memory_space=pltpu.MemorySpace.VMEM)


# ---------------------------- in-kernel helpers -------------------------------
def _bf16(x):
    return x.astype(jnp.bfloat16)


def _mm(a, b):
    """bf16 MXU operands, f32 accumulation."""
    return jnp.dot(_bf16(a), _bf16(b), preferred_element_type=jnp.float32)


def _mm_nt(a, b):
    """a @ b.T via dot_general contracting dims (no explicit XLU transpose)."""
    return jax.lax.dot_general(
        _bf16(a), _bf16(b),
        dimension_numbers=(((1,), (1,)), ((), ())),
        preferred_element_type=jnp.float32)


def _norm(x, eps=1e-5):
    """LayerNorm normalization only (affine folded into following weights)."""
    mean = jnp.mean(x, axis=-1, keepdims=True)
    var = jnp.mean((x - mean) ** 2, axis=-1, keepdims=True)
    return (x - mean) * jax.lax.rsqrt(var + eps)


def _layernorm(x, g, b, eps=1e-5):
    return _norm(x, eps) * g + b


def _gelu(x):
    # TODO(synk): PyTorch nn.GELU default is exact erf; tanh approximation used
    # here (erf is not guaranteed to lower in Mosaic).
    return jax.nn.gelu(x, approximate=True)


# ---------------------------- the fused kernel --------------------------------
def _encoder_kernel(xt_ref,
                    g_c1_ref, w_c1_ref, b_c1_ref,
                    g_c2_ref, w_c2_ref, b_c2_ref,
                    pos_ref, mask_ref,
                    w_qkv_ref, b_qkv_ref, w_o_ref, b_o_ref,
                    w_m1_ref, b_m1_ref, w_m2_ref, b_m2_ref,
                    lnf_g_ref, lnf_b_ref, out_ref):
    f32 = jnp.float32

    # ---- conv1 (k=3, s=1, p=1) + GELU -----------------------------------------
    # G1_k @ X selects row (t + k - 1) of each batch block of X (zero rows where
    # the tap hits padding), so the tap gather is a constant-selector matmul.
    xt = xt_ref[...]                                                  # (B*T, C)
    y1 = jnp.zeros((B * T_IN, D_MODEL), f32)
    for k in range(KSIZE):
        y1 = y1 + _mm(_mm(g_c1_ref[k], xt), w_c1_ref[k])
    h1 = _gelu(y1 + b_c1_ref[...])                                    # (B*T, D)

    # ---- conv2 (k=3, s=2, p=1) + GELU + sinusoidal pos-emb ---------------------
    # G2_k @ h1 selects row (2*s + k - 1) of each batch block of h1, so the
    # strided/padded window never leaves VMEM and needs no strided slicing.
    y2 = jnp.zeros((B * SEQ, D_MODEL), f32)
    for k in range(KSIZE):
        y2 = y2 + _mm(_mm(g_c2_ref[k], h1), w_c2_ref[k])
    x = _gelu(y2 + b_c2_ref[...]) + pos_ref[...]                      # (B*S, D)

    mask = mask_ref[...]                                              # (B*S, B*S)

    # ---- transformer blocks (statically unrolled; N_LAYERS=2) -----------------
    for l in range(N_LAYERS):
        # -- MHSA sub-block (pre-LN; LN affine + attn scale folded into W_qkv) --
        qkv = _mm(_norm(x), w_qkv_ref[l]) + b_qkv_ref[l]              # (B*S, 3D)
        o_acc = jnp.zeros((B * SEQ, D_MODEL), f32)
        for h in range(N_HEADS):
            lo = h * D_HEAD
            q_h = qkv[:, lo:lo + D_HEAD]
            k_h = qkv[:, D_MODEL + lo:D_MODEL + lo + D_HEAD]
            v_h = qkv[:, 2 * D_MODEL + lo:2 * D_MODEL + lo + D_HEAD]
            s = _mm_nt(q_h, k_h) + mask                               # (B*S, B*S)
            s = s - jnp.max(s, axis=-1, keepdims=True)
            p = jnp.exp(s)
            p = p * pl.reciprocal(jnp.sum(p, axis=-1, keepdims=True),
                                  approx=True)
            # head-merge fused into the output projection (rows of W_o).
            o_acc = o_acc + _mm(_mm(p, v_h), w_o_ref[l, h])
        x = x + o_acc + b_o_ref[l]                                    # residual

        # -- MLP sub-block (pre-LN; LN affine folded into W_m1/b_m1) --
        hid = _gelu(_mm(_norm(x), w_m1_ref[l]) + b_m1_ref[l])         # (B*S, 4D)
        x = x + _mm(hid, w_m2_ref[l]) + b_m2_ref[l]                   # residual

    out_ref[...] = _layernorm(x, lnf_g_ref[...],
                              lnf_b_ref[...]).astype(out_ref.dtype)


# ---------------------------- constants / parameters --------------------------
def _tap_selectors(t_out, t_in, stride):
    """0/1 matrices G_k: (G_k @ X)[b*t_out+s] = X[b*t_in + stride*s + k - 1]
    (or 0 where the tap hits the implicit zero padding)."""
    g = np.zeros((KSIZE, B * t_out, B * t_in), np.float32)
    for k in range(KSIZE):
        for b in range(B):
            for s in range(t_out):
                t = stride * s + k - 1
                if 0 <= t < t_in:
                    g[k, b * t_out + s, b * t_in + t] = 1.0
    return jnp.asarray(g)


def _batch_block_mask():
    """(B*SEQ, B*SEQ) additive mask: 0 within a batch item, -1e30 across."""
    m = np.full((B * SEQ, B * SEQ), -1e30, np.float32)
    for b in range(B):
        m[b * SEQ:(b + 1) * SEQ, b * SEQ:(b + 1) * SEQ] = 0.0
    return jnp.asarray(m)


def sinusoids(length, channels, max_timescale=10000.0):
    half = channels // 2
    log_inc = np.log(max_timescale) / (half - 1)
    inv = np.exp(-log_inc * np.arange(half))
    t = np.arange(length)[:, None] * inv[None, :]
    return jnp.asarray(np.concatenate([np.sin(t), np.cos(t)], 1), jnp.float32)


def init_params(key):
    keys = iter(jax.random.split(key, 64))

    def w(shape, scale=0.02):
        return scale * jax.random.normal(next(keys), shape, dtype=jnp.float32)

    zeros = lambda *s: jnp.zeros(s, jnp.float32)
    ones = lambda *s: jnp.ones(s, jnp.float32)

    params = {
        "conv1_w": w((D_MODEL, N_MELS, KSIZE)), "conv1_b": zeros(D_MODEL),
        "conv2_w": w((D_MODEL, D_MODEL, KSIZE)), "conv2_b": zeros(D_MODEL),
        "ln_post_g": ones(D_MODEL), "ln_post_b": zeros(D_MODEL),
        "layers": [],
    }
    for _ in range(N_LAYERS):
        params["layers"].append({
            "ln1_g": ones(D_MODEL), "ln1_b": zeros(D_MODEL),
            "wq": w((D_MODEL, D_MODEL)), "bq": zeros(D_MODEL),
            "wk": w((D_MODEL, D_MODEL)),                   # Whisper: no k bias
            "wv": w((D_MODEL, D_MODEL)), "bv": zeros(D_MODEL),
            "wo": w((D_MODEL, D_MODEL)), "bo": zeros(D_MODEL),
            "ln2_g": ones(D_MODEL), "ln2_b": zeros(D_MODEL),
            "w1": w((D_MODEL, D_FF)), "b1": zeros(D_FF),
            "w2": w((D_FF, D_MODEL)), "b2": zeros(D_MODEL),
        })
    return params


def pack_params(p):
    """Repack raw weights into kernel-ready operands:
      - bf16 MXU operands, f32 biases,
      - fused QKV with attention scale AND pre-LN affine folded in,
      - MLP-in with pre-LN affine folded in,
      - per-head W_o split so head-merge fuses into the output projection,
      - per-tap conv weights + constant 0/1 tap selectors."""
    bf16 = jnp.bfloat16
    scale = 1.0 / np.sqrt(D_HEAD)

    def fold_ln(gamma, beta, w, bias):
        # LN(x) @ W + bias == norm(x) @ (gamma[:,None]*W) + (beta @ W + bias)
        return gamma[:, None] * w, beta @ w + bias

    qkv_w, qkv_b, o_w, o_b = [], [], [], []
    m1_w, m1_b, m2_w, m2_b = [], [], [], []
    for l in p["layers"]:
        w_raw = jnp.concatenate([l["wq"] * scale, l["wk"], l["wv"]], axis=1)
        b_raw = jnp.concatenate([l["bq"] * scale,
                                 jnp.zeros((D_MODEL,), jnp.float32), l["bv"]])
        w_f, b_f = fold_ln(l["ln1_g"], l["ln1_b"], w_raw, b_raw)
        qkv_w.append(w_f)
        qkv_b.append(b_f.reshape(1, 3 * D_MODEL))
        o_w.append(l["wo"].reshape(N_HEADS, D_HEAD, D_MODEL))
        o_b.append(l["bo"].reshape(1, D_MODEL))
        w1_f, b1_f = fold_ln(l["ln2_g"], l["ln2_b"], l["w1"], l["b1"])
        m1_w.append(w1_f)
        m1_b.append(b1_f.reshape(1, D_FF))
        m2_w.append(l["w2"])
        m2_b.append(l["b2"].reshape(1, D_MODEL))

    stack = lambda xs: jnp.stack(xs, axis=0)
    return {
        "g_c1": _tap_selectors(T_IN, T_IN, 1).astype(bf16),
        "w_c1": p["conv1_w"].transpose(2, 1, 0).astype(bf16),   # (K, C_in, D)
        "b_c1": p["conv1_b"].reshape(1, D_MODEL),
        "g_c2": _tap_selectors(SEQ, T_IN, 2).astype(bf16),
        "w_c2": p["conv2_w"].transpose(2, 1, 0).astype(bf16),   # (K, C_in, D)
        "b_c2": p["conv2_b"].reshape(1, D_MODEL),
        "pos": jnp.tile(sinusoids(SEQ, D_MODEL), (B, 1)),
        "mask": _batch_block_mask(),
        "w_qkv": stack(qkv_w).astype(bf16),
        "b_qkv": stack(qkv_b),
        "w_o": stack(o_w).astype(bf16),
        "b_o": stack(o_b),
        "w_m1": stack(m1_w).astype(bf16),
        "b_m1": stack(m1_b),
        "w_m2": stack(m2_w).astype(bf16),
        "b_m2": stack(m2_b),
        "lnf_g": p["ln_post_g"].reshape(1, D_MODEL),
        "lnf_b": p["ln_post_b"].reshape(1, D_MODEL),
    }


_ARG_ORDER = ("g_c1", "w_c1", "b_c1", "g_c2", "w_c2", "b_c2", "pos", "mask",
              "w_qkv", "b_qkv", "w_o", "b_o",
              "w_m1", "b_m1", "w_m2", "b_m2", "lnf_g", "lnf_b")


# ---------------------------- forward ------------------------------------------
@jax.jit
def encoder_forward(mel, packed):
    # mel: (B, n_mels, T) NCW.  Only a layout transpose happens outside the
    # kernel; both conv tap gathers, both GELUs, pos-emb add, every transformer
    # block and the final LN run inside one fused, VMEM-resident kernel.
    xt = mel.transpose(0, 2, 1).reshape(B * T_IN, N_MELS)

    operands = [xt] + [packed[k] for k in _ARG_ORDER]
    y = pl.pallas_call(
        _encoder_kernel,
        out_shape=jax.ShapeDtypeStruct((B * SEQ, D_MODEL), jnp.float32),
        in_specs=[_VMEM] * len(operands),
        out_specs=_VMEM,
    )(*operands)
    return y.reshape(B, SEQ, D_MODEL)


# ---------------------------- main ---------------------------------------------
if __name__ == "__main__":
    key = jax.random.PRNGKey(0)
    k_in, k_par = jax.random.split(key)
    mel = jax.random.normal(k_in, (B, N_MELS, T_IN), dtype=jnp.float32)
    packed = pack_params(init_params(k_par))

    audio_features = encoder_forward(mel, packed)
    jax.block_until_ready(audio_features)
    assert audio_features.shape == (B, SEQ, D_MODEL)
    assert audio_features.dtype == jnp.float32
    assert bool(jnp.all(jnp.isfinite(audio_features)))
    print("KERNEL_OK")
</pallas_src>

<mosaic_0001>
module attributes {stable_mosaic.version = 11 : i64} {
  func.func @_encoder_kernel(%arg0: memref<32x8xf32, #tpu.memory_space<vmem>>, %arg1: memref<3x32x32xbf16, #tpu.memory_space<vmem>>, %arg2: memref<3x8x32xbf16, #tpu.memory_space<vmem>>, %arg3: memref<1x32xf32, #tpu.memory_space<vmem>>, %arg4: memref<3x16x32xbf16, #tpu.memory_space<vmem>>, %arg5: memref<3x32x32xbf16, #tpu.memory_space<vmem>>, %arg6: memref<1x32xf32, #tpu.memory_space<vmem>>, %arg7: memref<16x32xf32, #tpu.memory_space<vmem>>, %arg8: memref<16x16xf32, #tpu.memory_space<vmem>>, %arg9: memref<2x32x96xbf16, #tpu.memory_space<vmem>>, %arg10: memref<2x1x96xf32, #tpu.memory_space<vmem>>, %arg11: memref<2x4x8x32xbf16, #tpu.memory_space<vmem>>, %arg12: memref<2x1x32xf32, #tpu.memory_space<vmem>>, %arg13: memref<2x32x128xbf16, #tpu.memory_space<vmem>>, %arg14: memref<2x1x128xf32, #tpu.memory_space<vmem>>, %arg15: memref<2x128x32xbf16, #tpu.memory_space<vmem>>, %arg16: memref<2x1x32xf32, #tpu.memory_space<vmem>>, %arg17: memref<1x32xf32, #tpu.memory_space<vmem>>, %arg18: memref<1x32xf32, #tpu.memory_space<vmem>>, %arg19: memref<16x32xf32, #tpu.memory_space<vmem>>) attributes {dimension_semantics = [], scalar_prefetch = 0 : i64, scratch_operands = 0 : i64, tpu.core_type = #tpu.core_type<tc>} {
    %c0 = arith.constant 0 : index
    %c0_0 = arith.constant 0 : index
    %0 = vector.load %arg0[%c0, %c0_0] : memref<32x8xf32, #tpu.memory_space<vmem>>, vector<32x8xf32>
    %cst = arith.constant 0.000000e+00 : f32
    %1 = vector.broadcast %cst : f32 to vector<32x32xf32>
    %c0_1 = arith.constant 0 : index
    %c0_2 = arith.constant 0 : index
    %c0_3 = arith.constant 0 : index
    %2 = vector.load %arg1[%c0_1, %c0_2, %c0_3] : memref<3x32x32xbf16, #tpu.memory_space<vmem>>, vector<1x32x32xbf16>
    %3 = vector.shape_cast %2 : vector<1x32x32xbf16> to vector<32x32xbf16>
    %4 = arith.truncf %0 : vector<32x8xf32> to vector<32x8xbf16>
    %cst_4 = arith.constant dense<0.000000e+00> : vector<32x8xf32>
    %5 = tpu.matmul %3, %4, %cst_4 {dimension_numbers = #tpu.dot_dimension_numbers<[1], [0], [0], [1], [0, 0, 1, 1], [], []>} : vector<32x32xbf16>, vector<32x8xbf16>, vector<32x8xf32> -> vector<32x8xf32>
    %c0_5 = arith.constant 0 : index
    %c0_6 = arith.constant 0 : index
    %c0_7 = arith.constant 0 : index
    %6 = vector.load %arg2[%c0_5, %c0_6, %c0_7] : memref<3x8x32xbf16, #tpu.memory_space<vmem>>, vector<1x8x32xbf16>
    %7 = vector.shape_cast %6 : vector<1x8x32xbf16> to vector<8x32xbf16>
    %8 = arith.truncf %5 : vector<32x8xf32> to vector<32x8xbf16>
    %cst_8 = arith.constant dense<0.000000e+00> : vector<32x32xf32>
    %9 = tpu.matmul %8, %7, %cst_8 {dimension_numbers = #tpu.dot_dimension_numbers<[1], [0], [0], [1], [0, 0, 1, 1], [], []>} : vector<32x8xbf16>, vector<8x32xbf16>, vector<32x32xf32> -> vector<32x32xf32>
    %10 = arith.addf %1, %9 : vector<32x32xf32>
    %c1 = arith.constant 1 : index
    %c0_9 = arith.constant 0 : index
    %c0_10 = arith.constant 0 : index
    %11 = vector.load %arg1[%c1, %c0_9, %c0_10] : memref<3x32x32xbf16, #tpu.memory_space<vmem>>, vector<1x32x32xbf16>
    %12 = vector.shape_cast %11 : vector<1x32x32xbf16> to vector<32x32xbf16>
    %13 = arith.truncf %0 : vector<32x8xf32> to vector<32x8xbf16>
    %cst_11 = arith.constant dense<0.000000e+00> : vector<32x8xf32>
    %14 = tpu.matmul %12, %13, %cst_11 {dimension_numbers = #tpu.dot_dimension_numbers<[1], [0], [0], [1], [0, 0, 1, 1], [], []>} : vector<32x32xbf16>, vector<32x8xbf16>, vector<32x8xf32> -> vector<32x8xf32>
    %c1_12 = arith.constant 1 : index
    %c0_13 = arith.constant 0 : index
    %c0_14 = arith.constant 0 : index
    %15 = vector.load %arg2[%c1_12, %c0_13, %c0_14] : memref<3x8x32xbf16, #tpu.memory_space<vmem>>, vector<1x8x32xbf16>
    %16 = vector.shape_cast %15 : vector<1x8x32xbf16> to vector<8x32xbf16>
    %17 = arith.truncf %14 : vector<32x8xf32> to vector<32x8xbf16>
    %cst_15 = arith.constant dense<0.000000e+00> : vector<32x32xf32>
    %18 = tpu.matmul %17, %16, %cst_15 {dimension_numbers = #tpu.dot_dimension_numbers<[1], [0], [0], [1], [0, 0, 1, 1], [], []>} : vector<32x8xbf16>, vector<8x32xbf16>, vector<32x32xf32> -> vector<32x32xf32>
    %19 = arith.addf %10, %18 : vector<32x32xf32>
    %c2 = arith.constant 2 : index
    %c0_16 = arith.constant 0 : index
    %c0_17 = arith.constant 0 : index
    %20 = vector.load %arg1[%c2, %c0_16, %c0_17] : memref<3x32x32xbf16, #tpu.memory_space<vmem>>, vector<1x32x32xbf16>
    %21 = vector.shape_cast %20 : vector<1x32x32xbf16> to vector<32x32xbf16>
    %22 = arith.truncf %0 : vector<32x8xf32> to vector<32x8xbf16>
    %cst_18 = arith.constant dense<0.000000e+00> : vector<32x8xf32>
    %23 = tpu.matmul %21, %22, %cst_18 {dimension_numbers = #tpu.dot_dimension_numbers<[1], [0], [0], [1], [0, 0, 1, 1], [], []>} : vector<32x32xbf16>, vector<32x8xbf16>, vector<32x8xf32> -> vector<32x8xf32>
    %c2_19 = arith.constant 2 : index
    %c0_20 = arith.constant 0 : index
    %c0_21 = arith.constant 0 : index
    %24 = vector.load %arg2[%c2_19, %c0_20, %c0_21] : memref<3x8x32xbf16, #tpu.memory_space<vmem>>, vector<1x8x32xbf16>
    %25 = vector.shape_cast %24 : vector<1x8x32xbf16> to vector<8x32xbf16>
    %26 = arith.truncf %23 : vector<32x8xf32> to vector<32x8xbf16>
    %cst_22 = arith.constant dense<0.000000e+00> : vector<32x32xf32>
    %27 = tpu.matmul %26, %25, %cst_22 {dimension_numbers = #tpu.dot_dimension_numbers<[1], [0], [0], [1], [0, 0, 1, 1], [], []>} : vector<32x8xbf16>, vector<8x32xbf16>, vector<32x32xf32> -> vector<32x32xf32>
    %28 = arith.addf %19, %27 : vector<32x32xf32>
    %c0_23 = arith.constant 0 : index
    %c0_24 = arith.constant 0 : index
    %29 = vector.load %arg3[%c0_23, %c0_24] : memref<1x32xf32, #tpu.memory_space<vmem>>, vector<1x32xf32>
    %30 = vector.broadcast %29 : vector<1x32xf32> to vector<32x32xf32>
    %31 = arith.addf %28, %30 : vector<32x32xf32>
    %32 = arith.mulf %31, %31 : vector<32x32xf32>
    %33 = arith.mulf %31, %32 : vector<32x32xf32>
    %cst_25 = arith.constant 4.471500e-02 : f32
    %34 = vector.broadcast %cst_25 : f32 to vector<32x32xf32>
    %35 = arith.mulf %34, %33 : vector<32x32xf32>
    %36 = arith.addf %31, %35 : vector<32x32xf32>
    %cst_26 = arith.constant 0.797884583 : f32
    %37 = vector.broadcast %cst_26 : f32 to vector<32x32xf32>
    %38 = arith.mulf %37, %36 : vector<32x32xf32>
    %39 = math.tanh %38 : vector<32x32xf32>
    %cst_27 = arith.constant 1.000000e+00 : f32
    %40 = vector.broadcast %cst_27 : f32 to vector<32x32xf32>
    %41 = arith.addf %40, %39 : vector<32x32xf32>
    %cst_28 = arith.constant 5.000000e-01 : f32
    %42 = vector.broadcast %cst_28 : f32 to vector<32x32xf32>
    %43 = arith.mulf %42, %41 : vector<32x32xf32>
    %44 = arith.mulf %31, %43 : vector<32x32xf32>
    %cst_29 = arith.constant 0.000000e+00 : f32
    %45 = vector.broadcast %cst_29 : f32 to vector<16x32xf32>
    %c0_30 = arith.constant 0 : index
    %c0_31 = arith.constant 0 : index
    %c0_32 = arith.constant 0 : index
    %46 = vector.load %arg4[%c0_30, %c0_31, %c0_32] : memref<3x16x32xbf16, #tpu.memory_space<vmem>>, vector<1x16x32xbf16>
    %47 = vector.shape_cast %46 : vector<1x16x32xbf16> to vector<16x32xbf16>
    %48 = arith.truncf %44 : vector<32x32xf32> to vector<32x32xbf16>
    %cst_33 = arith.constant dense<0.000000e+00> : vector<16x32xf32>
    %49 = tpu.matmul %47, %48, %cst_33 {dimension_numbers = #tpu.dot_dimension_numbers<[1], [0], [0], [1], [0, 0, 1, 1], [], []>} : vector<16x32xbf16>, vector<32x32xbf16>, vector<16x32xf32> -> vector<16x32xf32>
    %c0_34 = arith.constant 0 : index
    %c0_35 = arith.constant 0 : index
    %c0_36 = arith.constant 0 : index
    %50 = vector.load %arg5[%c0_34, %c0_35, %c0_36] : memref<3x32x32xbf16, #tpu.memory_space<vmem>>, vector<1x32x32xbf16>
    %51 = vector.shape_cast %50 : vector<1x32x32xbf16> to vector<32x32xbf16>
    %52 = arith.truncf %49 : vector<16x32xf32> to vector<16x32xbf16>
    %cst_37 = arith.constant dense<0.000000e+00> : vector<16x32xf32>
    %53 = tpu.matmul %52, %51, %cst_37 {dimension_numbers = #tpu.dot_dimension_numbers<[1], [0], [0], [1], [0, 0, 1, 1], [], []>} : vector<16x32xbf16>, vector<32x32xbf16>, vector<16x32xf32> -> vector<16x32xf32>
    %54 = arith.addf %45, %53 : vector<16x32xf32>
    %c1_38 = arith.constant 1 : index
    %c0_39 = arith.constant 0 : index
    %c0_40 = arith.constant 0 : index
    %55 = vector.load %arg4[%c1_38, %c0_39, %c0_40] : memref<3x16x32xbf16, #tpu.memory_space<vmem>>, vector<1x16x32xbf16>
    %56 = vector.shape_cast %55 : vector<1x16x32xbf16> to vector<16x32xbf16>
    %57 = arith.truncf %44 : vector<32x32xf32> to vector<32x32xbf16>
    %cst_41 = arith.constant dense<0.000000e+00> : vector<16x32xf32>
    %58 = tpu.matmul %56, %57, %cst_41 {dimension_numbers = #tpu.dot_dimension_numbers<[1], [0], [0], [1], [0, 0, 1, 1], [], []>} : vector<16x32xbf16>, vector<32x32xbf16>, vector<16x32xf32> -> vector<16x32xf32>
    %c1_42 = arith.constant 1 : index
    %c0_43 = arith.constant 0 : index
    %c0_44 = arith.constant 0 : index
    %59 = vector.load %arg5[%c1_42, %c0_43, %c0_44] : memref<3x32x32xbf16, #tpu.memory_space<vmem>>, vector<1x32x32xbf16>
    %60 = vector.shape_cast %59 : vector<1x32x32xbf16> to vector<32x32xbf16>
    %61 = arith.truncf %58 : vector<16x32xf32> to vector<16x32xbf16>
    %cst_45 = arith.constant dense<0.000000e+00> : vector<16x32xf32>
    %62 = tpu.matmul %61, %60, %cst_45 {dimension_numbers = #tpu.dot_dimension_numbers<[1], [0], [0], [1], [0, 0, 1, 1], [], []>} : vector<16x32xbf16>, vector<32x32xbf16>, vector<16x32xf32> -> vector<16x32xf32>
    %63 = arith.addf %54, %62 : vector<16x32xf32>
    %c2_46 = arith.constant 2 : index
    %c0_47 = arith.constant 0 : index
    %c0_48 = arith.constant 0 : index
    %64 = vector.load %arg4[%c2_46, %c0_47, %c0_48] : memref<3x16x32xbf16, #tpu.memory_space<vmem>>, vector<1x16x32xbf16>
    %65 = vector.shape_cast %64 : vector<1x16x32xbf16> to vector<16x32xbf16>
    %66 = arith.truncf %44 : vector<32x32xf32> to vector<32x32xbf16>
    %cst_49 = arith.constant dense<0.000000e+00> : vector<16x32xf32>
    %67 = tpu.matmul %65, %66, %cst_49 {dimension_numbers = #tpu.dot_dimension_numbers<[1], [0], [0], [1], [0, 0, 1, 1], [], []>} : vector<16x32xbf16>, vector<32x32xbf16>, vector<16x32xf32> -> vector<16x32xf32>
    %c2_50 = arith.constant 2 : index
    %c0_51 = arith.constant 0 : index
    %c0_52 = arith.constant 0 : index
    %68 = vector.load %arg5[%c2_50, %c0_51, %c0_52] : memref<3x32x32xbf16, #tpu.memory_space<vmem>>, vector<1x32x32xbf16>
    %69 = vector.shape_cast %68 : vector<1x32x32xbf16> to vector<32x32xbf16>
    %70 = arith.truncf %67 : vector<16x32xf32> to vector<16x32xbf16>
    %cst_53 = arith.constant dense<0.000000e+00> : vector<16x32xf32>
    %71 = tpu.matmul %70, %69, %cst_53 {dimension_numbers = #tpu.dot_dimension_numbers<[1], [0], [0], [1], [0, 0, 1, 1], [], []>} : vector<16x32xbf16>, vector<32x32xbf16>, vector<16x32xf32> -> vector<16x32xf32>
    %72 = arith.addf %63, %71 : vector<16x32xf32>
    %c0_54 = arith.constant 0 : index
    %c0_55 = arith.constant 0 : index
    %73 = vector.load %arg6[%c0_54, %c0_55] : memref<1x32xf32, #tpu.memory_space<vmem>>, vector<1x32xf32>
    %74 = vector.broadcast %73 : vector<1x32xf32> to vector<16x32xf32>
    %75 = arith.addf %72, %74 : vector<16x32xf32>
    %76 = arith.mulf %75, %75 : vector<16x32xf32>
    %77 = arith.mulf %75, %76 : vector<16x32xf32>
    %cst_56 = arith.constant 4.471500e-02 : f32
    %78 = vector.broadcast %cst_56 : f32 to vector<16x32xf32>
    %79 = arith.mulf %78, %77 : vector<16x32xf32>
    %80 = arith.addf %75, %79 : vector<16x32xf32>
    %cst_57 = arith.constant 0.797884583 : f32
    %81 = vector.broadcast %cst_57 : f32 to vector<16x32xf32>
    %82 = arith.mulf %81, %80 : vector<16x32xf32>
    %83 = math.tanh %82 : vector<16x32xf32>
    %cst_58 = arith.constant 1.000000e+00 : f32
    %84 = vector.broadcast %cst_58 : f32 to vector<16x32xf32>
    %85 = arith.addf %84, %83 : vector<16x32xf32>
    %cst_59 = arith.constant 5.000000e-01 : f32
    %86 = vector.broadcast %cst_59 : f32 to vector<16x32xf32>
    %87 = arith.mulf %86, %85 : vector<16x32xf32>
    %88 = arith.mulf %75, %87 : vector<16x32xf32>
    %c0_60 = arith.constant 0 : index
    %c0_61 = arith.constant 0 : index
    %89 = vector.load %arg7[%c0_60, %c0_61] : memref<16x32xf32, #tpu.memory_space<vmem>>, vector<16x32xf32>
    %90 = arith.addf %88, %89 : vector<16x32xf32>
    %c0_62 = arith.constant 0 : index
    %c0_63 = arith.constant 0 : index
    %91 = vector.load %arg8[%c0_62, %c0_63] : memref<16x16xf32, #tpu.memory_space<vmem>>, vector<16x16xf32>
    %cst_64 = arith.constant dense<0.000000e+00> : vector<16xf32>
    %92 = vector.multi_reduction <add>, %90, %cst_64 [1] : vector<16x32xf32> to vector<16xf32>
    %93 = vector.shape_cast %92 : vector<16xf32> to vector<16x1xf32>
    %cst_65 = arith.constant 3.200000e+01 : f32
    %94 = vector.broadcast %cst_65 : f32 to vector<16x1xf32>
    %95 = arith.divf %93, %94 : vector<16x1xf32>
    %96 = vector.broadcast %95 : vector<16x1xf32> to vector<16x32xf32>
    %97 = arith.subf %90, %96 : vector<16x32xf32>
    %98 = arith.mulf %97, %97 : vector<16x32xf32>
    %cst_66 = arith.constant dense<0.000000e+00> : vector<16xf32>
    %99 = vector.multi_reduction <add>, %98, %cst_66 [1] : vector<16x32xf32> to vector<16xf32>
    %100 = vector.shape_cast %99 : vector<16xf32> to vector<16x1xf32>
    %cst_67 = arith.constant 3.200000e+01 : f32
    %101 = vector.broadcast %cst_67 : f32 to vector<16x1xf32>
    %102 = arith.divf %100, %101 : vector<16x1xf32>
    %103 = vector.broadcast %95 : vector<16x1xf32> to vector<16x32xf32>
    %104 = arith.subf %90, %103 : vector<16x32xf32>
    %cst_68 = arith.constant 9.99999974E-6 : f32
    %105 = vector.broadcast %cst_68 : f32 to vector<16x1xf32>
    %106 = arith.addf %102, %105 : vector<16x1xf32>
    %107 = math.rsqrt %106 : vector<16x1xf32>
    %108 = vector.broadcast %107 : vector<16x1xf32> to vector<16x32xf32>
    %109 = arith.mulf %104, %108 : vector<16x32xf32>
    %c0_69 = arith.constant 0 : index
    %c0_70 = arith.constant 0 : index
    %c0_71 = arith.constant 0 : index
    %110 = vector.load %arg9[%c0_69, %c0_70, %c0_71] : memref<2x32x96xbf16, #tpu.memory_space<vmem>>, vector<1x32x96xbf16>
    %111 = vector.shape_cast %110 : vector<1x32x96xbf16> to vector<32x96xbf16>
    %112 = arith.truncf %109 : vector<16x32xf32> to vector<16x32xbf16>
    %cst_72 = arith.constant dense<0.000000e+00> : vector<16x96xf32>
    %113 = tpu.matmul %112, %111, %cst_72 {dimension_numbers = #tpu.dot_dimension_numbers<[1], [0], [0], [1], [0, 0, 1, 1], [], []>} : vector<16x32xbf16>, vector<32x96xbf16>, vector<16x96xf32> -> vector<16x96xf32>
    %c0_73 = arith.constant 0 : index
    %c0_74 = arith.constant 0 : index
    %c0_75 = arith.constant 0 : index
    %114 = vector.load %arg10[%c0_73, %c0_74, %c0_75] : memref<2x1x96xf32, #tpu.memory_space<vmem>>, vector<1x1x96xf32>
    %115 = vector.shape_cast %114 : vector<1x1x96xf32> to vector<1x96xf32>
    %116 = vector.broadcast %115 : vector<1x96xf32> to vector<16x96xf32>
    %117 = arith.addf %113, %116 : vector<16x96xf32>
    %cst_76 = arith.constant 0.000000e+00 : f32
    %118 = vector.broadcast %cst_76 : f32 to vector<16x32xf32>
    %119 = vector.extract_strided_slice %117 {offsets = [0, 0], sizes = [16, 8], strides = [1, 1]} : vector<16x96xf32> to vector<16x8xf32>
    %120 = vector.extract_strided_slice %117 {offsets = [0, 32], sizes = [16, 8], strides = [1, 1]} : vector<16x96xf32> to vector<16x8xf32>
    %121 = vector.extract_strided_slice %117 {offsets = [0, 64], sizes = [16, 8], strides = [1, 1]} : vector<16x96xf32> to vector<16x8xf32>
    %122 = arith.truncf %119 : vector<16x8xf32> to vector<16x8xbf16>
    %123 = arith.truncf %120 : vector<16x8xf32> to vector<16x8xbf16>
    %cst_77 = arith.constant dense<0.000000e+00> : vector<16x16xf32>
    %124 = tpu.matmul %122, %123, %cst_77 {dimension_numbers = #tpu.dot_dimension_numbers<[1], [1], [0], [0], [0, 0, 1, 0], [], []>} : vector<16x8xbf16>, vector<16x8xbf16>, vector<16x16xf32> -> vector<16x16xf32>
    %125 = arith.addf %124, %91 : vector<16x16xf32>
    %cst_78 = arith.constant dense<0xFF800000> : vector<16xf32>
    %126 = vector.multi_reduction <maximumf>, %125, %cst_78 [1] : vector<16x16xf32> to vector<16xf32>
    %127 = vector.shape_cast %126 : vector<16xf32> to vector<16x1xf32>
    %128 = vector.broadcast %127 : vector<16x1xf32> to vector<16x16xf32>
    %129 = arith.subf %125, %128 : vector<16x16xf32>
    %130 = math.exp %129 : vector<16x16xf32>
    %cst_79 = arith.constant dense<0.000000e+00> : vector<16xf32>
    %131 = vector.multi_reduction <add>, %130, %cst_79 [1] : vector<16x16xf32> to vector<16xf32>
    %132 = vector.shape_cast %131 : vector<16xf32> to vector<16x1xf32>
    %133 = tpu.reciprocal %132 {approx = true} : vector<16x1xf32> -> vector<16x1xf32>
    %134 = vector.broadcast %133 : vector<16x1xf32> to vector<16x16xf32>
    %135 = arith.mulf %130, %134 : vector<16x16xf32>
    %136 = arith.truncf %135 : vector<16x16xf32> to vector<16x16xbf16>
    %137 = arith.truncf %121 : vector<16x8xf32> to vector<16x8xbf16>
    %cst_80 = arith.constant dense<0.000000e+00> : vector<16x8xf32>
    %138 = tpu.matmul %136, %137, %cst_80 {dimension_numbers = #tpu.dot_dimension_numbers<[1], [0], [0], [1], [0, 0, 1, 1], [], []>} : vector<16x16xbf16>, vector<16x8xbf16>, vector<16x8xf32> -> vector<16x8xf32>
    %c0_81 = arith.constant 0 : index
    %c0_82 = arith.constant 0 : index
    %c0_83 = arith.constant 0 : index
    %c0_84 = arith.constant 0 : index
    %139 = vector.load %arg11[%c0_81, %c0_82, %c0_83, %c0_84] : memref<2x4x8x32xbf16, #tpu.memory_space<vmem>>, vector<1x1x8x32xbf16>
    %140 = vector.shape_cast %139 : vector<1x1x8x32xbf16> to vector<8x32xbf16>
    %141 = arith.truncf %138 : vector<16x8xf32> to vector<16x8xbf16>
    %cst_85 = arith.constant dense<0.000000e+00> : vector<16x32xf32>
    %142 = tpu.matmul %141, %140, %cst_85 {dimension_numbers = #tpu.dot_dimension_numbers<[1], [0], [0], [1], [0, 0, 1, 1], [], []>} : vector<16x8xbf16>, vector<8x32xbf16>, vector<16x32xf32> -> vector<16x32xf32>
    %143 = arith.addf %118, %142 : vector<16x32xf32>
    %144 = vector.extract_strided_slice %117 {offsets = [0, 8], sizes = [16, 8], strides = [1, 1]} : vector<16x96xf32> to vector<16x8xf32>
    %145 = vector.extract_strided_slice %117 {offsets = [0, 40], sizes = [16, 8], strides = [1, 1]} : vector<16x96xf32> to vector<16x8xf32>
    %146 = vector.extract_strided_slice %117 {offsets = [0, 72], sizes = [16, 8], strides = [1, 1]} : vector<16x96xf32> to vector<16x8xf32>
    %147 = arith.truncf %144 : vector<16x8xf32> to vector<16x8xbf16>
    %148 = arith.truncf %145 : vector<16x8xf32> to vector<16x8xbf16>
    %cst_86 = arith.constant dense<0.000000e+00> : vector<16x16xf32>
    %149 = tpu.matmul %147, %148, %cst_86 {dimension_numbers = #tpu.dot_dimension_numbers<[1], [1], [0], [0], [0, 0, 1, 0], [], []>} : vector<16x8xbf16>, vector<16x8xbf16>, vector<16x16xf32> -> vector<16x16xf32>
    %150 = arith.addf %149, %91 : vector<16x16xf32>
    %cst_87 = arith.constant dense<0xFF800000> : vector<16xf32>
    %151 = vector.multi_reduction <maximumf>, %150, %cst_87 [1] : vector<16x16xf32> to vector<16xf32>
    %152 = vector.shape_cast %151 : vector<16xf32> to vector<16x1xf32>
    %153 = vector.broadcast %152 : vector<16x1xf32> to vector<16x16xf32>
    %154 = arith.subf %150, %153 : vector<16x16xf32>
    %155 = math.exp %154 : vector<16x16xf32>
    %cst_88 = arith.constant dense<0.000000e+00> : vector<16xf32>
    %156 = vector.multi_reduction <add>, %155, %cst_88 [1] : vector<16x16xf32> to vector<16xf32>
    %157 = vector.shape_cast %156 : vector<16xf32> to vector<16x1xf32>
    %158 = tpu.reciprocal %157 {approx = true} : vector<16x1xf32> -> vector<16x1xf32>
    %159 = vector.broadcast %158 : vector<16x1xf32> to vector<16x16xf32>
    %160 = arith.mulf %155, %159 : vector<16x16xf32>
    %161 = arith.truncf %160 : vector<16x16xf32> to vector<16x16xbf16>
    %162 = arith.truncf %146 : vector<16x8xf32> to vector<16x8xbf16>
    %cst_89 = arith.constant dense<0.000000e+00> : vector<16x8xf32>
    %163 = tpu.matmul %161, %162, %cst_89 {dimension_numbers = #tpu.dot_dimension_numbers<[1], [0], [0], [1], [0, 0, 1, 1], [], []>} : vector<16x16xbf16>, vector<16x8xbf16>, vector<16x8xf32> -> vector<16x8xf32>
    %c0_90 = arith.constant 0 : index
    %c1_91 = arith.constant 1 : index
    %c0_92 = arith.constant 0 : index
    %c0_93 = arith.constant 0 : index
    %164 = vector.load %arg11[%c0_90, %c1_91, %c0_92, %c0_93] : memref<2x4x8x32xbf16, #tpu.memory_space<vmem>>, vector<1x1x8x32xbf16>
    %165 = vector.shape_cast %164 : vector<1x1x8x32xbf16> to vector<8x32xbf16>
    %166 = arith.truncf %163 : vector<16x8xf32> to vector<16x8xbf16>
    %cst_94 = arith.constant dense<0.000000e+00> : vector<16x32xf32>
    %167 = tpu.matmul %166, %165, %cst_94 {dimension_numbers = #tpu.dot_dimension_numbers<[1], [0], [0], [1], [0, 0, 1, 1], [], []>} : vector<16x8xbf16>, vector<8x32xbf16>, vector<16x32xf32> -> vector<16x32xf32>
    %168 = arith.addf %143, %167 : vector<16x32xf32>
    %169 = vector.extract_strided_slice %117 {offsets = [0, 16], sizes = [16, 8], strides = [1, 1]} : vector<16x96xf32> to vector<16x8xf32>
    %170 = vector.extract_strided_slice %117 {offsets = [0, 48], sizes = [16, 8], strides = [1, 1]} : vector<16x96xf32> to vector<16x8xf32>
    %171 = vector.extract_strided_slice %117 {offsets = [0, 80], sizes = [16, 8], strides = [1, 1]} : vector<16x96xf32> to vector<16x8xf32>
    %172 = arith.truncf %169 : vector<16x8xf32> to vector<16x8xbf16>
    %173 = arith.truncf %170 : vector<16x8xf32> to vector<16x8xbf16>
    %cst_95 = arith.constant dense<0.000000e+00> : vector<16x16xf32>
    %174 = tpu.matmul %172, %173, %cst_95 {dimension_numbers = #tpu.dot_dimension_numbers<[1], [1], [0], [0], [0, 0, 1, 0], [], []>} : vector<16x8xbf16>, vector<16x8xbf16>, vector<16x16xf32> -> vector<16x16xf32>
    %175 = arith.addf %174, %91 : vector<16x16xf32>
    %cst_96 = arith.constant dense<0xFF800000> : vector<16xf32>
    %176 = vector.multi_reduction <maximumf>, %175, %cst_96 [1] : vector<16x16xf32> to vector<16xf32>
    %177 = vector.shape_cast %176 : vector<16xf32> to vector<16x1xf32>
    %178 = vector.broadcast %177 : vector<16x1xf32> to vector<16x16xf32>
    %179 = arith.subf %175, %178 : vector<16x16xf32>
    %180 = math.exp %179 : vector<16x16xf32>
    %cst_97 = arith.constant dense<0.000000e+00> : vector<16xf32>
    %181 = vector.multi_reduction <add>, %180, %cst_97 [1] : vector<16x16xf32> to vector<16xf32>
    %182 = vector.shape_cast %181 : vector<16xf32> to vector<16x1xf32>
    %183 = tpu.reciprocal %182 {approx = true} : vector<16x1xf32> -> vector<16x1xf32>
    %184 = vector.broadcast %183 : vector<16x1xf32> to vector<16x16xf32>
    %185 = arith.mulf %180, %184 : vector<16x16xf32>
    %186 = arith.truncf %185 : vector<16x16xf32> to vector<16x16xbf16>
    %187 = arith.truncf %171 : vector<16x8xf32> to vector<16x8xbf16>
    %cst_98 = arith.constant dense<0.000000e+00> : vector<16x8xf32>
    %188 = tpu.matmul %186, %187, %cst_98 {dimension_numbers = #tpu.dot_dimension_numbers<[1], [0], [0], [1], [0, 0, 1, 1], [], []>} : vector<16x16xbf16>, vector<16x8xbf16>, vector<16x8xf32> -> vector<16x8xf32>
    %c0_99 = arith.constant 0 : index
    %c2_100 = arith.constant 2 : index
    %c0_101 = arith.constant 0 : index
    %c0_102 = arith.constant 0 : index
    %189 = vector.load %arg11[%c0_99, %c2_100, %c0_101, %c0_102] : memref<2x4x8x32xbf16, #tpu.memory_space<vmem>>, vector<1x1x8x32xbf16>
    %190 = vector.shape_cast %189 : vector<1x1x8x32xbf16> to vector<8x32xbf16>
    %191 = arith.truncf %188 : vector<16x8xf32> to vector<16x8xbf16>
    %cst_103 = arith.constant dense<0.000000e+00> : vector<16x32xf32>
    %192 = tpu.matmul %191, %190, %cst_103 {dimension_numbers = #tpu.dot_dimension_numbers<[1], [0], [0], [1], [0, 0, 1, 1], [], []>} : vector<16x8xbf16>, vector<8x32xbf16>, vector<16x32xf32> -> vector<16x32xf32>
    %193 = arith.addf %168, %192 : vector<16x32xf32>
    %194 = vector.extract_strided_slice %117 {offsets = [0, 24], sizes = [16, 8], strides = [1, 1]} : vector<16x96xf32> to vector<16x8xf32>
    %195 = vector.extract_strided_slice %117 {offsets = [0, 56], sizes = [16, 8], strides = [1, 1]} : vector<16x96xf32> to vector<16x8xf32>
    %196 = vector.extract_strided_slice %117 {offsets = [0, 88], sizes = [16, 8], strides = [1, 1]} : vector<16x96xf32> to vector<16x8xf32>
    %197 = arith.truncf %194 : vector<16x8xf32> to vector<16x8xbf16>
    %198 = arith.truncf %195 : vector<16x8xf32> to vector<16x8xbf16>
    %cst_104 = arith.constant dense<0.000000e+00> : vector<16x16xf32>
    %199 = tpu.matmul %197, %198, %cst_104 {dimension_numbers = #tpu.dot_dimension_numbers<[1], [1], [0], [0], [0, 0, 1, 0], [], []>} : vector<16x8xbf16>, vector<16x8xbf16>, vector<16x16xf32> -> vector<16x16xf32>
    %200 = arith.addf %199, %91 : vector<16x16xf32>
    %cst_105 = arith.constant dense<0xFF800000> : vector<16xf32>
    %201 = vector.multi_reduction <maximumf>, %200, %cst_105 [1] : vector<16x16xf32> to vector<16xf32>
    %202 = vector.shape_cast %201 : vector<16xf32> to vector<16x1xf32>
    %203 = vector.broadcast %202 : vector<16x1xf32> to vector<16x16xf32>
    %204 = arith.subf %200, %203 : vector<16x16xf32>
    %205 = math.exp %204 : vector<16x16xf32>
    %cst_106 = arith.constant dense<0.000000e+00> : vector<16xf32>
    %206 = vector.multi_reduction <add>, %205, %cst_106 [1] : vector<16x16xf32> to vector<16xf32>
    %207 = vector.shape_cast %206 : vector<16xf32> to vector<16x1xf32>
    %208 = tpu.reciprocal %207 {approx = true} : vector<16x1xf32> -> vector<16x1xf32>
    %209 = vector.broadcast %208 : vector<16x1xf32> to vector<16x16xf32>
    %210 = arith.mulf %205, %209 : vector<16x16xf32>
    %211 = arith.truncf %210 : vector<16x16xf32> to vector<16x16xbf16>
    %212 = arith.truncf %196 : vector<16x8xf32> to vector<16x8xbf16>
    %cst_107 = arith.constant dense<0.000000e+00> : vector<16x8xf32>
    %213 = tpu.matmul %211, %212, %cst_107 {dimension_numbers = #tpu.dot_dimension_numbers<[1], [0], [0], [1], [0, 0, 1, 1], [], []>} : vector<16x16xbf16>, vector<16x8xbf16>, vector<16x8xf32> -> vector<16x8xf32>
    %c0_108 = arith.constant 0 : index
    %c3 = arith.constant 3 : index
    %c0_109 = arith.constant 0 : index
    %c0_110 = arith.constant 0 : index
    %214 = vector.load %arg11[%c0_108, %c3, %c0_109, %c0_110] : memref<2x4x8x32xbf16, #tpu.memory_space<vmem>>, vector<1x1x8x32xbf16>
    %215 = vector.shape_cast %214 : vector<1x1x8x32xbf16> to vector<8x32xbf16>
    %216 = arith.truncf %213 : vector<16x8xf32> to vector<16x8xbf16>
    %cst_111 = arith.constant dense<0.000000e+00> : vector<16x32xf32>
    %217 = tpu.matmul %216, %215, %cst_111 {dimension_numbers = #tpu.dot_dimension_numbers<[1], [0], [0], [1], [0, 0, 1, 1], [], []>} : vector<16x8xbf16>, vector<8x32xbf16>, vector<16x32xf32> -> vector<16x32xf32>
    %218 = arith.addf %193, %217 : vector<16x32xf32>
    %219 = arith.addf %90, %218 : vector<16x32xf32>
    %c0_112 = arith.constant 0 : index
    %c0_113 = arith.constant 0 : index
    %c0_114 = arith.constant 0 : index
    %220 = vector.load %arg12[%c0_112, %c0_113, %c0_114] : memref<2x1x32xf32, #tpu.memory_space<vmem>>, vector<1x1x32xf32>
    %221 = vector.shape_cast %220 : vector<1x1x32xf32> to vector<1x32xf32>
    %222 = vector.broadcast %221 : vector<1x32xf32> to vector<16x32xf32>
    %223 = arith.addf %219, %222 : vector<16x32xf32>
    %cst_115 = arith.constant dense<0.000000e+00> : vector<16xf32>
    %224 = vector.multi_reduction <add>, %223, %cst_115 [1] : vector<16x32xf32> to vector<16xf32>
    %225 = vector.shape_cast %224 : vector<16xf32> to vector<16x1xf32>
    %cst_116 = arith.constant 3.200000e+01 : f32
    %226 = vector.broadcast %cst_116 : f32 to vector<16x1xf32>
    %227 = arith.divf %225, %226 : vector<16x1xf32>
    %228 = vector.broadcast %227 : vector<16x1xf32> to vector<16x32xf32>
    %229 = arith.subf %223, %228 : vector<16x32xf32>
    %230 = arith.mulf %229, %229 : vector<16x32xf32>
    %cst_117 = arith.constant dense<0.000000e+00> : vector<16xf32>
    %231 = vector.multi_reduction <add>, %230, %cst_117 [1] : vector<16x32xf32> to vector<16xf32>
    %232 = vector.shape_cast %231 : vector<16xf32> to vector<16x1xf32>
    %cst_118 = arith.constant 3.200000e+01 : f32
    %233 = vector.broadcast %cst_118 : f32 to vector<16x1xf32>
    %234 = arith.divf %232, %233 : vector<16x1xf32>
    %235 = vector.broadcast %227 : vector<16x1xf32> to vector<16x32xf32>
    %236 = arith.subf %223, %235 : vector<16x32xf32>
    %cst_119 = arith.constant 9.99999974E-6 : f32
    %237 = vector.broadcast %cst_119 : f32 to vector<16x1xf32>
    %238 = arith.addf %234, %237 : vector<16x1xf32>
    %239 = math.rsqrt %238 : vector<16x1xf32>
    %240 = vector.broadcast %239 : vector<16x1xf32> to vector<16x32xf32>
    %241 = arith.mulf %236, %240 : vector<16x32xf32>
    %c0_120 = arith.constant 0 : index
    %c0_121 = arith.constant 0 : index
    %c0_122 = arith.constant 0 : index
    %242 = vector.load %arg13[%c0_120, %c0_121, %c0_122] : memref<2x32x128xbf16, #tpu.memory_space<vmem>>, vector<1x32x128xbf16>
    %243 = vector.shape_cast %242 : vector<1x32x128xbf16> to vector<32x128xbf16>
    %244 = arith.truncf %241 : vector<16x32xf32> to vector<16x32xbf16>
    %cst_123 = arith.constant dense<0.000000e+00> : vector<16x128xf32>
    %245 = tpu.matmul %244, %243, %cst_123 {dimension_numbers = #tpu.dot_dimension_numbers<[1], [0], [0], [1], [0, 0, 1, 1], [], []>} : vector<16x32xbf16>, vector<32x128xbf16>, vector<16x128xf32> -> vector<16x128xf32>
    %c0_124 = arith.constant 0 : index
    %c0_125 = arith.constant 0 : index
    %c0_126 = arith.constant 0 : index
    %246 = vector.load %arg14[%c0_124, %c0_125, %c0_126] : memref<2x1x128xf32, #tpu.memory_space<vmem>>, vector<1x1x128xf32>
    %247 = vector.shape_cast %246 : vector<1x1x128xf32> to vector<1x128xf32>
    %248 = vector.broadcast %247 : vector<1x128xf32> to vector<16x128xf32>
    %249 = arith.addf %245, %248 : vector<16x128xf32>
    %250 = arith.mulf %249, %249 : vector<16x128xf32>
    %251 = arith.mulf %249, %250 : vector<16x128xf32>
    %cst_127 = arith.constant 4.471500e-02 : f32
    %252 = vector.broadcast %cst_127 : f32 to vector<16x128xf32>
    %253 = arith.mulf %252, %251 : vector<16x128xf32>
    %254 = arith.addf %249, %253 : vector<16x128xf32>
    %cst_128 = arith.constant 0.797884583 : f32
    %255 = vector.broadcast %cst_128 : f32 to vector<16x128xf32>
    %256 = arith.mulf %255, %254 : vector<16x128xf32>
    %257 = math.tanh %256 : vector<16x128xf32>
    %cst_129 = arith.constant 1.000000e+00 : f32
    %258 = vector.broadcast %cst_129 : f32 to vector<16x128xf32>
    %259 = arith.addf %258, %257 : vector<16x128xf32>
    %cst_130 = arith.constant 5.000000e-01 : f32
    %260 = vector.broadcast %cst_130 : f32 to vector<16x128xf32>
    %261 = arith.mulf %260, %259 : vector<16x128xf32>
    %262 = arith.mulf %249, %261 : vector<16x128xf32>
    %c0_131 = arith.constant 0 : index
    %c0_132 = arith.constant 0 : index
    %c0_133 = arith.constant 0 : index
    %263 = vector.load %arg15[%c0_131, %c0_132, %c0_133] : memref<2x128x32xbf16, #tpu.memory_space<vmem>>, vector<1x128x32xbf16>
    %264 = vector.shape_cast %263 : vector<1x128x32xbf16> to vector<128x32xbf16>
    %265 = arith.truncf %262 : vector<16x128xf32> to vector<16x128xbf16>
    %cst_134 = arith.constant dense<0.000000e+00> : vector<16x32xf32>
    %266 = tpu.matmul %265, %264, %cst_134 {dimension_numbers = #tpu.dot_dimension_numbers<[1], [0], [0], [1], [0, 0, 1, 1], [], []>} : vector<16x128xbf16>, vector<128x32xbf16>, vector<16x32xf32> -> vector<16x32xf32>
    %267 = arith.addf %223, %266 : vector<16x32xf32>
    %c0_135 = arith.constant 0 : index
    %c0_136 = arith.constant 0 : index
    %c0_137 = arith.constant 0 : index
    %268 = vector.load %arg16[%c0_135, %c0_136, %c0_137] : memref<2x1x32xf32, #tpu.memory_space<vmem>>, vector<1x1x32xf32>
    %269 = vector.shape_cast %268 : vector<1x1x32xf32> to vector<1x32xf32>
    %270 = vector.broadcast %269 : vector<1x32xf32> to vector<16x32xf32>
    %271 = arith.addf %267, %270 : vector<16x32xf32>
    %cst_138 = arith.constant dense<0.000000e+00> : vector<16xf32>
    %272 = vector.multi_reduction <add>, %271, %cst_138 [1] : vector<16x32xf32> to vector<16xf32>
    %273 = vector.shape_cast %272 : vector<16xf32> to vector<16x1xf32>
    %cst_139 = arith.constant 3.200000e+01 : f32
    %274 = vector.broadcast %cst_139 : f32 to vector<16x1xf32>
    %275 = arith.divf %273, %274 : vector<16x1xf32>
    %276 = vector.broadcast %275 : vector<16x1xf32> to vector<16x32xf32>
    %277 = arith.subf %271, %276 : vector<16x32xf32>
    %278 = arith.mulf %277, %277 : vector<16x32xf32>
    %cst_140 = arith.constant dense<0.000000e+00> : vector<16xf32>
    %279 = vector.multi_reduction <add>, %278, %cst_140 [1] : vector<16x32xf32> to vector<16xf32>
    %280 = vector.shape_cast %279 : vector<16xf32> to vector<16x1xf32>
    %cst_141 = arith.constant 3.200000e+01 : f32
    %281 = vector.broadcast %cst_141 : f32 to vector<16x1xf32>
    %282 = arith.divf %280, %281 : vector<16x1xf32>
    %283 = vector.broadcast %275 : vector<16x1xf32> to vector<16x32xf32>
    %284 = arith.subf %271, %283 : vector<16x32xf32>
    %cst_142 = arith.constant 9.99999974E-6 : f32
    %285 = vector.broadcast %cst_142 : f32 to vector<16x1xf32>
    %286 = arith.addf %282, %285 : vector<16x1xf32>
    %287 = math.rsqrt %286 : vector<16x1xf32>
    %288 = vector.broadcast %287 : vector<16x1xf32> to vector<16x32xf32>
    %289 = arith.mulf %284, %288 : vector<16x32xf32>
    %c1_143 = arith.constant 1 : index
    %c0_144 = arith.constant 0 : index
    %c0_145 = arith.constant 0 : index
    %290 = vector.load %arg9[%c1_143, %c0_144, %c0_145] : memref<2x32x96xbf16, #tpu.memory_space<vmem>>, vector<1x32x96xbf16>
    %291 = vector.shape_cast %290 : vector<1x32x96xbf16> to vector<32x96xbf16>
    %292 = arith.truncf %289 : vector<16x32xf32> to vector<16x32xbf16>
    %cst_146 = arith.constant dense<0.000000e+00> : vector<16x96xf32>
    %293 = tpu.matmul %292, %291, %cst_146 {dimension_numbers = #tpu.dot_dimension_numbers<[1], [0], [0], [1], [0, 0, 1, 1], [], []>} : vector<16x32xbf16>, vector<32x96xbf16>, vector<16x96xf32> -> vector<16x96xf32>
    %c1_147 = arith.constant 1 : index
    %c0_148 = arith.constant 0 : index
    %c0_149 = arith.constant 0 : index
    %294 = vector.load %arg10[%c1_147, %c0_148, %c0_149] : memref<2x1x96xf32, #tpu.memory_space<vmem>>, vector<1x1x96xf32>
    %295 = vector.shape_cast %294 : vector<1x1x96xf32> to vector<1x96xf32>
    %296 = vector.broadcast %295 : vector<1x96xf32> to vector<16x96xf32>
    %297 = arith.addf %293, %296 : vector<16x96xf32>
    %cst_150 = arith.constant 0.000000e+00 : f32
    %298 = vector.broadcast %cst_150 : f32 to vector<16x32xf32>
    %299 = vector.extract_strided_slice %297 {offsets = [0, 0], sizes = [16, 8], strides = [1, 1]} : vector<16x96xf32> to vector<16x8xf32>
    %300 = vector.extract_strided_slice %297 {offsets = [0, 32], sizes = [16, 8], strides = [1, 1]} : vector<16x96xf32> to vector<16x8xf32>
    %301 = vector.extract_strided_slice %297 {offsets = [0, 64], sizes = [16, 8], strides = [1, 1]} : vector<16x96xf32> to vector<16x8xf32>
    %302 = arith.truncf %299 : vector<16x8xf32> to vector<16x8xbf16>
    %303 = arith.truncf %300 : vector<16x8xf32> to vector<16x8xbf16>
    %cst_151 = arith.constant dense<0.000000e+00> : vector<16x16xf32>
    %304 = tpu.matmul %302, %303, %cst_151 {dimension_numbers = #tpu.dot_dimension_numbers<[1], [1], [0], [0], [0, 0, 1, 0], [], []>} : vector<16x8xbf16>, vector<16x8xbf16>, vector<16x16xf32> -> vector<16x16xf32>
    %305 = arith.addf %304, %91 : vector<16x16xf32>
    %cst_152 = arith.constant dense<0xFF800000> : vector<16xf32>
    %306 = vector.multi_reduction <maximumf>, %305, %cst_152 [1] : vector<16x16xf32> to vector<16xf32>
    %307 = vector.shape_cast %306 : vector<16xf32> to vector<16x1xf32>
    %308 = vector.broadcast %307 : vector<16x1xf32> to vector<16x16xf32>
    %309 = arith.subf %305, %308 : vector<16x16xf32>
    %310 = math.exp %309 : vector<16x16xf32>
    %cst_153 = arith.constant dense<0.000000e+00> : vector<16xf32>
    %311 = vector.multi_reduction <add>, %310, %cst_153 [1] : vector<16x16xf32> to vector<16xf32>
    %312 = vector.shape_cast %311 : vector<16xf32> to vector<16x1xf32>
    %313 = tpu.reciprocal %312 {approx = true} : vector<16x1xf32> -> vector<16x1xf32>
    %314 = vector.broadcast %313 : vector<16x1xf32> to vector<16x16xf32>
    %315 = arith.mulf %310, %314 : vector<16x16xf32>
    %316 = arith.truncf %315 : vector<16x16xf32> to vector<16x16xbf16>
    %317 = arith.truncf %301 : vector<16x8xf32> to vector<16x8xbf16>
    %cst_154 = arith.constant dense<0.000000e+00> : vector<16x8xf32>
    %318 = tpu.matmul %316, %317, %cst_154 {dimension_numbers = #tpu.dot_dimension_numbers<[1], [0], [0], [1], [0, 0, 1, 1], [], []>} : vector<16x16xbf16>, vector<16x8xbf16>, vector<16x8xf32> -> vector<16x8xf32>
    %c1_155 = arith.constant 1 : index
    %c0_156 = arith.constant 0 : index
    %c0_157 = arith.constant 0 : index
    %c0_158 = arith.constant 0 : index
    %319 = vector.load %arg11[%c1_155, %c0_156, %c0_157, %c0_158] : memref<2x4x8x32xbf16, #tpu.memory_space<vmem>>, vector<1x1x8x32xbf16>
    %320 = vector.shape_cast %319 : vector<1x1x8x32xbf16> to vector<8x32xbf16>
    %321 = arith.truncf %318 : vector<16x8xf32> to vector<16x8xbf16>
    %cst_159 = arith.constant dense<0.000000e+00> : vector<16x32xf32>
    %322 = tpu.matmul %321, %320, %cst_159 {dimension_numbers = #tpu.dot_dimension_numbers<[1], [0], [0], [1], [0, 0, 1, 1], [], []>} : vector<16x8xbf16>, vector<8x32xbf16>, vector<16x32xf32> -> vector<16x32xf32>
    %323 = arith.addf %298, %322 : vector<16x32xf32>
    %324 = vector.extract_strided_slice %297 {offsets = [0, 8], sizes = [16, 8], strides = [1, 1]} : vector<16x96xf32> to vector<16x8xf32>
    %325 = vector.extract_strided_slice %297 {offsets = [0, 40], sizes = [16, 8], strides = [1, 1]} : vector<16x96xf32> to vector<16x8xf32>
    %326 = vector.extract_strided_slice %297 {offsets = [0, 72], sizes = [16, 8], strides = [1, 1]} : vector<16x96xf32> to vector<16x8xf32>
    %327 = arith.truncf %324 : vector<16x8xf32> to vector<16x8xbf16>
    %328 = arith.truncf %325 : vector<16x8xf32> to vector<16x8xbf16>
    %cst_160 = arith.constant dense<0.000000e+00> : vector<16x16xf32>
    %329 = tpu.matmul %327, %328, %cst_160 {dimension_numbers = #tpu.dot_dimension_numbers<[1], [1], [0], [0], [0, 0, 1, 0], [], []>} : vector<16x8xbf16>, vector<16x8xbf16>, vector<16x16xf32> -> vector<16x16xf32>
    %330 = arith.addf %329, %91 : vector<16x16xf32>
    %cst_161 = arith.constant dense<0xFF800000> : vector<16xf32>
    %331 = vector.multi_reduction <maximumf>, %330, %cst_161 [1] : vector<16x16xf32> to vector<16xf32>
    %332 = vector.shape_cast %331 : vector<16xf32> to vector<16x1xf32>
    %333 = vector.broadcast %332 : vector<16x1xf32> to vector<16x16xf32>
    %334 = arith.subf %330, %333 : vector<16x16xf32>
    %335 = math.exp %334 : vector<16x16xf32>
    %cst_162 = arith.constant dense<0.000000e+00> : vector<16xf32>
    %336 = vector.multi_reduction <add>, %335, %cst_162 [1] : vector<16x16xf32> to vector<16xf32>
    %337 = vector.shape_cast %336 : vector<16xf32> to vector<16x1xf32>
    %338 = tpu.reciprocal %337 {approx = true} : vector<16x1xf32> -> vector<16x1xf32>
    %339 = vector.broadcast %338 : vector<16x1xf32> to vector<16x16xf32>
    %340 = arith.mulf %335, %339 : vector<16x16xf32>
    %341 = arith.truncf %340 : vector<16x16xf32> to vector<16x16xbf16>
    %342 = arith.truncf %326 : vector<16x8xf32> to vector<16x8xbf16>
    %cst_163 = arith.constant dense<0.000000e+00> : vector<16x8xf32>
    %343 = tpu.matmul %341, %342, %cst_163 {dimension_numbers = #tpu.dot_dimension_numbers<[1], [0], [0], [1], [0, 0, 1, 1], [], []>} : vector<16x16xbf16>, vector<16x8xbf16>, vector<16x8xf32> -> vector<16x8xf32>
    %c1_164 = arith.constant 1 : index
    %c1_165 = arith.constant 1 : index
    %c0_166 = arith.constant 0 : index
    %c0_167 = arith.constant 0 : index
    %344 = vector.load %arg11[%c1_164, %c1_165, %c0_166, %c0_167] : memref<2x4x8x32xbf16, #tpu.memory_space<vmem>>, vector<1x1x8x32xbf16>
    %345 = vector.shape_cast %344 : vector<1x1x8x32xbf16> to vector<8x32xbf16>
    %346 = arith.truncf %343 : vector<16x8xf32> to vector<16x8xbf16>
    %cst_168 = arith.constant dense<0.000000e+00> : vector<16x32xf32>
    %347 = tpu.matmul %346, %345, %cst_168 {dimension_numbers = #tpu.dot_dimension_numbers<[1], [0], [0], [1], [0, 0, 1, 1], [], []>} : vector<16x8xbf16>, vector<8x32xbf16>, vector<16x32xf32> -> vector<16x32xf32>
    %348 = arith.addf %323, %347 : vector<16x32xf32>
    %349 = vector.extract_strided_slice %297 {offsets = [0, 16], sizes = [16, 8], strides = [1, 1]} : vector<16x96xf32> to vector<16x8xf32>
    %350 = vector.extract_strided_slice %297 {offsets = [0, 48], sizes = [16, 8], strides = [1, 1]} : vector<16x96xf32> to vector<16x8xf32>
    %351 = vector.extract_strided_slice %297 {offsets = [0, 80], sizes = [16, 8], strides = [1, 1]} : vector<16x96xf32> to vector<16x8xf32>
    %352 = arith.truncf %349 : vector<16x8xf32> to vector<16x8xbf16>
    %353 = arith.truncf %350 : vector<16x8xf32> to vector<16x8xbf16>
    %cst_169 = arith.constant dense<0.000000e+00> : vector<16x16xf32>
    %354 = tpu.matmul %352, %353, %cst_169 {dimension_numbers = #tpu.dot_dimension_numbers<[1], [1], [0], [0], [0, 0, 1, 0], [], []>} : vector<16x8xbf16>, vector<16x8xbf16>, vector<16x16xf32> -> vector<16x16xf32>
    %355 = arith.addf %354, %91 : vector<16x16xf32>
    %cst_170 = arith.constant dense<0xFF800000> : vector<16xf32>
    %356 = vector.multi_reduction <maximumf>, %355, %cst_170 [1] : vector<16x16xf32> to vector<16xf32>
    %357 = vector.shape_cast %356 : vector<16xf32> to vector<16x1xf32>
    %358 = vector.broadcast %357 : vector<16x1xf32> to vector<16x16xf32>
    %359 = arith.subf %355, %358 : vector<16x16xf32>
    %360 = math.exp %359 : vector<16x16xf32>
    %cst_171 = arith.constant dense<0.000000e+00> : vector<16xf32>
    %361 = vector.multi_reduction <add>, %360, %cst_171 [1] : vector<16x16xf32> to vector<16xf32>
    %362 = vector.shape_cast %361 : vector<16xf32> to vector<16x1xf32>
    %363 = tpu.reciprocal %362 {approx = true} : vector<16x1xf32> -> vector<16x1xf32>
    %364 = vector.broadcast %363 : vector<16x1xf32> to vector<16x16xf32>
    %365 = arith.mulf %360, %364 : vector<16x16xf32>
    %366 = arith.truncf %365 : vector<16x16xf32> to vector<16x16xbf16>
    %367 = arith.truncf %351 : vector<16x8xf32> to vector<16x8xbf16>
    %cst_172 = arith.constant dense<0.000000e+00> : vector<16x8xf32>
    %368 = tpu.matmul %366, %367, %cst_172 {dimension_numbers = #tpu.dot_dimension_numbers<[1], [0], [0], [1], [0, 0, 1, 1], [], []>} : vector<16x16xbf16>, vector<16x8xbf16>, vector<16x8xf32> -> vector<16x8xf32>
    %c1_173 = arith.constant 1 : index
    %c2_174 = arith.constant 2 : index
    %c0_175 = arith.constant 0 : index
    %c0_176 = arith.constant 0 : index
    %369 = vector.load %arg11[%c1_173, %c2_174, %c0_175, %c0_176] : memref<2x4x8x32xbf16, #tpu.memory_space<vmem>>, vector<1x1x8x32xbf16>
    %370 = vector.shape_cast %369 : vector<1x1x8x32xbf16> to vector<8x32xbf16>
    %371 = arith.truncf %368 : vector<16x8xf32> to vector<16x8xbf16>
    %cst_177 = arith.constant dense<0.000000e+00> : vector<16x32xf32>
    %372 = tpu.matmul %371, %370, %cst_177 {dimension_numbers = #tpu.dot_dimension_numbers<[1], [0], [0], [1], [0, 0, 1, 1], [], []>} : vector<16x8xbf16>, vector<8x32xbf16>, vector<16x32xf32> -> vector<16x32xf32>
    %373 = arith.addf %348, %372 : vector<16x32xf32>
    %374 = vector.extract_strided_slice %297 {offsets = [0, 24], sizes = [16, 8], strides = [1, 1]} : vector<16x96xf32> to vector<16x8xf32>
    %375 = vector.extract_strided_slice %297 {offsets = [0, 56], sizes = [16, 8], strides = [1, 1]} : vector<16x96xf32> to vector<16x8xf32>
    %376 = vector.extract_strided_slice %297 {offsets = [0, 88], sizes = [16, 8], strides = [1, 1]} : vector<16x96xf32> to vector<16x8xf32>
    %377 = arith.truncf %374 : vector<16x8xf32> to vector<16x8xbf16>
    %378 = arith.truncf %375 : vector<16x8xf32> to vector<16x8xbf16>
    %cst_178 = arith.constant dense<0.000000e+00> : vector<16x16xf32>
    %379 = tpu.matmul %377, %378, %cst_178 {dimension_numbers = #tpu.dot_dimension_numbers<[1], [1], [0], [0], [0, 0, 1, 0], [], []>} : vector<16x8xbf16>, vector<16x8xbf16>, vector<16x16xf32> -> vector<16x16xf32>
    %380 = arith.addf %379, %91 : vector<16x16xf32>
    %cst_179 = arith.constant dense<0xFF800000> : vector<16xf32>
    %381 = vector.multi_reduction <maximumf>, %380, %cst_179 [1] : vector<16x16xf32> to vector<16xf32>
    %382 = vector.shape_cast %381 : vector<16xf32> to vector<16x1xf32>
    %383 = vector.broadcast %382 : vector<16x1xf32> to vector<16x16xf32>
    %384 = arith.subf %380, %383 : vector<16x16xf32>
    %385 = math.exp %384 : vector<16x16xf32>
    %cst_180 = arith.constant dense<0.000000e+00> : vector<16xf32>
    %386 = vector.multi_reduction <add>, %385, %cst_180 [1] : vector<16x16xf32> to vector<16xf32>
    %387 = vector.shape_cast %386 : vector<16xf32> to vector<16x1xf32>
    %388 = tpu.reciprocal %387 {approx = true} : vector<16x1xf32> -> vector<16x1xf32>
    %389 = vector.broadcast %388 : vector<16x1xf32> to vector<16x16xf32>
    %390 = arith.mulf %385, %389 : vector<16x16xf32>
    %391 = arith.truncf %390 : vector<16x16xf32> to vector<16x16xbf16>
    %392 = arith.truncf %376 : vector<16x8xf32> to vector<16x8xbf16>
    %cst_181 = arith.constant dense<0.000000e+00> : vector<16x8xf32>
    %393 = tpu.matmul %391, %392, %cst_181 {dimension_numbers = #tpu.dot_dimension_numbers<[1], [0], [0], [1], [0, 0, 1, 1], [], []>} : vector<16x16xbf16>, vector<16x8xbf16>, vector<16x8xf32> -> vector<16x8xf32>
    %c1_182 = arith.constant 1 : index
    %c3_183 = arith.constant 3 : index
    %c0_184 = arith.constant 0 : index
    %c0_185 = arith.constant 0 : index
    %394 = vector.load %arg11[%c1_182, %c3_183, %c0_184, %c0_185] : memref<2x4x8x32xbf16, #tpu.memory_space<vmem>>, vector<1x1x8x32xbf16>
    %395 = vector.shape_cast %394 : vector<1x1x8x32xbf16> to vector<8x32xbf16>
    %396 = arith.truncf %393 : vector<16x8xf32> to vector<16x8xbf16>
    %cst_186 = arith.constant dense<0.000000e+00> : vector<16x32xf32>
    %397 = tpu.matmul %396, %395, %cst_186 {dimension_numbers = #tpu.dot_dimension_numbers<[1], [0], [0], [1], [0, 0, 1, 1], [], []>} : vector<16x8xbf16>, vector<8x32xbf16>, vector<16x32xf32> -> vector<16x32xf32>
    %398 = arith.addf %373, %397 : vector<16x32xf32>
    %399 = arith.addf %271, %398 : vector<16x32xf32>
    %c1_187 = arith.constant 1 : index
    %c0_188 = arith.constant 0 : index
    %c0_189 = arith.constant 0 : index
    %400 = vector.load %arg12[%c1_187, %c0_188, %c0_189] : memref<2x1x32xf32, #tpu.memory_space<vmem>>, vector<1x1x32xf32>
    %401 = vector.shape_cast %400 : vector<1x1x32xf32> to vector<1x32xf32>
    %402 = vector.broadcast %401 : vector<1x32xf32> to vector<16x32xf32>
    %403 = arith.addf %399, %402 : vector<16x32xf32>
    %cst_190 = arith.constant dense<0.000000e+00> : vector<16xf32>
    %404 = vector.multi_reduction <add>, %403, %cst_190 [1] : vector<16x32xf32> to vector<16xf32>
    %405 = vector.shape_cast %404 : vector<16xf32> to vector<16x1xf32>
    %cst_191 = arith.constant 3.200000e+01 : f32
    %406 = vector.broadcast %cst_191 : f32 to vector<16x1xf32>
    %407 = arith.divf %405, %406 : vector<16x1xf32>
    %408 = vector.broadcast %407 : vector<16x1xf32> to vector<16x32xf32>
    %409 = arith.subf %403, %408 : vector<16x32xf32>
    %410 = arith.mulf %409, %409 : vector<16x32xf32>
    %cst_192 = arith.constant dense<0.000000e+00> : vector<16xf32>
    %411 = vector.multi_reduction <add>, %410, %cst_192 [1] : vector<16x32xf32> to vector<16xf32>
    %412 = vector.shape_cast %411 : vector<16xf32> to vector<16x1xf32>
    %cst_193 = arith.constant 3.200000e+01 : f32
    %413 = vector.broadcast %cst_193 : f32 to vector<16x1xf32>
    %414 = arith.divf %412, %413 : vector<16x1xf32>
    %415 = vector.broadcast %407 : vector<16x1xf32> to vector<16x32xf32>
    %416 = arith.subf %403, %415 : vector<16x32xf32>
    %cst_194 = arith.constant 9.99999974E-6 : f32
    %417 = vector.broadcast %cst_194 : f32 to vector<16x1xf32>
    %418 = arith.addf %414, %417 : vector<16x1xf32>
    %419 = math.rsqrt %418 : vector<16x1xf32>
    %420 = vector.broadcast %419 : vector<16x1xf32> to vector<16x32xf32>
    %421 = arith.mulf %416, %420 : vector<16x32xf32>
    %c1_195 = arith.constant 1 : index
    %c0_196 = arith.constant 0 : index
    %c0_197 = arith.constant 0 : index
    %422 = vector.load %arg13[%c1_195, %c0_196, %c0_197] : memref<2x32x128xbf16, #tpu.memory_space<vmem>>, vector<1x32x128xbf16>
    %423 = vector.shape_cast %422 : vector<1x32x128xbf16> to vector<32x128xbf16>
    %424 = arith.truncf %421 : vector<16x32xf32> to vector<16x32xbf16>
    %cst_198 = arith.constant dense<0.000000e+00> : vector<16x128xf32>
    %425 = tpu.matmul %424, %423, %cst_198 {dimension_numbers = #tpu.dot_dimension_numbers<[1], [0], [0], [1], [0, 0, 1, 1], [], []>} : vector<16x32xbf16>, vector<32x128xbf16>, vector<16x128xf32> -> vector<16x128xf32>
    %c1_199 = arith.constant 1 : index
    %c0_200 = arith.constant 0 : index
    %c0_201 = arith.constant 0 : index
    %426 = vector.load %arg14[%c1_199, %c0_200, %c0_201] : memref<2x1x128xf32, #tpu.memory_space<vmem>>, vector<1x1x128xf32>
    %427 = vector.shape_cast %426 : vector<1x1x128xf32> to vector<1x128xf32>
    %428 = vector.broadcast %427 : vector<1x128xf32> to vector<16x128xf32>
    %429 = arith.addf %425, %428 : vector<16x128xf32>
    %430 = arith.mulf %429, %429 : vector<16x128xf32>
    %431 = arith.mulf %429, %430 : vector<16x128xf32>
    %cst_202 = arith.constant 4.471500e-02 : f32
    %432 = vector.broadcast %cst_202 : f32 to vector<16x128xf32>
    %433 = arith.mulf %432, %431 : vector<16x128xf32>
    %434 = arith.addf %429, %433 : vector<16x128xf32>
    %cst_203 = arith.constant 0.797884583 : f32
    %435 = vector.broadcast %cst_203 : f32 to vector<16x128xf32>
    %436 = arith.mulf %435, %434 : vector<16x128xf32>
    %437 = math.tanh %436 : vector<16x128xf32>
    %cst_204 = arith.constant 1.000000e+00 : f32
    %438 = vector.broadcast %cst_204 : f32 to vector<16x128xf32>
    %439 = arith.addf %438, %437 : vector<16x128xf32>
    %cst_205 = arith.constant 5.000000e-01 : f32
    %440 = vector.broadcast %cst_205 : f32 to vector<16x128xf32>
    %441 = arith.mulf %440, %439 : vector<16x128xf32>
    %442 = arith.mulf %429, %441 : vector<16x128xf32>
    %c1_206 = arith.constant 1 : index
    %c0_207 = arith.constant 0 : index
    %c0_208 = arith.constant 0 : index
    %443 = vector.load %arg15[%c1_206, %c0_207, %c0_208] : memref<2x128x32xbf16, #tpu.memory_space<vmem>>, vector<1x128x32xbf16>
    %444 = vector.shape_cast %443 : vector<1x128x32xbf16> to vector<128x32xbf16>
    %445 = arith.truncf %442 : vector<16x128xf32> to vector<16x128xbf16>
    %cst_209 = arith.constant dense<0.000000e+00> : vector<16x32xf32>
    %446 = tpu.matmul %445, %444, %cst_209 {dimension_numbers = #tpu.dot_dimension_numbers<[1], [0], [0], [1], [0, 0, 1, 1], [], []>} : vector<16x128xbf16>, vector<128x32xbf16>, vector<16x32xf32> -> vector<16x32xf32>
    %447 = arith.addf %403, %446 : vector<16x32xf32>
    %c1_210 = arith.constant 1 : index
    %c0_211 = arith.constant 0 : index
    %c0_212 = arith.constant 0 : index
    %448 = vector.load %arg16[%c1_210, %c0_211, %c0_212] : memref<2x1x32xf32, #tpu.memory_space<vmem>>, vector<1x1x32xf32>
    %449 = vector.shape_cast %448 : vector<1x1x32xf32> to vector<1x32xf32>
    %450 = vector.broadcast %449 : vector<1x32xf32> to vector<16x32xf32>
    %451 = arith.addf %447, %450 : vector<16x32xf32>
    %c0_213 = arith.constant 0 : index
    %c0_214 = arith.constant 0 : index
    %452 = vector.load %arg17[%c0_213, %c0_214] : memref<1x32xf32, #tpu.memory_space<vmem>>, vector<1x32xf32>
    %c0_215 = arith.constant 0 : index
    %c0_216 = arith.constant 0 : index
    %453 = vector.load %arg18[%c0_215, %c0_216] : memref<1x32xf32, #tpu.memory_space<vmem>>, vector<1x32xf32>
    %cst_217 = arith.constant dense<0.000000e+00> : vector<16xf32>
    %454 = vector.multi_reduction <add>, %451, %cst_217 [1] : vector<16x32xf32> to vector<16xf32>
    %455 = vector.shape_cast %454 : vector<16xf32> to vector<16x1xf32>
    %cst_218 = arith.constant 3.200000e+01 : f32
    %456 = vector.broadcast %cst_218 : f32 to vector<16x1xf32>
    %457 = arith.divf %455, %456 : vector<16x1xf32>
    %458 = vector.broadcast %457 : vector<16x1xf32> to vector<16x32xf32>
    %459 = arith.subf %451, %458 : vector<16x32xf32>
    %460 = arith.mulf %459, %459 : vector<16x32xf32>
    %cst_219 = arith.constant dense<0.000000e+00> : vector<16xf32>
    %461 = vector.multi_reduction <add>, %460, %cst_219 [1] : vector<16x32xf32> to vector<16xf32>
    %462 = vector.shape_cast %461 : vector<16xf32> to vector<16x1xf32>
    %cst_220 = arith.constant 3.200000e+01 : f32
    %463 = vector.broadcast %cst_220 : f32 to vector<16x1xf32>
    %464 = arith.divf %462, %463 : vector<16x1xf32>
    %465 = vector.broadcast %457 : vector<16x1xf32> to vector<16x32xf32>
    %466 = arith.subf %451, %465 : vector<16x32xf32>
    %cst_221 = arith.constant 9.99999974E-6 : f32
    %467 = vector.broadcast %cst_221 : f32 to vector<16x1xf32>
    %468 = arith.addf %464, %467 : vector<16x1xf32>
    %469 = math.rsqrt %468 : vector<16x1xf32>
    %470 = vector.broadcast %469 : vector<16x1xf32> to vector<16x32xf32>
    %471 = arith.mulf %466, %470 : vector<16x32xf32>
    %472 = vector.broadcast %452 : vector<1x32xf32> to vector<16x32xf32>
    %473 = arith.mulf %471, %472 : vector<16x32xf32>
    %474 = vector.broadcast %453 : vector<1x32xf32> to vector<16x32xf32>
    %475 = arith.addf %473, %474 : vector<16x32xf32>
    %c0_222 = arith.constant 0 : index
    %c0_223 = arith.constant 0 : index
    %476 = vector.load %arg19[%c0_222, %c0_223] : memref<16x32xf32, #tpu.memory_space<vmem>>, vector<16x32xf32>
    tpu.vector_store %arg19[%c0_222, %c0_223], %475 {strides = array<i32>} : memref<16x32xf32, #tpu.memory_space<vmem>>, vector<16x32xf32>,
    return
  }
}

</mosaic_0001>

<bundles_post_ra>
// kernel: encoder_forward.1
= control target key start
LH: loop header
LB: loop body
LE: loop exit
PB: predicated region body
PF: predicated region fallthrough
CT: control target
= control target key end

     0   :  { %s4840_s0 = inlined_call_operand.vmem [shape: f32[32,8], index: 0, kind: input, shape index: {}]   ;;  %s4841_s1 = inlined_call_operand.vmem [shape: bf16[3,32,32], index: 1, kind: input, shape index: {}]   ;;  %s4842_s2 = inlined_call_operand.hbm [shape: bf16[3,8,32], index: 2, kind: input, shape index: {}]   ;;  %s4843_s3 = inlined_call_operand.hbm [shape: f32[1,32], index: 3, kind: input, shape index: {}]   ;;  %s4844_s4 = inlined_call_operand.hbm [shape: bf16[3,16,32], index: 4, kind: input, shape index: {}]   ;;  %s4845_s5 = inlined_call_operand.vmem [shape: bf16[3,32,32], index: 5, kind: input, shape index: {}]   ;;  %s4846_s6 = inlined_call_operand.hbm [shape: f32[1,32], index: 6, kind: input, shape index: {}]   ;;  %s4847_s7 = inlined_call_operand.hbm [shape: f32[16,32], index: 7, kind: input, shape index: {}]   ;;  %s4848_s8 = inlined_call_operand.hbm [shape: f32[16,16], index: 8, kind: input, shape index: {}]   ;;  %s4849_s9 = inlined_call_operand.vmem [shape: bf16[2,32,96], index: 9, kind: input, shape index: {}]   ;;  %s4850_s10 = inlined_call_operand.hbm [shape: f32[2,1,96], index: 10, kind: input, shape index: {}]   ;;  %s4851_s11 = inlined_call_operand.vmem [shape: bf16[2,4,8,32], index: 11, kind: input, shape index: {}]   ;;  %s4852_s12 = inlined_call_operand.hbm [shape: f32[2,1,32], index: 12, kind: input, shape index: {}]   ;;  %s4853_s13 = inlined_call_operand.vmem [shape: bf16[2,32,128], index: 13, kind: input, shape index: {}]   ;;  %s4854_s14 = inlined_call_operand.hbm [shape: f32[2,1,128], index: 14, kind: input, shape index: {}]   ;;  %s4855_s15 = inlined_call_operand.vmem [shape: bf16[2,128,32], index: 15, kind: input, shape index: {}]   ;;  %s4856_s16 = inlined_call_operand.hbm [shape: f32[2,1,32], index: 16, kind: input, shape index: {}]   ;;  %s4857_s17 = inlined_call_operand.vmem [shape: f32[1,32], index: 17, kind: input, shape index: {}]   ;;  %s4858_s18 = inlined_call_operand.vmem [shape: f32[1,32], index: 18, kind: input, shape index: {}]   ;;  %s4859_s19 = inlined_call_operand.hbm [shape: f32[16,32], index: 19, kind: output, shape index: {}]  }
   0x1   :  { %4862 = sst [smem:[#allocation27_spill]] %s4840_s0 }
   0x2   :  { %4863 = sst [smem:[#allocation28_spill]] %s4841_s1 }
   0x3   :  { %4864 = sst [smem:[#allocation29_spill]] %s4842_s2 }
   0x4   :  { %4865 = sst [smem:[#allocation30_spill]] %s4843_s3 }
   0x5   :  { %24 = vsyncpa [#allocation3], 0 }
   0x6   :  { %25 = vsyncpa [#allocation6], 0 }
   0x7   :  { %26 = vsyncpa [#allocation9], 0 }
   0x8   :  { %27 = vsyncpa [#allocation12], 0 }
   0x9   :  { %28 = vsyncpa [#allocation15], 0 }
   0xa   :  { %29 = vsyncpa [#allocation18], 0 }
   0xb   :  { %30 = vsyncpa [#allocation4], 0  ;;  %s4125_s0 = smov [#allocation5]   ;;  %s4126_s20 = smov [#allocation8]  }
   0xc   :  { %s53_s30 = sshll.u32 %s4125_s0, 4  ;;  %s77_s21 = sshll.u32 %s4126_s20, 4  ;;  %s54_s30 = int_to_ptr.vmem [resolvable:$true] %s53_s30  ;;  %s78_s21 = int_to_ptr.vmem [resolvable:$true] %s77_s21 }
   0xd   :  { %s3899_s1 = scalar_lea.vmem %s54_s30, 16  ;;  %s3903_s22 = scalar_lea.vmem %s54_s30, 32 }
   0xe   :  { %p3900_p0 = scmp.ne.s32.totalorder %s54_s30, %s3899_s1  ;;  %p3904_p1 = scmp.lt.s32.totalorder %s54_s30, %s54_s30 }
   0xf   :  { %p3905_p2 = scmp.lt.s32.totalorder %s3903_s22, %s3899_s1 }
  0x11   :  { %p3906_p3 = por %p3905_p2, %p3904_p1 }
  0x13   :  { %p3907_p4 = pnand %p3906_p3, %p3900_p0 }
  0x15   :  { %3910 = shalt.err (!%p3907_p4)
}
  0x16   :  { %s4866_s24 = sld [smem:[#allocation30_spill]]  ;;  %s3919_s25 = scalar_lea.vmem %s78_s21, 16 }
  0x17   :  { %p3920_p5 = scmp.ne.s32.totalorder %s78_s21, %s3919_s25  ;;  %s3923_s3 = scalar_lea.vmem %s78_s21, 32 }
  0x18   :  { %p3924_p6 = scmp.lt.s32.totalorder %s78_s21, %s78_s21  ;;  %p3925_p7 = scmp.lt.s32.totalorder %s3923_s3, %s3919_s25 }
  0x1a   :  { %p3926_p8 = por %p3925_p7, %p3924_p6 }
  0x1c   :  { %56 = dma.hbm_to_vmem [thread:$0]  %s4866_s24, 16, %s54_s30, [#allocation6]  }
  0x1d   :  { %p3927_p9 = pnand %p3926_p8, %p3920_p5 }
  0x1f   :  { %3930 = shalt.err (!%p3927_p9)
}
  0x20   :  { %80 = dma.hbm_to_vmem [thread:$0]  %s4846_s6, 16, %s78_s21, [#allocation9]  }
  0x21   :  { %s4127_s28 = smov [#allocation11]  }
  0x22   :  { %s98_s29 = sshll.u32 %s4127_s28, 4  ;;  %s99_s29 = int_to_ptr.vmem [resolvable:$true] %s98_s29 }
  0x23   :  { %s3939_s0 = scalar_lea.vmem %s99_s29, 256  ;;  %p3944_p11 = scmp.lt.s32.totalorder %s99_s29, %s99_s29 }
  0x24   :  { %p3940_p10 = scmp.ne.s32.totalorder %s99_s29, %s3939_s0  ;;  %p3945_p12 = scmp.lt.s32.totalorder %s3939_s0, %s3939_s0 }
  0x26   :  { %p3946_p13 = por %p3945_p12, %p3944_p11 }
  0x28   :  { %p3947_p0 = pnand %p3946_p13, %p3940_p10 }
  0x2a   :  { %3950 = shalt.err (!%p3947_p0)
}
  0x2b   :  { %s4128_s30 = smov 128   ;;  %s4129_s20 = smov 8  }
  0x2c   :  { %104 = dma.hbm_to_vmem [thread:$0]  %s4848_s8, 256, %s99_s29, [#allocation12], %s4128_s30, %s4128_s30, %s4129_s20  }
  0x2d   :  { %s4130_s6 = smov [#allocation14]   ;;  %s4131_s2 = smov [#allocation2]  }
  0x2e   :  { %s126_s21 = sshll.u32 %s4130_s6, 4  ;;  %s40_s23 = sshll.u32 %s4131_s2, 4  ;;  %s127_s21 = int_to_ptr.vmem [resolvable:$true] %s126_s21  ;;  %s41_s23 = int_to_ptr.vmem [resolvable:$true] %s40_s23 }
  0x2f   :  { %s3959_s24 = scalar_lea.vmem %s127_s21, 32  ;;  %p3964_p2 = scmp.lt.s32.totalorder %s127_s21, %s127_s21 }
  0x30   :  { %p3960_p1 = scmp.ne.s32.totalorder %s127_s21, %s3959_s24  ;;  %p3965_p3 = scmp.lt.s32.totalorder %s3959_s24, %s3959_s24 }
  0x32   :  { %p3966_p4 = por %p3965_p3, %p3964_p2 }
  0x34   :  { %p3967_p5 = pnand %p3966_p4, %p3960_p1 }
  0x36   :  { %3970 = shalt.err (!%p3967_p5)
}
  0x37   :  { %s4132_s25 = smov 16   ;;  %s4133_s3 = smov 1  }
  0x38   :  { %132 = dma.hbm_to_vmem [thread:$0]  %s4852_s12, 32, %s127_s21, [#allocation15], %s4132_s25, %s4132_s25, %s4133_s3  }
  0x39   :  { %s3979_s8 = scalar_lea.vmem %s41_s23, 192  ;;  %p3984_p7 = scmp.lt.s32.totalorder %s41_s23, %s41_s23 }
  0x3a   :  { %p3980_p6 = scmp.ne.s32.totalorder %s41_s23, %s3979_s8  ;;  %p3985_p8 = scmp.lt.s32.totalorder %s3979_s8, %s3979_s8 }
  0x3c   :  { %p3986_p9 = por %p3985_p8, %p3984_p7 }
  0x3e   :  { %p3987_p10 = pnand %p3986_p9, %p3980_p6 }
  0x40   :  { %3990 = shalt.err (!%p3987_p10)
}
  0x41   :  { %s4134_s28 = smov 64   ;;  %s4135_s29 = smov 4  }
  0x42   :  { %s4867_s22 = sld [smem:[#allocation29_spill]]  ;;  %s4136_s6 = smov [#allocation7]  }
  0x43   :  { %s62_s2 = sshll.u32 %s4136_s6, 4  ;;  %s4137_s12 = smov [#allocation10]   ;;  %s63_s2 = int_to_ptr.vmem [resolvable:$true] %s62_s2 }
  0x44   :  { %s86_s21 = sshll.u32 %s4137_s12, 4  ;;  %s3999_s24 = scalar_lea.vmem %s63_s2, 384  ;;  %s87_s21 = int_to_ptr.vmem [resolvable:$true] %s86_s21 }
  0x45   :  { %p4000_p11 = scmp.ne.s32.totalorder %s63_s2, %s3999_s24  ;;  %p4004_p12 = scmp.lt.s32.totalorder %s63_s2, %s63_s2 }
  0x46   :  { %p4005_p13 = scmp.lt.s32.totalorder %s3999_s24, %s3999_s24 }
  0x48   :  { %46 = dma.hbm_to_vmem [thread:$0]  %s4867_s22, 192, %s41_s23, [#allocation3], %s4134_s28, %s4134_s28, %s4135_s29  }
  0x49   :  { %p4006_p0 = por %p4005_p13, %p4004_p12 }
  0x4b   :  { %p4007_p1 = pnand %p4006_p0, %p4000_p11 }
  0x4d   :  { %4010 = shalt.err (!%p4007_p1)
}
  0x4e   :  { %68 = dma.hbm_to_vmem [thread:$0]  %s4844_s4, 384, %s63_s2, [#allocation6], %s4134_s28, %s4134_s28, %s4135_s29  }
  0x4f   :  { %s4019_s23 = scalar_lea.vmem %s87_s21, 256  ;;  %p4024_p3 = scmp.lt.s32.totalorder %s87_s21, %s87_s21 }
  0x50   :  { %p4020_p2 = scmp.ne.s32.totalorder %s87_s21, %s4019_s23  ;;  %p4025_p4 = scmp.lt.s32.totalorder %s4019_s23, %s4019_s23 }
  0x52   :  { %p4026_p5 = por %p4025_p4, %p4024_p3 }
  0x54   :  { %p4027_p6 = pnand %p4026_p5, %p4020_p2 }
  0x56   :  { %4030 = shalt.err (!%p4027_p6)
}
  0x57   :  { %92 = dma.hbm_to_vmem [thread:$0]  %s4847_s7, 256, %s87_s21, [#allocation9], %s4128_s30, %s4128_s30, %s4129_s20  }
  0x58   :  { %s4138_s1 = smov [#allocation13]   ;;  %s4139_s6 = smov [#allocation16]  }
  0x59   :  { %s112_s22 = sshll.u32 %s4138_s1, 4  ;;  %s140_s4 = sshll.u32 %s4139_s6, 4  ;;  %s113_s22 = int_to_ptr.vmem [resolvable:$true] %s112_s22  ;;  %s141_s4 = int_to_ptr.vmem [resolvable:$true] %s140_s4 }
  0x5a   :  { %s4039_s29 = scalar_lea.vmem %s113_s22, 32  ;;  %p4044_p8 = scmp.lt.s32.totalorder %s113_s22, %s113_s22 }
  0x5b   :  { %p4040_p7 = scmp.ne.s32.totalorder %s113_s22, %s4039_s29  ;;  %p4045_p9 = scmp.lt.s32.totalorder %s4039_s29, %s4039_s29 }
  0x5d   :  { %p4046_p10 = por %p4045_p9, %p4044_p8 }
  0x5f   :  { %p4047_p11 = pnand %p4046_p10, %p4040_p7 }
  0x61   :  { %4050 = shalt.err (!%p4047_p11)
}
  0x62   :  { %118 = dma.hbm_to_vmem [thread:$0]  %s4850_s10, 32, %s113_s22, [#allocation12], %s4132_s25, %s4132_s25, %s4133_s3  }
  0x63   :  { %s4059_s7 = scalar_lea.vmem %s141_s4, 32  ;;  %p4064_p13 = scmp.lt.s32.totalorder %s141_s4, %s141_s4 }
  0x64   :  { %p4060_p12 = scmp.ne.s32.totalorder %s141_s4, %s4059_s7  ;;  %p4065_p0 = scmp.lt.s32.totalorder %s4059_s7, %s4059_s7 }
  0x66   :  { %p4066_p1 = por %p4065_p0, %p4064_p13 }
  0x68   :  { %p4067_p2 = pnand %p4066_p1, %p4060_p12 }
  0x6a   :  { %4070 = shalt.err (!%p4067_p2)
}
  0x6b   :  { %146 = dma.hbm_to_vmem [thread:$0]  %s4854_s14, 32, %s141_s4, [#allocation15], %s4132_s25, %s4132_s25, %s4133_s3  }
  0x6c   :  { %s4140_s26 = smov [#allocation17]  }
  0x6d   :  { %s154_s27 = sshll.u32 %s4140_s26, 4  ;;  %s155_s27 = int_to_ptr.vmem [resolvable:$true] %s154_s27 }
  0x6e   :  { %s4079_s23 = scalar_lea.vmem %s155_s27, 32  ;;  %p4084_p4 = scmp.lt.s32.totalorder %s155_s27, %s155_s27 }
  0x6f   :  { %p4080_p3 = scmp.ne.s32.totalorder %s155_s27, %s4079_s23  ;;  %p4085_p5 = scmp.lt.s32.totalorder %s4079_s23, %s4079_s23 }
  0x71   :  { %p4086_p6 = por %p4085_p5, %p4084_p4 }
  0x73   :  { %p4087_p7 = pnand %p4086_p6, %p4080_p3 }
  0x75   :  { %4090 = shalt.err (!%p4087_p7)
}
  0x76   :  { %160 = dma.hbm_to_vmem [thread:$0]  %s4856_s16, 32, %s155_s27, [#allocation18], %s4132_s25, %s4132_s25, %s4133_s3  }
  0x77   :  { %4111 = dma.done.wait [#allocation3], 192  }
  0x78   :  { %4112 = vsyncadd [#allocation3], 4294967104 }
  0x79   :  { %4113 = dma.done.wait [#allocation6], 400  }
  0x7a   :  { %4114 = vsyncadd [#allocation6], 4294966896 }
  0x7b   :  { %4115 = dma.done.wait [#allocation9], 272  }
  0x7c   :  { %4116 = vsyncadd [#allocation9], 4294967024 }
  0x7d   :  { %4117 = dma.done.wait [#allocation12], 288  }
  0x7e   :  { %4118 = vsyncadd [#allocation12], 4294967008 }
  0x7f   :  { %4119 = dma.done.wait [#allocation15], 64  }
  0x80   :  { %4120 = vsyncadd [#allocation15], 4294967232 }
  0x81   :  { %4121 = dma.done.wait [#allocation18], 32  }
  0x82   :  { %4122 = vsyncadd [#allocation18], 4294967264  ;;  %s4868_s1 = sld [smem:[#allocation27_spill]]  ;;  %vm216_vm0 = vcmask 261120   ;;  %v346_v12 = vld [vmem:[#allocation2 + $0x4] sm:$0xf] }
  0x83   :  { %s4869_s12 = sld [smem:[#allocation28_spill]]  ;;  %vm356_vm1 = vcmask 1043456   ;;  %v272_v14 = vld [vmem:[#allocation2] sm:$0xf]  ;;  %vm349_vm2 = vcmask 64512   ;;  %v4141_v36 = vmov 0.0  }
  0x84   :  { %v358_v13 = vsel %vm356_vm1, %v346_v12, 0  ;;  %v416_v27 = vsel %vm356_vm1, %v272_v14, 0  ;;  %v538_v30 = vld [vmem:[#allocation2 + $0x8] sm:$0xf]  ;;  %vm4142_vm3 = vmmov 0   ;;  %s4143_s23 = smov 88  }
  0x85   :  { %v548_v34 = vsel %vm356_vm1, %v538_v30, 0  ;;  %v3173_v47 = vld [vmem:[#allocation5] ss:$0 sm:$0xff]  ;;  %s4144_s10 = smov 96   ;;  %s4145_s8 = smov 120   ;;  %vm1173_vm4 = vcmask 130048  }
  0x86   :  { %s4146_s14 = smov 80   ;;  %s4147_s0 = smov 112  }
  0x87   :  { %s4149_s3 = smov 48   ;;  %s4150_s4 = smov 104  }
  0x88   :  { %v198_v0 = vld [vmem:[%s4868_s1 + $0x10] sm:$0xff]  ;;  %v199_v1 = vld [vmem:[%s4868_s1 + $0x18] sm:$0xff]  ;;  %v196_v2 = vld [vmem:[%s4868_s1] sm:$0xff]  ;;  %s4151_s29 = smov 72   ;;  %s4152_s7 = smov 40  }
  0x89   :  { %v205_v3 = vpack.c.bf16 %v199_v1, %v198_v0  ;;  %v197_v4 = vld [vmem:[%s4868_s1 + $0x8] sm:$0xff]  ;;  %v3746_v6 = vld [vmem:[%s4869_s12] sm:$0xff]   ;;  %v3748_v8 = vld [vmem:[%s4869_s12 + $0x10] sm:$0xff]   ;;  %s4148_s1 = smov 56  }
  0x8a   :  { %v204_v5 = vpack.c.bf16 %v197_v4, %v196_v2  ;;  %3412 = vmatprep.mubr.msk.bf16.mxu1 %vm216_vm0, %v3746_v6  ;;  %v3747_v7 = vld [vmem:[%s4869_s12 + $0x8] sm:$0xff]   ;;  %v3750_v9 = vld [vmem:[%s4869_s12 + $0x20] sm:$0xff]   ;;  %v3749_v11 = vld [vmem:[%s4869_s12 + $0x18] sm:$0xff]  }
  0x8b   :  { %3408 = vmatprep.subr.bf16.mxu1 %v205_v3  ;;  %3436 = vmatprep.subr.bf16.mxu0 %v205_v3  ;;  %v3751_v10 = vld [vmem:[%s4869_s12 + $0x28] sm:$0xff]  }
  0x8c   :  { %3409 = vmatpush3.bf16.msra.mxu1 %v205_v3  ;;  %3437 = vmatpush3.bf16.msra.mxu0 %v205_v3 }
  0x8d   :  { %3410 = vmatprep.subr.bf16.mxu1 %v204_v5  ;;  %3438 = vmatprep.subr.bf16.mxu0 %v204_v5 }
  0x8e   :  { %3440 = vmatprep.mubr.msk.bf16.mxu0 %vm216_vm0, %v3750_v9 }
  0x90   :  { %3411 = vmatpush3.bf16.msra.mxu1 %v204_v5  ;;  %3439 = vmatpush3.bf16.msra.mxu0 %v204_v5 }
  0x91   :  { %3416 = vmatprep.subr.bf16.mxu1 %v205_v3  ;;  %3450 = vmatprep.subr.bf16.mxu0 %v4141_v36 }
  0x93   :  { %3413 = vmatmul.mubr.msk.bf16.vlgmr.msra.gmra.mxu1 %vm216_vm0, %v3747_v7  ;;  %3441 = vmatmul.mubr.msk.bf16.vlgmr.msra.gmra.mxu0 %vm216_vm0, %v3751_v10 }
  0x94   :  { %3417 = vmatpush3.bf16.msra.mxu1 %v205_v3  ;;  %3420 = vmatprep.mubr.msk.bf16.mxu1 %vm216_vm0, %v3748_v8 }
  0x95   :  { %3418 = vmatprep.subr.bf16.mxu1 %v204_v5  ;;  %3454 = vmatprep.mubr.msk.bf16.mxu0 %vm4142_vm3, %v4141_v36 }
  0x98   :  { %3419 = vmatpush3.bf16.msra.mxu1 %v204_v5 }
  0x99   :  { %3714 = vmatprep.subr.msk.bf16.mxu1 %vm356_vm1, %v346_v12 }
  0x9b   :  { %3421 = vmatmul.mubr.msk.bf16.vlgmr.msra.gmra.mxu1 %vm216_vm0, %v3749_v11 }
  0x9c   :  { %3425 = vmatpush3.bf16.msra.mxu1 %v358_v13 }
  0x9d   :  { %3715 = vmatprep.subr.msk.bf16.mxu1 %vm356_vm1, %v272_v14 }
 0x153   :  { %v3414_v15 = vpop.f32.mrf.mxu1  ;;  %v3442_v20 = vpop.f32.mrf.mxu0 }
 0x155   :  { %v257_v16 = vpop.f32.mrf.mxu1  ;;  %v522_v23 = vpop.f32.mrf.mxu0 }
 0x157   :  { %v3415_v17 = vpop.f32.mrf.mxu1  ;;  %v3443_v28 = vpop.f32.mrf.mxu0 }
 0x158   :  { %v274_v33 = vpack.c.bf16 %v3415_v17, %v3414_v15  ;;  %v540_v35 = vpack.c.bf16 %v3443_v28, %v3442_v20 }
 0x159   :  { %v260_v18 = vpop.f32.mrf.mxu1  ;;  %v525_v31 = vpop.f32.mrf.mxu0 }
 0x15a   :  { %v273_v29 = vpack.c.bf16 %v260_v18, %v257_v16  ;;  %v539_v32 = vpack.c.bf16 %v525_v31, %v522_v23 }
 0x15b   :  { %v3422_v19 = vpop.f32.mrf.mxu1 }
 0x15d   :  { %v330_v21 = vpop.f32.mrf.mxu1 }
 0x15f   :  { %v3423_v22 = vpop.f32.mrf.mxu1 }
 0x160   :  { %v348_v26 = vpack.c.bf16 %v3423_v22, %v3422_v19 }
 0x161   :  { %v333_v24 = vpop.f32.mrf.mxu1 }
 0x162   :  { %v347_v25 = vpack.c.bf16 %v333_v24, %v330_v21 }
 0x164   :  { %3426 = vmatprep.mubr.msk.bf16.mxu1 %vm349_vm2, %v347_v25 }
 0x165   :  { %3427 = vmatmul.mubr.msk.bf16.vlgmr.msra.gmra.mxu1 %vm349_vm2, %v348_v26 }
 0x166   :  { %3431 = vmatpush3.bf16.msra.mxu1 %v416_v27  ;;  %3432 = vmatprep.mubr.msk.bf16.mxu1 %vm349_vm2, %v273_v29 }
 0x167   :  { %3716 = vmatprep.subr.msk.bf16.mxu1 %vm356_vm1, %v538_v30 }
 0x16d   :  { %3433 = vmatmul.mubr.msk.bf16.vlgmr.msra.gmra.mxu1 %vm349_vm2, %v274_v33 }
 0x16e   :  { %3445 = vmatpush3.bf16.msra.mxu1 %v548_v34  ;;  %3446 = vmatprep.mubr.msk.bf16.mxu1 %vm349_vm2, %v539_v32 }
 0x16f   :  { %3458 = vmatprep.subr.bf16.mxu1 %v4141_v36 }
 0x175   :  { %3447 = vmatmul.mubr.msk.bf16.vlgmr.msra.gmra.mxu1 %vm349_vm2, %v540_v35 }
 0x176   :  { %3462 = vmatprep.mubr.msk.bf16.mxu1 %vm4142_vm3, %v4141_v36 }
 0x225   :  { %v3428_v37 = vpop.f32.mrf.mxu1 }
 0x227   :  { %v394_v38 = vpop.f32.mrf.mxu1 }
 0x229   :  { %v3429_v39 = vpop.f32.mrf.mxu1 }
 0x22b   :  { %v397_v40 = vpop.f32.mrf.mxu1 }
 0x22d   :  { %v3434_v41 = vpop.f32.mrf.mxu1 }
 0x22e   :  { %v461_v45 = vadd.f32 %v3434_v41, %v3428_v37  ;;  %v3752_v37 = vld [vmem:[#allocation7] sm:$0xff]  }
 0x22f   :  { %v452_v42 = vpop.f32.mrf.mxu1  ;;  %v3756_v41 = vld [vmem:[%s4845_s5 + $0x10] sm:$0xff]  }
 0x230   :  { %v453_v48 = vadd.f32 %v452_v42, %v394_v38  ;;  %v3753_v38 = vld [vmem:[#allocation7 + $0x8] sm:$0xff]   ;;  %v3757_v42 = vld [vmem:[%s4845_s5] sm:$0xff]  }
 0x231   :  { %v3435_v43 = vpop.f32.mrf.mxu1 }
 0x232   :  { %v464_v51 = vadd.f32 %v3435_v43, %v3429_v39  ;;  %v3754_v39 = vld [vmem:[%s4845_s5 + $0x18] sm:$0xff]  }
 0x233   :  { %v455_v44 = vpop.f32.mrf.mxu1 }
 0x234   :  { %v456_v55 = vadd.f32 %v455_v44, %v397_v40  ;;  %v3755_v40 = vld [vmem:[%s4845_s5 + $0x8] sm:$0xff]  }
 0x235   :  { %v3448_v46 = vpop.f32.mrf.mxu1 }
 0x236   :  { %v601_v49 = vadd.f32 %v3448_v46, %v461_v45 }
 0x237   :  { %v584_v50 = vpop.f32.mrf.mxu1 }
 0x238   :  { %v612_v52 = vadd.f32 %v3173_v47, %v601_v49  ;;  %v599_v53 = vadd.f32 %v584_v50, %v453_v48 }
 0x239   :  { %v3449_v54 = vpop.f32.mrf.mxu1 }
 0x23a   :  { %v616_v56 = vmul.f32 %v612_v52, %v612_v52  ;;  %v610_v57 = vadd.f32 %v3173_v47, %v599_v53  ;;  %v602_v58 = vadd.f32 %v3449_v54, %v464_v51  ;;  %v3758_v53 = vld [vmem:[#allocation7 + $0x10] sm:$0xff]   ;;  %v3759_v54 = vld [vmem:[%s4845_s5 + $0x28] sm:$0xff]  }
 0x23b   :  { %v587_v59 = vpop.f32.mrf.mxu1 }
 0x23c   :  { %v620_v60 = vmul.f32 %v616_v56, %v612_v52  ;;  %v614_v61 = vmul.f32 %v610_v57, %v610_v57  ;;  %v613_v62 = vadd.f32 %v3173_v47, %v602_v58  ;;  %v600_v63 = vadd.f32 %v587_v59, %v456_v55  ;;  %v3760_v55 = vld [vmem:[%s4845_s5 + $0x20] sm:$0xff]  }
 0x23e   :  { %v624_v0 = vmul.f32 0.044715, %v620_v60  ;;  %v618_v1 = vmul.f32 %v614_v61, %v610_v57  ;;  %v617_v2 = vmul.f32 %v613_v62, %v613_v62  ;;  %v611_v3 = vadd.f32 %v3173_v47, %v600_v63 }
 0x240   :  { %v628_v4 = vadd.f32 %v624_v0, %v612_v52  ;;  %v622_v5 = vmul.f32 0.044715, %v618_v1  ;;  %v621_v6 = vmul.f32 %v617_v2, %v613_v62  ;;  %v615_v7 = vmul.f32 %v611_v3, %v611_v3 }
 0x242   :  { %v632_v8 = vmul.f32 0.7978846, %v628_v4  ;;  %v626_v9 = vadd.f32 %v622_v5, %v610_v57  ;;  %v625_v10 = vmul.f32 0.044715, %v621_v6  ;;  %v619_v11 = vmul.f32 %v615_v7, %v611_v3 }
 0x244   :  { %3785 = vtanh.f32 %v632_v8  ;;  %v630_v12 = vmul.f32 0.7978846, %v626_v9  ;;  %v629_v13 = vadd.f32 %v625_v10, %v613_v62  ;;  %v623_v14 = vmul.f32 0.044715, %v619_v11  ;;  %v3197_v8 = vld [vmem:[#allocation8] ss:$0 sm:$0xff] }
 0x246   :  { %3787 = vtanh.f32 %v630_v12  ;;  %v633_v15 = vmul.f32 0.7978846, %v629_v13  ;;  %v627_v16 = vadd.f32 %v623_v14, %v611_v3 }
 0x248   :  { %3789 = vtanh.f32 %v633_v15  ;;  %v631_v17 = vmul.f32 0.7978846, %v627_v16 }
 0x24a   :  { %3791 = vtanh.f32 %v631_v17 }
 0x251   :  { %v3786_v18 = vpop.eup %3785 }
 0x252   :  { %v640_v19 = vadd.f32 1.0, %v3786_v18 }
 0x253   :  { %v3788_v20 = vpop.eup %3787 }
 0x254   :  { %v644_v23 = vmul.f32 0.5, %v640_v19  ;;  %v638_v24 = vadd.f32 1.0, %v3788_v20 }
 0x255   :  { %v3790_v21 = vpop.eup %3789 }
 0x256   :  { %v641_v22 = vadd.f32 1.0, %v3790_v21  ;;  %v648_v28 = vmul.f32 %v644_v23, %v612_v52  ;;  %v642_v30 = vmul.f32 0.5, %v638_v24 }
 0x257   :  { %v3792_v25 = vpop.eup %3791 }
 0x258   :  { %v645_v26 = vmul.f32 0.5, %v641_v22  ;;  %v639_v27 = vadd.f32 1.0, %v3792_v25  ;;  %v646_v34 = vmul.f32 %v642_v30, %v610_v57  ;;  %v1021_v30 = vld [vmem:[#allocation10] sm:$0xff] }
 0x25a   :  { %v649_v29 = vmul.f32 %v645_v26, %v613_v62  ;;  %v643_v31 = vmul.f32 0.5, %v639_v27 }
 0x25c   :  { %v653_v32 = vpack.c.bf16 %v649_v29, %v648_v28  ;;  %v647_v33 = vmul.f32 %v643_v31, %v611_v3 }
 0x25e   :  { %3451 = vmatpush3.bf16.msra.mxu0 %v653_v32  ;;  %3459 = vmatpush3.bf16.msra.mxu1 %v653_v32  ;;  %v652_v35 = vpack.c.bf16 %v647_v33, %v646_v34 }
 0x25f   :  { %3452 = vmatprep.subr.bf16.mxu0 %v4141_v36  ;;  %3460 = vmatprep.subr.bf16.mxu1 %v4141_v36 }
 0x262   :  { %3453 = vmatpush3.bf16.msra.mxu0 %v652_v35  ;;  %3461 = vmatpush3.bf16.msra.mxu1 %v652_v35 }
 0x263   :  { %3466 = vmatprep.subr.bf16.mxu0 %v4141_v36  ;;  %3474 = vmatprep.subr.bf16.mxu1 %v4141_v36 }
 0x265   :  { %3455 = vmatmul.mubr.msk.bf16.vlgmr.msra.gmra.mxu0 %vm216_vm0, %v3752_v37  ;;  %3463 = vmatmul.mubr.msk.bf16.vlgmr.msra.gmra.mxu1 %vm216_vm0, %v3753_v38 }
 0x266   :  { %3467 = vmatpush3.bf16.msra.mxu0 %v3754_v39  ;;  %3470 = vmatprep.mubr.msk.bf16.mxu0 %vm4142_vm3, %v4141_v36 }
 0x267   :  { %3468 = vmatprep.subr.bf16.mxu0 %v4141_v36  ;;  %3478 = vmatprep.mubr.msk.bf16.mxu1 %vm4142_vm3, %v4141_v36 }
 0x268   :  { %3475 = vmatpush3.bf16.msra.mxu1 %v3755_v40 }
 0x269   :  { %3476 = vmatprep.subr.bf16.mxu1 %v4141_v36 }
 0x26a   :  { %3469 = vmatpush3.bf16.msra.mxu0 %v3756_v41 }
 0x26b   :  { %3482 = vmatprep.subr.bf16.mxu0 %v4141_v36 }
 0x26c   :  { %3477 = vmatpush3.bf16.msra.mxu1 %v3757_v42 }
 0x26d   :  { %3490 = vmatprep.subr.bf16.mxu1 %v4141_v36 }
 0x325   :  { %v696_v43 = vpop.f32.mrf.mxu0  ;;  %v753_v44 = vpop.f32.mrf.mxu1 }
 0x327   :  { %v3456_v45 = vpop.f32.mrf.mxu0  ;;  %v3464_v46 = vpop.f32.mrf.mxu1 }
 0x329   :  { %v699_v47 = vpop.f32.mrf.mxu0  ;;  %v756_v48 = vpop.f32.mrf.mxu1 }
 0x32a   :  { %v707_v49 = vpack.c.bf16 %v699_v47, %v696_v43  ;;  %v765_v50 = vpack.c.bf16 %v756_v48, %v753_v44 }
 0x32b   :  { %v3465_v51 = vpop.f32.mrf.mxu1  ;;  %v3457_v52 = vpop.f32.mrf.mxu0 }
 0x32c   :  { %3471 = vmatmul.mubr.msk.bf16.vlgmr.msra.gmra.mxu0 %vm216_vm0, %v765_v50  ;;  %3479 = vmatmul.mubr.msk.bf16.vlgmr.msra.gmra.mxu1 %vm216_vm0, %v707_v49  ;;  %v3761_v51 = vld [vmem:[%s4849_s9 + $0x8] sm:$0xff]   ;;  %v3762_v52 = vld [vmem:[%s4849_s9] sm:$0xff]  }
 0x32d   :  { %3483 = vmatpush3.bf16.msra.mxu0 %v653_v32  ;;  %3486 = vmatprep.mubr.msk.bf16.mxu0 %vm4142_vm3, %v4141_v36 }
 0x32e   :  { %3484 = vmatprep.subr.bf16.mxu0 %v4141_v36  ;;  %3494 = vmatprep.mubr.msk.bf16.mxu1 %vm4142_vm3, %v4141_v36 }
 0x32f   :  { %3491 = vmatpush3.bf16.msra.mxu1 %v3759_v54 }
 0x330   :  { %3492 = vmatprep.subr.bf16.mxu1 %v4141_v36 }
 0x331   :  { %3485 = vmatpush3.bf16.msra.mxu0 %v652_v35  ;;  %v1022_v35 = vld [vmem:[#allocation10 + $0x8] sm:$0xff] }
 0x332   :  { %3498 = vmatprep.subr.bf16.mxu0 %v4141_v36 }
 0x333   :  { %3493 = vmatpush3.bf16.msra.mxu1 %v3760_v55 }
 0x334   :  { %3487 = vmatmul.mubr.msk.bf16.vlgmr.msra.gmra.mxu0 %vm216_vm0, %v3758_v53  ;;  %3506 = vmatprep.subr.bf16.mxu1 %v4141_v36 }
 0x335   :  { %3502 = vmatprep.mubr.msk.bf16.mxu0 %vm4142_vm3, %v4141_v36  ;;  %3499 = vmatpush3.bf16.msra.mxu0 %v3761_v51 }
 0x336   :  { %3500 = vmatprep.subr.bf16.mxu0 %v4141_v36 }
 0x339   :  { %3501 = vmatpush3.bf16.msra.mxu0 %v3762_v52 }
 0x33a   :  { %3512 = vmatprep.subr.bf16.mxu0 %v4141_v36 }
 0x3ec   :  { %v815_v56 = vpop.f32.mrf.mxu0  ;;  %v871_v57 = vpop.f32.mrf.mxu1 }
 0x3ed   :  { %v872_v58 = vadd.f32 %v871_v57, %v815_v56 }
 0x3ee   :  { %v3472_v59 = vpop.f32.mrf.mxu0  ;;  %v3480_v60 = vpop.f32.mrf.mxu1 }
 0x3f0   :  { %v818_v61 = vpop.f32.mrf.mxu0  ;;  %v874_v62 = vpop.f32.mrf.mxu1 }
 0x3f1   :  { %v875_v63 = vadd.f32 %v874_v62, %v818_v61 }
 0x3f2   :  { %v3473_v0 = vpop.f32.mrf.mxu0  ;;  %v3481_v1 = vpop.f32.mrf.mxu1 }
 0x3f3   :  { %v3198_v1 = vld [vmem:[#allocation13] ss:$0 sm:$0xff] }
 0x3f4   :  { %v923_v2 = vpop.f32.mrf.mxu0 }
 0x3f6   :  { %v3488_v3 = vpop.f32.mrf.mxu0 }
 0x3f8   :  { %v926_v4 = vpop.f32.mrf.mxu0 }
 0x3f9   :  { %v935_v5 = vpack.c.bf16 %v926_v4, %v923_v2 }
 0x3fa   :  { %v3489_v6 = vpop.f32.mrf.mxu0 }
 0x3fb   :  { %3495 = vmatmul.mubr.msk.bf16.vlgmr.msra.gmra.mxu1 %vm216_vm0, %v935_v5 }
 0x3fc   :  { %3508 = vmatprep.mubr.msk.bf16.mxu1 %vm4142_vm3, %v4141_v36 }
 0x4bb   :  { %v985_v7 = vpop.f32.mrf.mxu1 }
 0x4bc   :  { %v992_v9 = vadd.f32 %v985_v7, %v872_v58 }
 0x4bd   :  { %v3496_v10 = vpop.f32.mrf.mxu1 }
 0x4be   :  { %v1001_v11 = vadd.f32 %v3197_v8, %v992_v9 }
 0x4bf   :  { %v988_v12 = vpop.f32.mrf.mxu1 }
 0x4c0   :  { %v1003_v13 = vmul.f32 %v1001_v11, %v1001_v11  ;;  %v993_v14 = vadd.f32 %v988_v12, %v875_v63 }
 0x4c1   :  { %v3497_v15 = vpop.f32.mrf.mxu1 }
 0x4c2   :  { %v1005_v16 = vmul.f32 %v1003_v13, %v1001_v11  ;;  %v1002_v17 = vadd.f32 %v3197_v8, %v993_v14  ;;  %v4450_v13 = vld [vmem:[#allocation11] sm:$0xff] }
 0x4c4   :  { %v1007_v18 = vmul.f32 0.044715, %v1005_v16  ;;  %v1004_v19 = vmul.f32 %v1002_v17, %v1002_v17 }
 0x4c6   :  { %v1009_v20 = vadd.f32 %v1007_v18, %v1001_v11  ;;  %v1006_v21 = vmul.f32 %v1004_v19, %v1002_v17 }
 0x4c8   :  { %v1011_v22 = vmul.f32 0.7978846, %v1009_v20  ;;  %v1008_v23 = vmul.f32 0.044715, %v1006_v21 }
 0x4ca   :  { %3793 = vtanh.f32 %v1011_v22  ;;  %v1010_v24 = vadd.f32 %v1008_v23, %v1002_v17 }
 0x4cc   :  { %v1012_v25 = vmul.f32 0.7978846, %v1010_v24 }
 0x4ce   :  { %3795 = vtanh.f32 %v1012_v25 }
 0x4d7   :  { %v3794_v26 = vpop.eup %3793 }
 0x4d8   :  { %v1015_v27 = vadd.f32 1.0, %v3794_v26 }
 0x4da   :  { %v1017_v28 = vmul.f32 0.5, %v1015_v27 }
 0x4db   :  { %v3796_v29 = vpop.eup %3795 }
 0x4dc   :  { %v1019_v31 = vmul.f32 %v1017_v28, %v1001_v11  ;;  %v1016_v32 = vadd.f32 1.0, %v3796_v29 }
 0x4de   :  { %v4408_v33 = vadd.f32 %v1021_v30, %v1019_v31  ;;  %v1018_v34 = vmul.f32 0.5, %v1016_v32 }
 0x4e0   :  { %v1027_v37 = vsel %vm216_vm0, %v4408_v33, 0.0  ;;  %v1020_v38 = vmul.f32 %v1018_v34, %v1002_v17  ;;  %v4453_v17 = vld [vmem:[#allocation11 + $0x8] sm:$0xff] }
 0x4e1   :  { %1028 = vadd.xlane.f32.xlu0 %v1027_v37 }
 0x4e2   :  { %v4412_v39 = vadd.f32 %v1022_v35, %v1020_v38 }
 0x4e4   :  { %v1030_v40 = vsel %vm216_vm0, %v4412_v39, 0.0 }
 0x4e5   :  { %1031 = vadd.xlane.f32.xlu0 %v1030_v40 }
 0x56a   :  { %v1029_v41 = vpop.xlane.xlu0 %1028 }
 0x56b   :  { %v1034_v42 = vmul.f32 0.03125, %v1029_v41 }
 0x56d   :  { %v1036_v43 = vsub.f32 %v4408_v33, %v1034_v42 }
 0x56e   :  { %v1032_v44 = vpop.xlane.xlu0 %1031 }
 0x56f   :  { %v1035_v45 = vmul.f32 0.03125, %v1032_v44  ;;  %v1038_v46 = vmul.f32 %v1036_v43, %v1036_v43 }
 0x571   :  { %v1037_v47 = vsub.f32 %v4412_v39, %v1035_v45  ;;  %v1040_v48 = vsel %vm216_vm0, %v1038_v46, 0.0 }
 0x572   :  { %1041 = vadd.xlane.f32.xlu1 %v1040_v48 }
 0x573   :  { %v1039_v49 = vmul.f32 %v1037_v47, %v1037_v47 }
 0x575   :  { %v1043_v50 = vsel %vm216_vm0, %v1039_v49, 0.0 }
 0x576   :  { %1044 = vadd.xlane.f32.xlu1 %v1043_v50 }
 0x5fb   :  { %v1042_v53 = vpop.xlane.xlu1 %1041 }
 0x5fc   :  { %v1046_v54 = vmul.f32 0.03125, %v1042_v53 }
 0x5fe   :  { %v1048_v55 = vadd.f32 1e-05, %v1046_v54 }
 0x5ff   :  { %v1045_v56 = vpop.xlane.xlu1 %1044 }
 0x600   :  { %v1047_v57 = vmul.f32 0.03125, %v1045_v56  ;;  %3797 = vrsqrt.f32 %v1048_v55 }
 0x602   :  { %v1049_v58 = vadd.f32 1e-05, %v1047_v57 }
 0x604   :  { %3799 = vrsqrt.f32 %v1049_v58 }
 0x60d   :  { %v3798_v59 = vpop.eup %3797 }
 0x60e   :  { %v1052_v61 = vmul.f32 %v3798_v59, %v1036_v43 }
 0x611   :  { %v3800_v60 = vpop.eup %3799 }
 0x612   :  { %v1053_v62 = vmul.f32 %v3800_v60, %v1037_v47 }
 0x614   :  { %v1058_v63 = vpack.c.bf16 %v1053_v62, %v1052_v61 }
 0x616   :  { %3503 = vmatmul.mubr.msk.bf16.vlgmr.msra.gmra.mxu0 %vm216_vm0, %v1058_v63 }
 0x617   :  { %3514 = vmatprep.mubr.msk.bf16.mxu0 %vm4142_vm3, %v4141_v36 }
 0x6d6   :  { %v1115_v0 = vpop.f32.mrf.mxu0 }
 0x6d7   :  { %v1116_v4 = vadd.f32 %v3198_v1, %v1115_v0 }
 0x6d8   :  { %v3504_v2 = vpop.f32.mrf.mxu0 }
 0x6da   :  { %v1118_v3 = vpop.f32.mrf.mxu0 }
 0x6db   :  { %v1119_v5 = vadd.f32 %v3198_v1, %v1118_v3 }
 0x6dc   :  { %v3505_v6 = vpop.f32.mrf.mxu0 }
 0x6dd   :  { %v4431_v7 = vpack.c.bf16 %v1119_v5, %v1116_v4  ;;  %v1244_v6 = vld [vmem:[%s4851_s11] sm:$0xf] }
 0x6df   :  { %1248 = vrot.lane.b32.xlu1 %v4431_v7, %s4143_s23  ;;  %1124 = vrot.lane.b32.xlu0 %v4431_v7, %s4144_s10 }
 0x6e3   :  { %1246 = vrot.lane.b32.xlu1 %v4431_v7, %s4145_s8 }
 0x751   :  { %v1125_v8 = vpop.permute.xlu0 %1124  ;;  %v1249_v10 = vpop.permute.xlu1 %1248 }
 0x752   :  { %v1130_v9 = vsel %vm349_vm2, %v1125_v8, 0  ;;  %v1254_v11 = vsel %vm349_vm2, %v1249_v10, 0  ;;  %v1421_v8 = vsel %vm356_vm1, %v1244_v6, 0 }
 0x753   :  { %3507 = vmatpush3.bf16.xpose.msra.mxu1 %v1130_v9  ;;  %v3206_v9 = vld [vmem:[%s4851_s11 + $0x4] sm:$0xf] }
 0x754   :  { %3518 = vmatprep.subr.bf16.mxu1 %v4141_v36  ;;  %v1374_v10 = vsel %vm356_vm1, %v3206_v9, 0 }
 0x755   :  { %v1247_v12 = vpop.permute.xlu1 %1246 }
 0x75a   :  { %3509 = vmatmul.mubr.msk.bf16.vlgmr.msra.gmra.mxu1 %vm349_vm2, %v4431_v7 }
 0x75b   :  { %3519 = vmatpush3.bf16.xpose.msra.mxu1 %v1254_v11  ;;  %3520 = vmatprep.mubr.msk.bf16.mxu1 %vm4142_vm3, %v4141_v36 }
 0x75c   :  { %3530 = vmatprep.subr.bf16.mxu1 %v4141_v36 }
 0x762   :  { %3521 = vmatmul.mubr.msk.bf16.vlgmr.msra.gmra.mxu1 %vm349_vm2, %v1247_v12 }
 0x763   :  { %3532 = vmatprep.mubr.msk.bf16.mxu1 %vm4142_vm3, %v4141_v36  ;;  %3531 = vmatpush3.bf16.msra.mxu1 %v1374_v10 }
 0x764   :  { %3542 = vmatprep.subr.bf16.mxu1 %v4141_v36 }
 0x81a   :  { %v1166_v14 = vpop.f32.mrf.mxu1 }
 0x81b   :  { %v1167_v15 = vadd.f32 %v1166_v14, %v4450_v13 }
 0x81c   :  { %v3510_v16 = vpop.f32.mrf.mxu1 }
 0x81d   :  { %v1174_v18 = vsel %vm1173_vm4, %v1167_v15, -inf }
 0x81e   :  { %1175 = vmax.xlane.f32.xlu1 %v1174_v18  ;;  %v1169_v19 = vpop.f32.mrf.mxu1 }
 0x81f   :  { %v1170_v20 = vadd.f32 %v1169_v19, %v4453_v17 }
 0x820   :  { %v3511_v21 = vpop.f32.mrf.mxu1 }
 0x821   :  { %v1177_v22 = vsel %vm1173_vm4, %v1170_v20, -inf }
 0x822   :  { %1178 = vmax.xlane.f32.xlu0 %v1177_v22  ;;  %v1290_v23 = vpop.f32.mrf.mxu1 }
 0x823   :  { %v1291_v24 = vadd.f32 %v1290_v23, %v4450_v13 }
 0x824   :  { %v3522_v25 = vpop.f32.mrf.mxu1 }
 0x825   :  { %v1297_v26 = vsel %vm1173_vm4, %v1291_v24, -inf }
 0x826   :  { %1298 = vmax.xlane.f32.xlu0 %v1297_v26  ;;  %v1293_v27 = vpop.f32.mrf.mxu1 }
 0x827   :  { %v1294_v28 = vadd.f32 %v1293_v27, %v4453_v17 }
 0x828   :  { %v3523_v29 = vpop.f32.mrf.mxu1 }
 0x829   :  { %v1300_v30 = vsel %vm1173_vm4, %v1294_v28, -inf }
 0x82a   :  { %1301 = vmax.xlane.f32.xlu0 %v1300_v30 }
 0x8a7   :  { %v1176_v31 = vpop.xlane.xlu1 %1175 }
 0x8a8   :  { %v1180_v32 = vsub.f32 %v1167_v15, %v1176_v31 }
 0x8aa   :  { %v1182_v34 = vmul.f32 1.442695, %v1180_v32 }
 0x8ab   :  { %v1179_v35 = vpop.xlane.xlu0 %1178 }
 0x8ac   :  { %3801 = vpow2.f32 %v1182_v34  ;;  %v1181_v37 = vsub.f32 %v1170_v20, %v1179_v35 }
 0x8ae   :  { %v1184_v38 = vmul.f32 1.442695, %v1181_v37 }
 0x8af   :  { %v1299_v40 = vpop.xlane.xlu0 %1298 }
 0x8b0   :  { %3803 = vpow2.f32 %v1184_v38  ;;  %v1303_v41 = vsub.f32 %v1291_v24, %v1299_v40 }
 0x8b2   :  { %v1305_v42 = vmul.f32 1.442695, %v1303_v41 }
 0x8b3   :  { %v1302_v43 = vpop.xlane.xlu0 %1301 }
 0x8b4   :  { %3805 = vpow2.f32 %v1305_v42  ;;  %v1304_v44 = vsub.f32 %v1294_v28, %v1302_v43 }
 0x8b6   :  { %v1307_v45 = vmul.f32 1.442695, %v1304_v44 }
 0x8b8   :  { %3807 = vpow2.f32 %v1307_v45 }
 0x8b9   :  { %v3802_v46 = vpop.eup %3801 }
 0x8ba   :  { %v1186_v47 = vsel %vm1173_vm4, %v3802_v46, 0.0 }
 0x8bb   :  { %1187 = vadd.xlane.f32.xlu1 %v1186_v47 }
 0x8bd   :  { %v3804_v48 = vpop.eup %3803 }
 0x8be   :  { %v1189_v49 = vsel %vm1173_vm4, %v3804_v48, 0.0 }
 0x8bf   :  { %1190 = vadd.xlane.f32.xlu0 %v1189_v49 }
 0x8c1   :  { %v3806_v50 = vpop.eup %3805 }
 0x8c2   :  { %v1309_v51 = vsel %vm1173_vm4, %v3806_v50, 0.0 }
 0x8c3   :  { %1310 = vadd.xlane.f32.xlu1 %v1309_v51 }
 0x8c5   :  { %v3808_v52 = vpop.eup %3807 }
 0x8c6   :  { %v1312_v53 = vsel %vm1173_vm4, %v3808_v52, 0.0 }
 0x8c7   :  { %1313 = vadd.xlane.f32.xlu0 %v1312_v53 }
 0x8d4   :  { %1197 = vrot.lane.b32.xlu1 %v4431_v7, %s4134_s28 }
 0x8d8   :  { %1466 = vrot.lane.b32.xlu1 %v4431_v7, %s4146_s14 }
 0x8dc   :  { %1464 = vrot.lane.b32.xlu1 %v4431_v7, %s4147_s0 }
 0x8dd   :  { %1320 = vrot.lane.b32.xlu0 %v4431_v7, %s4148_s1 }
 0x944   :  { %v1188_v54 = vpop.xlane.xlu1 %1187 }
 0x945   :  { %3809 = vrcp.f32 %v1188_v54 }
 0x948   :  { %v1191_v55 = vpop.xlane.xlu0 %1190 }
 0x949   :  { %3811 = vrcp.f32 %v1191_v55 }
 0x94c   :  { %v1311_v56 = vpop.xlane.xlu1 %1310 }
 0x94d   :  { %3813 = vrcp.f32 %v1311_v56 }
 0x950   :  { %v1198_v57 = vpop.permute.xlu1 %1197  ;;  %v1314_v58 = vpop.xlane.xlu0 %1313 }
 0x951   :  { %3815 = vrcp.f32 %v1314_v58  ;;  %3513 = vmatpush3.bf16.msra.mxu0 %v1198_v57 }
 0x952   :  { %3524 = vmatprep.subr.bf16.mxu0 %v4141_v36  ;;  %v3810_v59 = vpop.eup %3809 }
 0x953   :  { %v1194_v61 = vmul.f32 %v3810_v59, %v3802_v46 }
 0x954   :  { %v1321_v0 = vpop.permute.xlu0 %1320  ;;  %v1467_v20 = vpop.permute.xlu1 %1466 }
 0x955   :  { %v1472_v24 = vsel %vm349_vm2, %v1467_v20, 0 }
 0x956   :  { %v3812_v60 = vpop.eup %3811 }
 0x957   :  { %v1195_v62 = vmul.f32 %v3812_v60, %v3804_v48 }
 0x958   :  { %v1465_v25 = vpop.permute.xlu1 %1464 }
 0x959   :  { %v1196_v63 = vpack.c.bf16 %v1195_v62, %v1194_v61 }
 0x95a   :  { %v3814_v1 = vpop.eup %3813 }
 0x95b   :  { %3515 = vmatmul.mubr.msk.bf16.vlgmr.msra.gmra.mxu0 %vm1173_vm4, %v1196_v63  ;;  %v1317_v3 = vmul.f32 %v3814_v1, %v3806_v50 }
 0x95c   :  { %3525 = vmatpush3.bf16.msra.mxu0 %v1321_v0  ;;  %3526 = vmatprep.mubr.msk.bf16.mxu0 %vm4142_vm3, %v4141_v36 }
 0x95d   :  { %3536 = vmatprep.subr.bf16.mxu0 %v4141_v36 }
 0x95e   :  { %v3816_v2 = vpop.eup %3815 }
 0x95f   :  { %v1318_v4 = vmul.f32 %v3816_v2, %v3808_v52 }
 0x961   :  { %v1319_v5 = vpack.c.bf16 %v1318_v4, %v1317_v3  ;;  %v3211_v4 = vld [vmem:[%s4851_s11 + $0x8] sm:$0xf] }
 0x963   :  { %3527 = vmatmul.mubr.msk.bf16.vlgmr.msra.gmra.mxu0 %vm1173_vm4, %v1319_v5  ;;  %v1592_v5 = vsel %vm356_vm1, %v3211_v4, 0 }
 0x964   :  { %3538 = vmatprep.mubr.msk.bf16.mxu0 %vm4142_vm3, %v4141_v36  ;;  %3537 = vmatpush3.bf16.msra.mxu0 %v1421_v8 }
 0x965   :  { %3548 = vmatprep.subr.bf16.mxu0 %v4141_v36 }
 0xa1b   :  { %v1237_v11 = vpop.f32.mrf.mxu0 }
 0xa1d   :  { %v3516_v12 = vpop.f32.mrf.mxu0 }
 0xa1f   :  { %v1240_v14 = vpop.f32.mrf.mxu0 }
 0xa20   :  { %v1245_v15 = vpack.c.bf16 %v1240_v14, %v1237_v11 }
 0xa21   :  { %v3517_v16 = vpop.f32.mrf.mxu0 }
 0xa22   :  { %3539 = vmatmul.mubr.msk.bf16.vlgmr.msra.gmra.mxu0 %vm349_vm2, %v1245_v15 }
 0xa23   :  { %v1360_v18 = vpop.f32.mrf.mxu0  ;;  %3550 = vmatprep.mubr.msk.bf16.mxu0 %vm4142_vm3, %v4141_v36 }
 0xa25   :  { %v3528_v19 = vpop.f32.mrf.mxu0 }
 0xa27   :  { %v1363_v21 = vpop.f32.mrf.mxu0 }
 0xa28   :  { %v1369_v22 = vpack.c.bf16 %v1363_v21, %v1360_v18 }
 0xa29   :  { %v3529_v23 = vpop.f32.mrf.mxu0 }
 0xa2a   :  { %3533 = vmatmul.mubr.msk.bf16.vlgmr.msra.gmra.mxu1 %vm349_vm2, %v1369_v22 }
 0xa2b   :  { %3543 = vmatpush3.bf16.xpose.msra.mxu1 %v1472_v24  ;;  %3544 = vmatprep.mubr.msk.bf16.mxu1 %vm4142_vm3, %v4141_v36 }
 0xa2c   :  { %3554 = vmatprep.subr.bf16.mxu1 %v4141_v36 }
 0xa32   :  { %3545 = vmatmul.mubr.msk.bf16.vlgmr.msra.gmra.mxu1 %vm349_vm2, %v1465_v25 }
 0xa33   :  { %3556 = vmatprep.mubr.msk.bf16.mxu1 %vm4142_vm3, %v4141_v36  ;;  %3555 = vmatpush3.bf16.msra.mxu1 %v1592_v5 }
 0xa34   :  { %3566 = vmatprep.subr.bf16.mxu1 %v4141_v36 }
 0xae2   :  { %v1457_v26 = vpop.f32.mrf.mxu0 }
 0xae4   :  { %v3540_v27 = vpop.f32.mrf.mxu0 }
 0xae6   :  { %v1460_v28 = vpop.f32.mrf.mxu0 }
 0xae8   :  { %v3541_v29 = vpop.f32.mrf.mxu0 }
 0xaea   :  { %v1410_v30 = vpop.f32.mrf.mxu1 }
 0xaeb   :  { %v4503_v31 = vadd.f32 %v1457_v26, %v1410_v30 }
 0xaec   :  { %v3534_v32 = vpop.f32.mrf.mxu1 }
 0xaee   :  { %v1413_v34 = vpop.f32.mrf.mxu1 }
 0xaef   :  { %v4505_v35 = vadd.f32 %v1460_v28, %v1413_v34 }
 0xaf0   :  { %v3535_v37 = vpop.f32.mrf.mxu1 }
 0xaf2   :  { %v1508_v38 = vpop.f32.mrf.mxu1 }
 0xaf3   :  { %v1509_v40 = vadd.f32 %v1508_v38, %v4450_v13 }
 0xaf4   :  { %v3546_v41 = vpop.f32.mrf.mxu1 }
 0xaf5   :  { %v1515_v42 = vsel %vm1173_vm4, %v1509_v40, -inf }
 0xaf6   :  { %1516 = vmax.xlane.f32.xlu1 %v1515_v42  ;;  %v1511_v43 = vpop.f32.mrf.mxu1 }
 0xaf7   :  { %v1512_v44 = vadd.f32 %v1511_v43, %v4453_v17 }
 0xaf8   :  { %v3547_v45 = vpop.f32.mrf.mxu1 }
 0xaf9   :  { %v1518_v46 = vsel %vm1173_vm4, %v1512_v44, -inf }
 0xafa   :  { %1519 = vmax.xlane.f32.xlu0 %v1518_v46 }
 0xb07   :  { %1538 = vrot.lane.b32.xlu1 %v4431_v7, %s4149_s3 }
 0xb0b   :  { %1637 = vrot.lane.b32.xlu1 %v4431_v7, %s4150_s4 }
 0xb7f   :  { %v1517_v47 = vpop.xlane.xlu1 %1516 }
 0xb80   :  { %v1521_v48 = vsub.f32 %v1509_v40, %v1517_v47 }
 0xb82   :  { %v1523_v49 = vmul.f32 1.442695, %v1521_v48 }
 0xb83   :  { %v1539_v50 = vpop.permute.xlu1 %1538  ;;  %v1520_v51 = vpop.xlane.xlu0 %1519 }
 0xb84   :  { %3817 = vpow2.f32 %v1523_v49  ;;  %v1522_v52 = vsub.f32 %v1512_v44, %v1520_v51  ;;  %3549 = vmatpush3.bf16.msra.mxu0 %v1539_v50 }
 0xb85   :  { %3560 = vmatprep.subr.bf16.mxu0 %v4141_v36 }
 0xb86   :  { %v1525_v53 = vmul.f32 1.442695, %v1522_v52 }
 0xb87   :  { %v1638_v3 = vpop.permute.xlu1 %1637 }
 0xb88   :  { %3819 = vpow2.f32 %v1525_v53 }
 0xb91   :  { %v3818_v54 = vpop.eup %3817 }
 0xb92   :  { %v1527_v55 = vsel %vm1173_vm4, %v3818_v54, 0.0 }
 0xb93   :  { %1528 = vadd.xlane.f32.xlu0 %v1527_v55 }
 0xb95   :  { %v3820_v56 = vpop.eup %3819 }
 0xb96   :  { %v1530_v57 = vsel %vm1173_vm4, %v3820_v56, 0.0 }
 0xb97   :  { %1531 = vadd.xlane.f32.xlu0 %v1530_v57  ;;  %v3217_v57 = vld [vmem:[#allocation14] ss:$0 sm:$0xff] }
 0xbad   :  { %1639 = vrot.lane.b32.xlu0 %v4431_v7, %s4151_s29 }
 0xc1c   :  { %v1529_v58 = vpop.xlane.xlu0 %1528 }
 0xc1d   :  { %3821 = vrcp.f32 %v1529_v58 }
 0xc20   :  { %v1532_v59 = vpop.xlane.xlu0 %1531 }
 0xc21   :  { %3823 = vrcp.f32 %v1532_v59 }
 0xc24   :  { %v1640_v0 = vpop.permute.xlu0 %1639 }
 0xc25   :  { %v1645_v2 = vsel %vm349_vm2, %v1640_v0, 0 }
 0xc2a   :  { %v3822_v60 = vpop.eup %3821 }
 0xc2b   :  { %v1535_v62 = vmul.f32 %v3822_v60, %v3818_v54 }
 0xc2e   :  { %v3824_v61 = vpop.eup %3823 }
 0xc2f   :  { %v1536_v63 = vmul.f32 %v3824_v61, %v3820_v56 }
 0xc31   :  { %v1537_v1 = vpack.c.bf16 %v1536_v63, %v1535_v62 }
 0xc33   :  { %3551 = vmatmul.mubr.msk.bf16.vlgmr.msra.gmra.mxu0 %vm1173_vm4, %v1537_v1 }
 0xc34   :  { %3561 = vmatpush3.bf16.xpose.msra.mxu0 %v1645_v2  ;;  %3562 = vmatprep.mubr.msk.bf16.mxu0 %vm4142_vm3, %v4141_v36 }
 0xc35   :  { %3572 = vmatprep.subr.bf16.mxu0 %v4141_v36 }
 0xc3b   :  { %3563 = vmatmul.mubr.msk.bf16.vlgmr.msra.gmra.mxu0 %vm349_vm2, %v1638_v3 }
 0xc3c   :  { %3574 = vmatprep.mubr.msk.bf16.mxu0 %vm4142_vm3, %v4141_v36 }
 0xcf3   :  { %v1578_v6 = vpop.f32.mrf.mxu0 }
 0xcf5   :  { %v3552_v8 = vpop.f32.mrf.mxu0 }
 0xcf7   :  { %v1581_v9 = vpop.f32.mrf.mxu0 }
 0xcf8   :  { %v1587_v10 = vpack.c.bf16 %v1581_v9, %v1578_v6 }
 0xcf9   :  { %v3553_v11 = vpop.f32.mrf.mxu0 }
 0xcfa   :  { %3557 = vmatmul.mubr.msk.bf16.vlgmr.msra.gmra.mxu1 %vm349_vm2, %v1587_v10 }
 0xcfb   :  { %v1681_v12 = vpop.f32.mrf.mxu0  ;;  %3568 = vmatprep.mubr.msk.bf16.mxu1 %vm4142_vm3, %v4141_v36 }
 0xcfc   :  { %v1682_v14 = vadd.f32 %v1681_v12, %v4450_v13 }
 0xcfd   :  { %v3564_v15 = vpop.f32.mrf.mxu0 }
 0xcfe   :  { %v1688_v16 = vsel %vm1173_vm4, %v1682_v14, -inf  ;;  %v3764_v15 = vld [vmem:[%s4853_s13] sm:$0xff]  }
 0xcff   :  { %1689 = vmax.xlane.f32.xlu1 %v1688_v16  ;;  %v1684_v18 = vpop.f32.mrf.mxu0 }
 0xd00   :  { %v1685_v19 = vadd.f32 %v1684_v18, %v4453_v17 }
 0xd01   :  { %v3565_v20 = vpop.f32.mrf.mxu0 }
 0xd02   :  { %v1691_v21 = vsel %vm1173_vm4, %v1685_v19, -inf }
 0xd03   :  { %1692 = vmax.xlane.f32.xlu0 %v1691_v21 }
 0xd88   :  { %v1690_v22 = vpop.xlane.xlu1 %1689 }
 0xd89   :  { %v1694_v23 = vsub.f32 %v1682_v14, %v1690_v22  ;;  %v3763_v14 = vld [vmem:[%s4853_s13 + $0x8] sm:$0xff]  }
 0xd8b   :  { %v1696_v24 = vmul.f32 1.442695, %v1694_v23 }
 0xd8c   :  { %v1693_v25 = vpop.xlane.xlu0 %1692 }
 0xd8d   :  { %3825 = vpow2.f32 %v1696_v24  ;;  %v1695_v26 = vsub.f32 %v1685_v19, %v1693_v25 }
 0xd8f   :  { %v1698_v27 = vmul.f32 1.442695, %v1695_v26 }
 0xd91   :  { %3827 = vpow2.f32 %v1698_v27 }
 0xd9a   :  { %v3826_v28 = vpop.eup %3825 }
 0xd9b   :  { %v1700_v29 = vsel %vm1173_vm4, %v3826_v28, 0.0 }
 0xd9c   :  { %1701 = vadd.xlane.f32.xlu0 %v1700_v29  ;;  %v3766_v29 = vld [vmem:[%s4855_s15 + $0x30] sm:$0xff]  }
 0xd9e   :  { %v3828_v30 = vpop.eup %3827 }
 0xd9f   :  { %v1703_v32 = vsel %vm1173_vm4, %v3828_v30, 0.0 }
 0xda0   :  { %1704 = vadd.xlane.f32.xlu1 %v1703_v32  ;;  %v3768_v32 = vld [vmem:[%s4855_s15 + $0x20] sm:$0xff]  }
 0xdb2   :  { %1711 = vrot.lane.b32.xlu0 %v4431_v7, %s4152_s7 }
 0xdba   :  { %v1628_v34 = vpop.f32.mrf.mxu1 }
 0xdbb   :  { %v1635_v37 = vadd.f32 %v1628_v34, %v4503_v31  ;;  %v3215_v31 = vld [vmem:[%s4851_s11 + $0xc] sm:$0xf]  ;;  %v3769_v34 = vld [vmem:[%s4855_s15 + $0x18] sm:$0xff]  }
 0xdbc   :  { %v3558_v38 = vpop.f32.mrf.mxu1 }
 0xdbd   :  { %v3771_v38 = vld [vmem:[%s4855_s15 + $0x8] sm:$0xff]  }
 0xdbe   :  { %v1631_v40 = vpop.f32.mrf.mxu1 }
 0xdbf   :  { %v1636_v41 = vadd.f32 %v1631_v40, %v4505_v35  ;;  %v1765_v35 = vsel %vm356_vm1, %v3215_v31, 0  ;;  %v3772_v40 = vld [vmem:[%s4855_s15] sm:$0xff]  }
 0xdc0   :  { %v3559_v42 = vpop.f32.mrf.mxu1  ;;  %3573 = vmatpush3.bf16.msra.mxu0 %v1765_v35 }
 0xdc1   :  { %3586 = vmatprep.subr.bf16.mxu0 %v4141_v36 }
 0xe25   :  { %v1702_v43 = vpop.xlane.xlu0 %1701 }
 0xe26   :  { %3829 = vrcp.f32 %v1702_v43 }
 0xe29   :  { %v1705_v44 = vpop.xlane.xlu1 %1704  ;;  %v1712_v45 = vpop.permute.xlu0 %1711 }
 0xe2a   :  { %3831 = vrcp.f32 %v1705_v44  ;;  %3567 = vmatpush3.bf16.msra.mxu1 %v1712_v45 }
 0xe2b   :  { %3578 = vmatprep.subr.bf16.mxu1 %v4141_v36 }
 0xe33   :  { %v3830_v46 = vpop.eup %3829 }
 0xe34   :  { %v1708_v48 = vmul.f32 %v3830_v46, %v3826_v28  ;;  %v3765_v28 = vld [vmem:[%s4855_s15 + $0x38] sm:$0xff]  }
 0xe37   :  { %v3832_v47 = vpop.eup %3831 }
 0xe38   :  { %v1709_v7 = vmul.f32 %v3832_v47, %v3828_v30  ;;  %v3767_v30 = vld [vmem:[%s4855_s15 + $0x28] sm:$0xff]  }
 0xe3a   :  { %v1710_v49 = vpack.c.bf16 %v1709_v7, %v1708_v48 }
 0xe3c   :  { %3569 = vmatmul.mubr.msk.bf16.vlgmr.msra.gmra.mxu1 %vm1173_vm4, %v1710_v49 }
 0xe3d   :  { %3582 = vmatprep.mubr.msk.bf16.mxu1 %vm4142_vm3, %v4141_v36  ;;  %3579 = vmatpush3.bf16.msra.mxu1 %v3763_v14 }
 0xe3e   :  { %3580 = vmatprep.subr.bf16.mxu1 %v4141_v36 }
 0xe41   :  { %3581 = vmatpush3.bf16.msra.mxu1 %v3764_v15 }
 0xe42   :  { %3606 = vmatprep.subr.bf16.mxu1 %v4141_v36 }
 0xefc   :  { %v1751_v50 = vpop.f32.mrf.mxu1 }
 0xefe   :  { %v3570_v51 = vpop.f32.mrf.mxu1 }
 0xf00   :  { %v1754_v52 = vpop.f32.mrf.mxu1 }
 0xf01   :  { %v1760_v53 = vpack.c.bf16 %v1754_v52, %v1751_v50 }
 0xf02   :  { %v3571_v54 = vpop.f32.mrf.mxu1 }
 0xf03   :  { %3575 = vmatmul.mubr.msk.bf16.vlgmr.msra.gmra.mxu0 %vm349_vm2, %v1760_v53 }
 0xf04   :  { %3602 = vmatprep.mubr.msk.bf16.mxu0 %vm4142_vm3, %v4141_v36  ;;  %3587 = vmatpush3.bf16.msra.mxu0 %v3765_v28 }
 0xf05   :  { %3588 = vmatprep.subr.bf16.mxu0 %v4141_v36 }
 0xf08   :  { %3589 = vmatpush3.bf16.msra.mxu0 %v3766_v29 }
 0xf09   :  { %3590 = vmatprep.subr.bf16.mxu0 %v4141_v36 }
 0xf0c   :  { %3591 = vmatpush3.bf16.msra.mxu0 %v3767_v30 }
 0xf0d   :  { %3592 = vmatprep.subr.bf16.mxu0 %v4141_v36 }
 0xf10   :  { %3593 = vmatpush3.bf16.msra.mxu0 %v3768_v32 }
 0xf11   :  { %3594 = vmatprep.subr.bf16.mxu0 %v4141_v36 }
 0xf14   :  { %3595 = vmatpush3.bf16.msra.mxu0 %v3769_v34 }
 0xf15   :  { %3596 = vmatprep.subr.bf16.mxu0 %v4141_v36 }
 0xfc3   :  { %v1801_v55 = vpop.f32.mrf.mxu0 }
 0xfc4   :  { %v1808_v56 = vadd.f32 %v1801_v55, %v1635_v37  ;;  %v3770_v37 = vld [vmem:[%s4855_s15 + $0x10] sm:$0xff]  }
 0xfc5   :  { %v3576_v58 = vpop.f32.mrf.mxu0  ;;  %3597 = vmatpush3.bf16.msra.mxu0 %v3770_v37 }
 0xfc6   :  { %v1810_v59 = vadd.f32 %v1808_v56, %v4408_v33  ;;  %3598 = vmatprep.subr.bf16.mxu0 %v4141_v36 }
 0xfc7   :  { %v1804_v60 = vpop.f32.mrf.mxu0 }
 0xfc8   :  { %v4559_v61 = vadd.f32 %v3217_v57, %v1810_v59  ;;  %v1809_v62 = vadd.f32 %v1804_v60, %v1636_v41  ;;  %v3218_v41 = vld [vmem:[#allocation16] ss:$0 sm:$0xff] }
 0xfc9   :  { %v3577_v63 = vpop.f32.mrf.mxu0  ;;  %3599 = vmatpush3.bf16.msra.mxu0 %v3771_v38 }
 0xfca   :  { %v1811_v0 = vadd.f32 %v1809_v62, %v4412_v39  ;;  %v1821_v1 = vsel %vm216_vm0, %v4559_v61, 0.0  ;;  %3600 = vmatprep.subr.bf16.mxu0 %v4141_v36 }
 0xfcb   :  { %1822 = vadd.xlane.f32.xlu1 %v1821_v1 }
 0xfcc   :  { %v4564_v2 = vadd.f32 %v3217_v57, %v1811_v0 }
 0xfcd   :  { %3601 = vmatpush3.bf16.msra.mxu0 %v3772_v40 }
 0xfce   :  { %v1824_v3 = vsel %vm216_vm0, %v4564_v2, 0.0  ;;  %3632 = vmatprep.subr.bf16.mxu0 %v4141_v36 }
 0xfcf   :  { %1825 = vadd.xlane.f32.xlu1 %v1824_v3  ;;  %v3230_v3 = vld [vmem:[#allocation17] ss:$0 sm:$0xff] }
0x1054   :  { %v1823_v4 = vpop.xlane.xlu1 %1822 }
0x1055   :  { %v1827_v5 = vmul.f32 0.03125, %v1823_v4 }
0x1057   :  { %v1829_v33 = vsub.f32 %v4559_v61, %v1827_v5 }
0x1058   :  { %v1826_v6 = vpop.xlane.xlu1 %1825 }
0x1059   :  { %v1828_v8 = vmul.f32 0.03125, %v1826_v6  ;;  %v1831_v9 = vmul.f32 %v1829_v33, %v1829_v33 }
0x105b   :  { %v1830_v10 = vsub.f32 %v4564_v2, %v1828_v8  ;;  %v1833_v39 = vsel %vm216_vm0, %v1831_v9, 0.0 }
0x105c   :  { %1834 = vadd.xlane.f32.xlu1 %v1833_v39 }
0x105d   :  { %v1832_v11 = vmul.f32 %v1830_v10, %v1830_v10 }
0x105f   :  { %v1836_v12 = vsel %vm216_vm0, %v1832_v11, 0.0 }
0x1060   :  { %1837 = vadd.xlane.f32.xlu1 %v1836_v12 }
0x10e5   :  { %v1835_v16 = vpop.xlane.xlu1 %1834 }
0x10e6   :  { %v1839_v18 = vmul.f32 0.03125, %v1835_v16 }
0x10e8   :  { %v1841_v19 = vadd.f32 1e-05, %v1839_v18 }
0x10e9   :  { %v1838_v20 = vpop.xlane.xlu1 %1837 }
0x10ea   :  { %v1840_v21 = vmul.f32 0.03125, %v1838_v20  ;;  %3833 = vrsqrt.f32 %v1841_v19 }
0x10ec   :  { %v1842_v22 = vadd.f32 1e-05, %v1840_v21 }
0x10ee   :  { %3835 = vrsqrt.f32 %v1842_v22  ;;  %v3773_v22 = vld [vmem:[%s4849_s9 + $0x18] sm:$0xff]  }
0x10f7   :  { %v3834_v23 = vpop.eup %3833 }
0x10f8   :  { %v1845_v25 = vmul.f32 %v3834_v23, %v1829_v33  ;;  %v3774_v23 = vld [vmem:[%s4849_s9 + $0x10] sm:$0xff]  }
0x10fb   :  { %v3836_v24 = vpop.eup %3835 }
0x10fc   :  { %v1846_v26 = vmul.f32 %v3836_v24, %v1830_v10 }
0x10fe   :  { %v1851_v27 = vpack.c.bf16 %v1846_v26, %v1845_v25 }
0x1100   :  { %3583 = vmatmul.mubr.msk.bf16.vlgmr.msra.gmra.mxu1 %vm216_vm0, %v1851_v27 }
0x1101   :  { %3610 = vmatprep.mubr.msk.bf16.mxu1 %vm4142_vm3, %v4141_v36  ;;  %3607 = vmatpush3.bf16.msra.mxu1 %v3773_v22 }
0x1102   :  { %3608 = vmatprep.subr.bf16.mxu1 %v4141_v36 }
0x1105   :  { %3609 = vmatpush3.bf16.msra.mxu1 %v3774_v23 }
0x1106   :  { %3614 = vmatprep.subr.bf16.mxu1 %v4141_v36 }
0x11c0   :  { %v1908_v42 = vpop.f32.mrf.mxu1 }
0x11c1   :  { %v1909_v43 = vadd.f32 %v3218_v41, %v1908_v42 }
0x11c2   :  { %v3584_v44 = vpop.f32.mrf.mxu1 }
0x11c3   :  { %v1915_v45 = vmul.f32 %v1909_v43, %v1909_v43 }
0x11c4   :  { %v1911_v46 = vpop.f32.mrf.mxu1 }
0x11c5   :  { %v1917_v47 = vmul.f32 %v1915_v45, %v1909_v43  ;;  %v1912_v48 = vadd.f32 %v3218_v41, %v1911_v46  ;;  %v3235_v41 = vld [vmem:[#allocation13 + $0x1] ss:$0 sm:$0xff] }
0x11c6   :  { %v3585_v7 = vpop.f32.mrf.mxu1 }
0x11c7   :  { %v1919_v49 = vmul.f32 0.044715, %v1917_v47  ;;  %v1916_v31 = vmul.f32 %v1912_v48, %v1912_v48 }
0x11c9   :  { %v1921_v35 = vadd.f32 %v1919_v49, %v1909_v43  ;;  %v1918_v50 = vmul.f32 %v1916_v31, %v1912_v48 }
0x11cb   :  { %v1923_v51 = vmul.f32 0.7978846, %v1921_v35  ;;  %v1920_v52 = vmul.f32 0.044715, %v1918_v50 }
0x11cd   :  { %3837 = vtanh.f32 %v1923_v51  ;;  %v1922_v53 = vadd.f32 %v1920_v52, %v1912_v48 }
0x11cf   :  { %v1924_v54 = vmul.f32 0.7978846, %v1922_v53 }
0x11d1   :  { %3839 = vtanh.f32 %v1924_v54 }
0x11da   :  { %v3838_v55 = vpop.eup %3837 }
0x11db   :  { %v1927_v56 = vadd.f32 1.0, %v3838_v55 }
0x11dd   :  { %v1929_v58 = vmul.f32 0.5, %v1927_v56 }
0x11de   :  { %v3840_v57 = vpop.eup %3839 }
0x11df   :  { %v1928_v59 = vadd.f32 1.0, %v3840_v57  ;;  %v1931_v62 = vmul.f32 %v1929_v58, %v1909_v43 }
0x11e1   :  { %v1930_v60 = vmul.f32 0.5, %v1928_v59 }
0x11e3   :  { %v1932_v63 = vmul.f32 %v1930_v60, %v1912_v48 }
0x11e5   :  { %v1949_v0 = vpack.c.bf16 %v1932_v63, %v1931_v62 }
0x11e7   :  { %3603 = vmatmul.mubr.bf16.vlgmr.msra.gmra.mxu0 %v1949_v0 }
0x11e8   :  { %3634 = vmatprep.mubr.msk.bf16.mxu0 %vm4142_vm3, %v4141_v36 }
0x12a7   :  { %v2032_v1 = vpop.f32.mrf.mxu0 }
0x12a8   :  { %v2039_v4 = vadd.f32 %v2032_v1, %v4559_v61 }
0x12a9   :  { %v3604_v5 = vpop.f32.mrf.mxu0 }
0x12aa   :  { %v4618_v33 = vadd.f32 %v3230_v3, %v2039_v4 }
0x12ab   :  { %v2035_v6 = vpop.f32.mrf.mxu0 }
0x12ac   :  { %v2040_v8 = vadd.f32 %v2035_v6, %v4564_v2  ;;  %v2050_v9 = vsel %vm216_vm0, %v4618_v33, 0.0 }
0x12ad   :  { %2051 = vadd.xlane.f32.xlu1 %v2050_v9  ;;  %v3605_v10 = vpop.f32.mrf.mxu0 }
0x12ae   :  { %v4623_v39 = vadd.f32 %v3230_v3, %v2040_v8 }
0x12b0   :  { %v2053_v11 = vsel %vm216_vm0, %v4623_v39, 0.0 }
0x12b1   :  { %2054 = vadd.xlane.f32.xlu1 %v2053_v11 }
0x1336   :  { %v2052_v12 = vpop.xlane.xlu1 %2051 }
0x1337   :  { %v2056_v14 = vmul.f32 0.03125, %v2052_v12 }
0x1339   :  { %v2058_v61 = vsub.f32 %v4618_v33, %v2056_v14 }
0x133a   :  { %v2055_v15 = vpop.xlane.xlu1 %2054 }
0x133b   :  { %v2057_v16 = vmul.f32 0.03125, %v2055_v15  ;;  %v2060_v18 = vmul.f32 %v2058_v61, %v2058_v61 }
0x133d   :  { %v2059_v2 = vsub.f32 %v4623_v39, %v2057_v16  ;;  %v2062_v19 = vsel %vm216_vm0, %v2060_v18, 0.0 }
0x133e   :  { %2063 = vadd.xlane.f32.xlu0 %v2062_v19 }
0x133f   :  { %v2061_v20 = vmul.f32 %v2059_v2, %v2059_v2 }
0x1341   :  { %v2065_v21 = vsel %vm216_vm0, %v2061_v20, 0.0 }
0x1342   :  { %2066 = vadd.xlane.f32.xlu1 %v2065_v21 }
0x13c7   :  { %v2064_v24 = vpop.xlane.xlu0 %2063 }
0x13c8   :  { %v2068_v25 = vmul.f32 0.03125, %v2064_v24 }
0x13ca   :  { %v2070_v26 = vadd.f32 1e-05, %v2068_v25 }
0x13cb   :  { %v2067_v27 = vpop.xlane.xlu1 %2066 }
0x13cc   :  { %v2069_v28 = vmul.f32 0.03125, %v2067_v27  ;;  %3841 = vrsqrt.f32 %v2070_v26 }
0x13ce   :  { %v2071_v29 = vadd.f32 1e-05, %v2069_v28 }
0x13d0   :  { %3843 = vrsqrt.f32 %v2071_v29 }
0x13d9   :  { %v3842_v30 = vpop.eup %3841 }
0x13da   :  { %v2074_v34 = vmul.f32 %v3842_v30, %v2058_v61 }
0x13dd   :  { %v3844_v32 = vpop.eup %3843 }
0x13de   :  { %v2075_v37 = vmul.f32 %v3844_v32, %v2059_v2 }
0x13e0   :  { %v2081_v38 = vpack.c.bf16 %v2075_v37, %v2074_v34 }
0x13e2   :  { %3611 = vmatmul.mubr.msk.bf16.vlgmr.msra.gmra.mxu1 %vm216_vm0, %v2081_v38 }
0x13e3   :  { %3616 = vmatprep.mubr.msk.bf16.mxu1 %vm4142_vm3, %v4141_v36 }
0x14a2   :  { %v2139_v40 = vpop.f32.mrf.mxu1 }
0x14a3   :  { %v2140_v44 = vadd.f32 %v3235_v41, %v2139_v40 }
0x14a4   :  { %v3612_v42 = vpop.f32.mrf.mxu1 }
0x14a6   :  { %v2142_v43 = vpop.f32.mrf.mxu1 }
0x14a7   :  { %v2143_v45 = vadd.f32 %v3235_v41, %v2142_v43 }
0x14a8   :  { %v3613_v46 = vpop.f32.mrf.mxu1 }
0x14a9   :  { %v4642_v47 = vpack.c.bf16 %v2143_v45, %v2140_v44  ;;  %v3241_v46 = vld [vmem:[%s4851_s11 + $0x10] sm:$0xf] }
0x14ab   :  { %2148 = vrot.lane.b32.xlu1 %v4642_v47, %s4144_s10 }
0x151d   :  { %v2149_v48 = vpop.permute.xlu1 %2148 }
0x151e   :  { %v2154_v7 = vsel %vm349_vm2, %v2149_v48, 0 }
0x151f   :  { %3615 = vmatpush3.bf16.xpose.msra.mxu1 %v2154_v7 }
0x1520   :  { %3620 = vmatprep.subr.bf16.mxu1 %v4141_v36 }
0x1526   :  { %3617 = vmatmul.mubr.msk.bf16.vlgmr.msra.gmra.mxu1 %vm349_vm2, %v4642_v47 }
0x1527   :  { %3622 = vmatprep.mubr.msk.bf16.mxu1 %vm4142_vm3, %v4141_v36 }
0x15e6   :  { %v2190_v49 = vpop.f32.mrf.mxu1 }
0x15e7   :  { %v2191_v31 = vadd.f32 %v2190_v49, %v4450_v13 }
0x15e8   :  { %v3618_v35 = vpop.f32.mrf.mxu1 }
0x15e9   :  { %v2197_v50 = vsel %vm1173_vm4, %v2191_v31, -inf  ;;  %v3244_v35 = vld [vmem:[%s4851_s11 + $0x14] sm:$0xf] }
0x15ea   :  { %2198 = vmax.xlane.f32.xlu1 %v2197_v50  ;;  %v2193_v51 = vpop.f32.mrf.mxu1  ;;  %v2398_v50 = vsel %vm356_vm1, %v3244_v35, 0 }
0x15eb   :  { %v2194_v52 = vadd.f32 %v2193_v51, %v4453_v17 }
0x15ec   :  { %v3619_v53 = vpop.f32.mrf.mxu1 }
0x15ed   :  { %v2200_v54 = vsel %vm1173_vm4, %v2194_v52, -inf }
0x15ee   :  { %2201 = vmax.xlane.f32.xlu0 %v2200_v54 }
0x15fb   :  { %2272 = vrot.lane.b32.xlu1 %v4642_v47, %s4143_s23 }
0x1673   :  { %v2199_v55 = vpop.xlane.xlu1 %2198 }
0x1674   :  { %v2203_v56 = vsub.f32 %v2191_v31, %v2199_v55  ;;  %v2445_v31 = vsel %vm356_vm1, %v3241_v46, 0 }
0x1676   :  { %v2205_v57 = vmul.f32 1.442695, %v2203_v56 }
0x1677   :  { %v2202_v58 = vpop.xlane.xlu0 %2201  ;;  %v2273_v11 = vpop.permute.xlu1 %2272 }
0x1678   :  { %3845 = vpow2.f32 %v2205_v57  ;;  %v2204_v59 = vsub.f32 %v2194_v52, %v2202_v58  ;;  %v2278_v14 = vsel %vm349_vm2, %v2273_v11, 0 }
0x167a   :  { %v2207_v60 = vmul.f32 1.442695, %v2204_v59 }
0x167c   :  { %3847 = vpow2.f32 %v2207_v60 }
0x1685   :  { %v3846_v62 = vpop.eup %3845 }
0x1686   :  { %v2209_v63 = vsel %vm1173_vm4, %v3846_v62, 0.0 }
0x1687   :  { %2210 = vadd.xlane.f32.xlu0 %v2209_v63 }
0x1689   :  { %v3848_v0 = vpop.eup %3847 }
0x168a   :  { %v2212_v1 = vsel %vm1173_vm4, %v3848_v0, 0.0 }
0x168b   :  { %2213 = vadd.xlane.f32.xlu0 %v2212_v1 }
0x16a1   :  { %2220 = vrot.lane.b32.xlu0 %v4642_v47, %s4134_s28 }
0x16a5   :  { %2270 = vrot.lane.b32.xlu0 %v4642_v47, %s4145_s8 }
0x1710   :  { %v2211_v3 = vpop.xlane.xlu0 %2210 }
0x1711   :  { %3849 = vrcp.f32 %v2211_v3 }
0x1714   :  { %v2214_v4 = vpop.xlane.xlu0 %2213 }
0x1715   :  { %3851 = vrcp.f32 %v2214_v4 }
0x1718   :  { %v2221_v5 = vpop.permute.xlu0 %2220 }
0x1719   :  { %3621 = vmatpush3.bf16.msra.mxu1 %v2221_v5 }
0x171a   :  { %3626 = vmatprep.subr.bf16.mxu1 %v4141_v36 }
0x171c   :  { %v2271_v61 = vpop.permute.xlu0 %2270 }
0x171e   :  { %v3850_v6 = vpop.eup %3849 }
0x171f   :  { %v2217_v9 = vmul.f32 %v3850_v6, %v3846_v62  ;;  %v3889_v6 = vld [vmem:[#allocation11] sm:$0xff] }
0x1722   :  { %v3852_v8 = vpop.eup %3851 }
0x1723   :  { %v2218_v10 = vmul.f32 %v3852_v8, %v3848_v0 }
0x1725   :  { %v2219_v12 = vpack.c.bf16 %v2218_v10, %v2217_v9 }
0x1727   :  { %3623 = vmatmul.mubr.msk.bf16.vlgmr.msra.gmra.mxu1 %vm1173_vm4, %v2219_v12  ;;  %v3890_v12 = vld [vmem:[#allocation11 + $0x8] sm:$0xff] }
0x1728   :  { %3627 = vmatpush3.bf16.xpose.msra.mxu1 %v2278_v14  ;;  %3628 = vmatprep.mubr.msk.bf16.mxu1 %vm4142_vm3, %v4141_v36 }
0x1729   :  { %3638 = vmatprep.subr.bf16.mxu1 %v4141_v36 }
0x172f   :  { %3629 = vmatmul.mubr.msk.bf16.vlgmr.msra.gmra.mxu1 %vm349_vm2, %v2271_v61 }
0x1730   :  { %3640 = vmatprep.mubr.msk.bf16.mxu1 %vm4142_vm3, %v4141_v36  ;;  %3639 = vmatpush3.bf16.msra.mxu1 %v2398_v50 }
0x1731   :  { %3650 = vmatprep.subr.bf16.mxu1 %v4141_v36 }
0x17e7   :  { %v2260_v15 = vpop.f32.mrf.mxu1 }
0x17e9   :  { %v3624_v16 = vpop.f32.mrf.mxu1 }
0x17eb   :  { %v2263_v18 = vpop.f32.mrf.mxu1 }
0x17ec   :  { %v2269_v2 = vpack.c.bf16 %v2263_v18, %v2260_v15 }
0x17ed   :  { %v3625_v19 = vpop.f32.mrf.mxu1 }
0x17ef   :  { %v2314_v20 = vpop.f32.mrf.mxu1 }
0x17f0   :  { %v2315_v21 = vadd.f32 %v2314_v20, %v4450_v13 }
0x17f1   :  { %v3630_v22 = vpop.f32.mrf.mxu1 }
0x17f2   :  { %v2321_v23 = vsel %vm1173_vm4, %v2315_v21, -inf }
0x17f3   :  { %2322 = vmax.xlane.f32.xlu0 %v2321_v23  ;;  %v2317_v24 = vpop.f32.mrf.mxu1 }
0x17f4   :  { %v2318_v25 = vadd.f32 %v2317_v24, %v4453_v17 }
0x17f5   :  { %v3631_v26 = vpop.f32.mrf.mxu1 }
0x17f6   :  { %v2324_v27 = vsel %vm1173_vm4, %v2318_v25, -inf }
0x17f7   :  { %2325 = vmax.xlane.f32.xlu1 %v2324_v27 }
0x1808   :  { %2490 = vrot.lane.b32.xlu1 %v4642_v47, %s4146_s14 }
0x180c   :  { %2488 = vrot.lane.b32.xlu1 %v4642_v47, %s4147_s0  ;;  %s4153_s0 = smov [#allocation19]  }
0x187c   :  { %v2323_v28 = vpop.xlane.xlu0 %2322 }
0x187d   :  { %v2327_v29 = vsub.f32 %v2315_v21, %v2323_v28 }
0x187f   :  { %v2329_v13 = vmul.f32 1.442695, %v2327_v29 }
0x1880   :  { %v2326_v30 = vpop.xlane.xlu1 %2325 }
0x1881   :  { %3853 = vpow2.f32 %v2329_v13  ;;  %v2328_v32 = vsub.f32 %v2318_v25, %v2326_v30 }
0x1883   :  { %v2331_v34 = vmul.f32 1.442695, %v2328_v32 }
0x1884   :  { %v2491_v53 = vpop.permute.xlu1 %2490 }
0x1885   :  { %3855 = vpow2.f32 %v2331_v34  ;;  %v2496_v57 = vsel %vm349_vm2, %v2491_v53, 0 }
0x1888   :  { %v2489_v62 = vpop.permute.xlu1 %2488 }
0x188e   :  { %v3854_v37 = vpop.eup %3853 }
0x188f   :  { %v2333_v17 = vsel %vm1173_vm4, %v3854_v37, 0.0 }
0x1890   :  { %2334 = vadd.xlane.f32.xlu0 %v2333_v17 }
0x1892   :  { %v3856_v38 = vpop.eup %3855 }
0x1893   :  { %v2336_v40 = vsel %vm1173_vm4, %v3856_v38, 0.0 }
0x1894   :  { %2337 = vadd.xlane.f32.xlu0 %v2336_v40  ;;  %v3249_v40 = vld [vmem:[%s4851_s11 + $0x18] sm:$0xf] }
0x18aa   :  { %2344 = vrot.lane.b32.xlu0 %v4642_v47, %s4148_s1  ;;  %s3130_s1 = sshll.u32 %s4153_s0, 4  ;;  %s3131_s1 = int_to_ptr.vmem [resolvable:$true] %s3130_s1 }
0x18ab   :  { %p4096_p9 = scmp.lt.s32.totalorder %s3131_s1, %s3131_s1 }
0x1919   :  { %v2335_v41 = vpop.xlane.xlu0 %2334 }
0x191a   :  { %3857 = vrcp.f32 %v2335_v41  ;;  %v2616_v41 = vsel %vm356_vm1, %v3249_v40, 0 }
0x191d   :  { %v2338_v42 = vpop.xlane.xlu0 %2337 }
0x191e   :  { %3859 = vrcp.f32 %v2338_v42 }
0x1921   :  { %v2345_v43 = vpop.permute.xlu0 %2344 }
0x1922   :  { %3633 = vmatpush3.bf16.msra.mxu0 %v2345_v43 }
0x1923   :  { %3644 = vmatprep.subr.bf16.mxu0 %v4141_v36 }
0x1927   :  { %v3858_v44 = vpop.eup %3857 }
0x1928   :  { %v2341_v48 = vmul.f32 %v3858_v44, %v3854_v37 }
0x192b   :  { %v3860_v45 = vpop.eup %3859 }
0x192c   :  { %v2342_v7 = vmul.f32 %v3860_v45, %v3856_v38 }
0x192e   :  { %v2343_v49 = vpack.c.bf16 %v2342_v7, %v2341_v48 }
0x1930   :  { %3635 = vmatmul.mubr.msk.bf16.vlgmr.msra.gmra.mxu0 %vm1173_vm4, %v2343_v49 }
0x1931   :  { %3645 = vmatpush3.bf16.msra.mxu0 %v2445_v31  ;;  %3646 = vmatprep.mubr.msk.bf16.mxu0 %vm4142_vm3, %v4141_v36 }
0x1932   :  { %3656 = vmatprep.subr.bf16.mxu0 %v4141_v36 }
0x1938   :  { %3647 = vmatmul.mubr.msk.bf16.vlgmr.msra.gmra.mxu0 %vm349_vm2, %v2269_v2 }
0x1939   :  { %3658 = vmatprep.mubr.msk.bf16.mxu0 %vm4142_vm3, %v4141_v36 }
0x19f0   :  { %v2384_v51 = vpop.f32.mrf.mxu0 }
0x19f2   :  { %v3636_v52 = vpop.f32.mrf.mxu0 }
0x19f4   :  { %v2387_v54 = vpop.f32.mrf.mxu0 }
0x19f5   :  { %v2393_v55 = vpack.c.bf16 %v2387_v54, %v2384_v51 }
0x19f6   :  { %v3637_v56 = vpop.f32.mrf.mxu0 }
0x19f7   :  { %3641 = vmatmul.mubr.msk.bf16.vlgmr.msra.gmra.mxu1 %vm349_vm2, %v2393_v55 }
0x19f8   :  { %3651 = vmatpush3.bf16.xpose.msra.mxu1 %v2496_v57  ;;  %v4704_v58 = vpop.f32.mrf.mxu0  ;;  %3652 = vmatprep.mubr.msk.bf16.mxu1 %vm4142_vm3, %v4141_v36 }
0x19f9   :  { %3662 = vmatprep.subr.bf16.mxu1 %v4141_v36 }
0x19fa   :  { %v3648_v59 = vpop.f32.mrf.mxu0 }
0x19fc   :  { %v4709_v60 = vpop.f32.mrf.mxu0 }
0x19fe   :  { %v3649_v63 = vpop.f32.mrf.mxu0 }
0x19ff   :  { %3653 = vmatmul.mubr.msk.bf16.vlgmr.msra.gmra.mxu1 %vm349_vm2, %v2489_v62 }
0x1a00   :  { %3664 = vmatprep.mubr.msk.bf16.mxu1 %vm4142_vm3, %v4141_v36  ;;  %3663 = vmatpush3.bf16.msra.mxu1 %v2616_v41 }
0x1a01   :  { %3674 = vmatprep.subr.bf16.mxu1 %v4141_v36 }
0x1ab7   :  { %v4714_v0 = vpop.f32.mrf.mxu1 }
0x1ab9   :  { %v3642_v1 = vpop.f32.mrf.mxu1 }
0x1abb   :  { %v4716_v3 = vpop.f32.mrf.mxu1 }
0x1abd   :  { %v3643_v4 = vpop.f32.mrf.mxu1 }
0x1abf   :  { %v2532_v5 = vpop.f32.mrf.mxu1 }
0x1ac0   :  { %v2533_v8 = vadd.f32 %v3889_v6, %v2532_v5 }
0x1ac1   :  { %v3654_v9 = vpop.f32.mrf.mxu1 }
0x1ac2   :  { %v2539_v10 = vsel %vm1173_vm4, %v2533_v8, -inf }
0x1ac3   :  { %2540 = vmax.xlane.f32.xlu0 %v2539_v10  ;;  %v2535_v11 = vpop.f32.mrf.mxu1  ;;  %v2485_v10 = vadd.f32 %v4709_v60, %v4716_v3 }
0x1ac4   :  { %v2536_v14 = vadd.f32 %v3890_v12, %v2535_v11 }
0x1ac5   :  { %v3655_v61 = vpop.f32.mrf.mxu1 }
0x1ac6   :  { %v2542_v15 = vsel %vm1173_vm4, %v2536_v14, -inf }
0x1ac7   :  { %2543 = vmax.xlane.f32.xlu1 %v2542_v15 }
0x1ad8   :  { %2663 = vrot.lane.b32.xlu1 %v4642_v47, %s4151_s29 }
0x1adc   :  { %2661 = vrot.lane.b32.xlu1 %v4642_v47, %s4150_s4 }
0x1b4c   :  { %v2541_v16 = vpop.xlane.xlu0 %2540 }
0x1b4d   :  { %v2545_v18 = vsub.f32 %v2533_v8, %v2541_v16 }
0x1b4f   :  { %v2547_v2 = vmul.f32 1.442695, %v2545_v18 }
0x1b50   :  { %v2544_v19 = vpop.xlane.xlu1 %2543 }
0x1b51   :  { %3861 = vpow2.f32 %v2547_v2  ;;  %v2546_v20 = vsub.f32 %v2536_v14, %v2544_v19 }
0x1b53   :  { %v2549_v21 = vmul.f32 1.442695, %v2546_v20 }
0x1b54   :  { %v2664_v34 = vpop.permute.xlu1 %2663 }
0x1b55   :  { %3863 = vpow2.f32 %v2549_v21  ;;  %v2669_v17 = vsel %vm349_vm2, %v2664_v34, 0 }
0x1b58   :  { %v2662_v38 = vpop.permute.xlu1 %2661 }
0x1b5e   :  { %v3862_v22 = vpop.eup %3861 }
0x1b5f   :  { %v2551_v23 = vsel %vm1173_vm4, %v3862_v22, 0.0 }
0x1b60   :  { %2552 = vadd.xlane.f32.xlu0 %v2551_v23 }
0x1b62   :  { %v3864_v24 = vpop.eup %3863 }
0x1b63   :  { %v2554_v25 = vsel %vm1173_vm4, %v3864_v24, 0.0 }
0x1b64   :  { %2555 = vadd.xlane.f32.xlu0 %v2554_v25 }
0x1b7a   :  { %2562 = vrot.lane.b32.xlu0 %v4642_v47, %s4149_s3 }
0x1be9   :  { %v2553_v26 = vpop.xlane.xlu0 %2552 }
0x1bea   :  { %3865 = vrcp.f32 %v2553_v26  ;;  %v3255_v26 = vld [vmem:[#allocation14 + $0x1] ss:$0 sm:$0xff] }
0x1bed   :  { %v2556_v27 = vpop.xlane.xlu0 %2555 }
0x1bee   :  { %3867 = vrcp.f32 %v2556_v27 }
0x1bf1   :  { %v2563_v28 = vpop.permute.xlu0 %2562 }
0x1bf2   :  { %3657 = vmatpush3.bf16.msra.mxu0 %v2563_v28 }
0x1bf3   :  { %3668 = vmatprep.subr.bf16.mxu0 %v4141_v36 }
0x1bf7   :  { %v3866_v29 = vpop.eup %3865 }
0x1bf8   :  { %v2559_v30 = vmul.f32 %v3866_v29, %v3862_v22 }
0x1bfb   :  { %v3868_v13 = vpop.eup %3867 }
0x1bfc   :  { %v2560_v32 = vmul.f32 %v3868_v13, %v3864_v24 }
0x1bfe   :  { %v2561_v37 = vpack.c.bf16 %v2560_v32, %v2559_v30 }
0x1c00   :  { %3659 = vmatmul.mubr.msk.bf16.vlgmr.msra.gmra.mxu0 %vm1173_vm4, %v2561_v37 }
0x1c01   :  { %3669 = vmatpush3.bf16.xpose.msra.mxu0 %v2669_v17  ;;  %3670 = vmatprep.mubr.msk.bf16.mxu0 %vm4142_vm3, %v4141_v36 }
0x1c02   :  { %3680 = vmatprep.subr.bf16.mxu0 %v4141_v36 }
0x1c08   :  { %3671 = vmatmul.mubr.msk.bf16.vlgmr.msra.gmra.mxu0 %vm349_vm2, %v2662_v38 }
0x1c09   :  { %3682 = vmatprep.mubr.msk.bf16.mxu0 %vm4142_vm3, %v4141_v36 }
0x1cc0   :  { %v2602_v42 = vpop.f32.mrf.mxu0 }
0x1cc2   :  { %v3660_v43 = vpop.f32.mrf.mxu0 }
0x1cc4   :  { %v2605_v44 = vpop.f32.mrf.mxu0 }
0x1cc5   :  { %v2611_v45 = vpack.c.bf16 %v2605_v44, %v2602_v42 }
0x1cc6   :  { %v3661_v46 = vpop.f32.mrf.mxu0 }
0x1cc7   :  { %3665 = vmatmul.mubr.msk.bf16.vlgmr.msra.gmra.mxu1 %vm349_vm2, %v2611_v45 }
0x1cc8   :  { %v2705_v48 = vpop.f32.mrf.mxu0  ;;  %3676 = vmatprep.mubr.msk.bf16.mxu1 %vm4142_vm3, %v4141_v36 }
0x1cc9   :  { %v2706_v7 = vadd.f32 %v3889_v6, %v2705_v48 }
0x1cca   :  { %v3672_v49 = vpop.f32.mrf.mxu0 }
0x1ccb   :  { %v2712_v31 = vsel %vm1173_vm4, %v2706_v7, -inf  ;;  %v3776_v49 = vld [vmem:[%s4853_s13 + $0x10] sm:$0xff]  }
0x1ccc   :  { %2713 = vmax.xlane.f32.xlu1 %v2712_v31  ;;  %v2708_v35 = vpop.f32.mrf.mxu0 }
0x1ccd   :  { %v2709_v50 = vadd.f32 %v3890_v12, %v2708_v35 }
0x1cce   :  { %v3673_v51 = vpop.f32.mrf.mxu0 }
0x1ccf   :  { %v2715_v52 = vsel %vm1173_vm4, %v2709_v50, -inf }
0x1cd0   :  { %2716 = vmax.xlane.f32.xlu0 %v2715_v52 }
0x1cdd   :  { %2735 = vrot.lane.b32.xlu1 %v4642_v47, %s4152_s7  ;;  %v2482_v47 = vadd.f32 %v4704_v58, %v4714_v0  ;;  %v3253_v58 = vld [vmem:[%s4851_s11 + $0x1c] sm:$0xf]  ;;  %s4091_s11 = scalar_lea.vmem %s3131_s1, 256 }
0x1cde   :  { %v2789_v60 = vsel %vm356_vm1, %v3253_v58, 0  ;;  %p4092_p8 = scmp.ne.s32.totalorder %s3131_s1, %s4091_s11  ;;  %p4097_p10 = scmp.lt.s32.totalorder %s4091_s11, %s4091_s11 }
0x1cdf   :  { %3681 = vmatpush3.bf16.msra.mxu0 %v2789_v60 }
0x1ce0   :  { %3694 = vmatprep.subr.bf16.mxu0 %v4141_v36  ;;  %p4098_p11 = por %p4097_p10, %p4096_p9 }
0x1ce2   :  { %p4099_p12 = pnand %p4098_p11, %p4092_p8 }
0x1d55   :  { %v2714_v53 = vpop.xlane.xlu1 %2713 }
0x1d56   :  { %v2718_v54 = vsub.f32 %v2706_v7, %v2714_v53  ;;  %v3775_v7 = vld [vmem:[%s4853_s13 + $0x18] sm:$0xff]  }
0x1d58   :  { %v2720_v55 = vmul.f32 1.442695, %v2718_v54 }
0x1d59   :  { %v2736_v56 = vpop.permute.xlu1 %2735  ;;  %v2717_v57 = vpop.xlane.xlu0 %2716 }
0x1d5a   :  { %3869 = vpow2.f32 %v2720_v55  ;;  %v2719_v59 = vsub.f32 %v2709_v50, %v2717_v57  ;;  %3675 = vmatpush3.bf16.msra.mxu1 %v2736_v56 }
0x1d5b   :  { %3686 = vmatprep.subr.bf16.mxu1 %v4141_v36 }
0x1d5c   :  { %v2722_v62 = vmul.f32 1.442695, %v2719_v59 }
0x1d5e   :  { %3871 = vpow2.f32 %v2722_v62  ;;  %v3777_v62 = vld [vmem:[%s4855_s15 + $0x78] sm:$0xff]  }
0x1d67   :  { %v3870_v63 = vpop.eup %3869 }
0x1d68   :  { %v2724_v1 = vsel %vm1173_vm4, %v3870_v63, 0.0 }
0x1d69   :  { %2725 = vadd.xlane.f32.xlu0 %v2724_v1  ;;  %v3779_v1 = vld [vmem:[%s4855_s15 + $0x68] sm:$0xff]  }
0x1d6b   :  { %v3872_v4 = vpop.eup %3871 }
0x1d6c   :  { %v2727_v5 = vsel %vm1173_vm4, %v3872_v4, 0.0 }
0x1d6d   :  { %2728 = vadd.xlane.f32.xlu0 %v2727_v5  ;;  %v3781_v5 = vld [vmem:[%s4855_s15 + $0x58] sm:$0xff]  }
0x1d87   :  { %v2652_v6 = vpop.f32.mrf.mxu1 }
0x1d88   :  { %v2659_v8 = vadd.f32 %v2652_v6, %v2482_v47  ;;  %v3782_v47 = vld [vmem:[%s4855_s15 + $0x50] sm:$0xff]   ;;  %v3783_v6 = vld [vmem:[%s4855_s15 + $0x48] sm:$0xff]  }
0x1d89   :  { %v3666_v9 = vpop.f32.mrf.mxu1 }
0x1d8a   :  { %v3260_v9 = vld [vmem:[#allocation16 + $0x1] ss:$0 sm:$0xff] }
0x1d8b   :  { %v2655_v11 = vpop.f32.mrf.mxu1 }
0x1d8c   :  { %v2660_v12 = vadd.f32 %v2655_v11, %v2485_v10 }
0x1d8d   :  { %v3667_v14 = vpop.f32.mrf.mxu1 }
0x1df2   :  { %v2726_v61 = vpop.xlane.xlu0 %2725 }
0x1df3   :  { %3873 = vrcp.f32 %v2726_v61 }
0x1df6   :  { %v2729_v15 = vpop.xlane.xlu0 %2728 }
0x1df7   :  { %3875 = vrcp.f32 %v2729_v15 }
0x1e00   :  { %v3874_v16 = vpop.eup %3873 }
0x1e01   :  { %v2732_v2 = vmul.f32 %v3874_v16, %v3870_v63  ;;  %v3778_v63 = vld [vmem:[%s4855_s15 + $0x70] sm:$0xff]  }
0x1e04   :  { %v3876_v18 = vpop.eup %3875 }
0x1e05   :  { %v2733_v19 = vmul.f32 %v3876_v18, %v3872_v4  ;;  %v3780_v4 = vld [vmem:[%s4855_s15 + $0x60] sm:$0xff]  }
0x1e07   :  { %v2734_v20 = vpack.c.bf16 %v2733_v19, %v2732_v2 }
0x1e09   :  { %3677 = vmatmul.mubr.msk.bf16.vlgmr.msra.gmra.mxu1 %vm1173_vm4, %v2734_v20 }
0x1e0a   :  { %3690 = vmatprep.mubr.msk.bf16.mxu1 %vm4142_vm3, %v4141_v36  ;;  %3687 = vmatpush3.bf16.msra.mxu1 %v3775_v7 }
0x1e0b   :  { %3688 = vmatprep.subr.bf16.mxu1 %v4141_v36 }
0x1e0e   :  { %3689 = vmatpush3.bf16.msra.mxu1 %v3776_v49 }
0x1ec9   :  { %v2775_v0 = vpop.f32.mrf.mxu1 }
0x1ecb   :  { %v3678_v3 = vpop.f32.mrf.mxu1 }
0x1ecd   :  { %v2778_v21 = vpop.f32.mrf.mxu1 }
0x1ece   :  { %v2784_v22 = vpack.c.bf16 %v2778_v21, %v2775_v0 }
0x1ecf   :  { %v3679_v23 = vpop.f32.mrf.mxu1 }
0x1ed0   :  { %3683 = vmatmul.mubr.msk.bf16.vlgmr.msra.gmra.mxu0 %vm349_vm2, %v2784_v22 }
0x1ed1   :  { %3710 = vmatprep.mubr.msk.bf16.mxu0 %vm4142_vm3, %v4141_v36  ;;  %3695 = vmatpush3.bf16.msra.mxu0 %v3777_v62  ;;  %v3290_v62 = vld [vmem:[%s4858_s18] ss:$0 sm:$0xff] }
0x1ed2   :  { %3696 = vmatprep.subr.bf16.mxu0 %v4141_v36 }
0x1ed5   :  { %3697 = vmatpush3.bf16.msra.mxu0 %v3778_v63 }
0x1ed6   :  { %3698 = vmatprep.subr.bf16.mxu0 %v4141_v36 }
0x1ed9   :  { %3699 = vmatpush3.bf16.msra.mxu0 %v3779_v1 }
0x1eda   :  { %3700 = vmatprep.subr.bf16.mxu0 %v4141_v36 }
0x1edd   :  { %3701 = vmatpush3.bf16.msra.mxu0 %v3780_v4 }
0x1ede   :  { %3702 = vmatprep.subr.bf16.mxu0 %v4141_v36 }
0x1ee1   :  { %3703 = vmatpush3.bf16.msra.mxu0 %v3781_v5 }
0x1ee2   :  { %3704 = vmatprep.subr.bf16.mxu0 %v4141_v36 }
0x1ee5   :  { %3705 = vmatpush3.bf16.msra.mxu0 %v3782_v47 }
0x1ee6   :  { %3706 = vmatprep.subr.bf16.mxu0 %v4141_v36 }
0x1ee9   :  { %3707 = vmatpush3.bf16.msra.mxu0 %v3783_v6 }
0x1eea   :  { %3708 = vmatprep.subr.bf16.mxu0 %v4141_v36 }
0x1f90   :  { %v2825_v24 = vpop.f32.mrf.mxu0 }
0x1f91   :  { %v2832_v25 = vadd.f32 %v2825_v24, %v2659_v8  ;;  %v3784_v8 = vld [vmem:[%s4855_s15 + $0x40] sm:$0xff]  }
0x1f92   :  { %v3684_v27 = vpop.f32.mrf.mxu0  ;;  %3709 = vmatpush3.bf16.msra.mxu0 %v3784_v8 }
0x1f93   :  { %v2834_v28 = vadd.f32 %v2832_v25, %v4618_v33 }
0x1f94   :  { %v2828_v29 = vpop.f32.mrf.mxu0 }
0x1f95   :  { %v4768_v13 = vadd.f32 %v3255_v26, %v2834_v28  ;;  %v2833_v30 = vadd.f32 %v2828_v29, %v2660_v12 }
0x1f96   :  { %v3685_v32 = vpop.f32.mrf.mxu0 }
0x1f97   :  { %v2835_v34 = vadd.f32 %v2833_v30, %v4623_v39  ;;  %v2846_v37 = vsel %vm216_vm0, %v4768_v13, 0.0  ;;  %v3288_v32 = vld [vmem:[#allocation17 + $0x1] ss:$0 sm:$0xff] }
0x1f98   :  { %2847 = vadd.xlane.f32.xlu0 %v2846_v37 }
0x1f99   :  { %v4773_v17 = vadd.f32 %v3255_v26, %v2835_v34 }
0x1f9b   :  { %v2849_v38 = vsel %vm216_vm0, %v4773_v17, 0.0 }
0x1f9c   :  { %2850 = vadd.xlane.f32.xlu0 %v2849_v38 }
0x2021   :  { %v2848_v40 = vpop.xlane.xlu0 %2847 }
0x2022   :  { %v2852_v41 = vmul.f32 0.03125, %v2848_v40 }
0x2024   :  { %v2854_v33 = vsub.f32 %v4768_v13, %v2852_v41 }
0x2025   :  { %v2851_v42 = vpop.xlane.xlu0 %2850 }
0x2026   :  { %v2853_v43 = vmul.f32 0.03125, %v2851_v42  ;;  %v2856_v44 = vmul.f32 %v2854_v33, %v2854_v33 }
0x2028   :  { %v2855_v45 = vsub.f32 %v4773_v17, %v2853_v43  ;;  %v2858_v39 = vsel %vm216_vm0, %v2856_v44, 0.0 }
0x2029   :  { %2859 = vadd.xlane.f32.xlu0 %v2858_v39 }
0x202a   :  { %v2857_v46 = vmul.f32 %v2855_v45, %v2855_v45 }
0x202c   :  { %v2861_v48 = vsel %vm216_vm0, %v2857_v46, 0.0 }
0x202d   :  { %2862 = vadd.xlane.f32.xlu0 %v2861_v48 }
0x20b2   :  { %v2860_v31 = vpop.xlane.xlu0 %2859 }
0x20b3   :  { %v2864_v35 = vmul.f32 0.03125, %v2860_v31 }
0x20b5   :  { %v2866_v50 = vadd.f32 1e-05, %v2864_v35 }
0x20b6   :  { %v2863_v51 = vpop.xlane.xlu0 %2862 }
0x20b7   :  { %v2865_v52 = vmul.f32 0.03125, %v2863_v51  ;;  %3877 = vrsqrt.f32 %v2866_v50 }
0x20b9   :  { %v2867_v53 = vadd.f32 1e-05, %v2865_v52 }
0x20bb   :  { %3879 = vrsqrt.f32 %v2867_v53 }
0x20c4   :  { %v3878_v54 = vpop.eup %3877 }
0x20c5   :  { %v2870_v56 = vmul.f32 %v3878_v54, %v2854_v33 }
0x20c8   :  { %v3880_v55 = vpop.eup %3879 }
0x20c9   :  { %v2871_v57 = vmul.f32 %v3880_v55, %v2855_v45 }
0x20cb   :  { %v2877_v59 = vpack.c.bf16 %v2871_v57, %v2870_v56  ;;  %v3289_v57 = vld [vmem:[%s4857_s17] ss:$0 sm:$0xff] }
0x20cd   :  { %3691 = vmatmul.mubr.msk.bf16.vlgmr.msra.gmra.mxu1 %vm216_vm0, %v2877_v59 }
0x218d   :  { %v2935_v10 = vpop.f32.mrf.mxu1 }
0x218e   :  { %v2936_v11 = vadd.f32 %v3260_v9, %v2935_v10 }
0x218f   :  { %v3692_v12 = vpop.f32.mrf.mxu1 }
0x2190   :  { %v2942_v14 = vmul.f32 %v2936_v11, %v2936_v11 }
0x2191   :  { %v2938_v61 = vpop.f32.mrf.mxu1 }
0x2192   :  { %v2944_v15 = vmul.f32 %v2942_v14, %v2936_v11  ;;  %v2939_v16 = vadd.f32 %v3260_v9, %v2938_v61 }
0x2193   :  { %v3693_v18 = vpop.f32.mrf.mxu1 }
0x2194   :  { %v2946_v2 = vmul.f32 0.044715, %v2944_v15  ;;  %v2943_v19 = vmul.f32 %v2939_v16, %v2939_v16 }
0x2196   :  { %v2948_v20 = vadd.f32 %v2946_v2, %v2936_v11  ;;  %v2945_v58 = vmul.f32 %v2943_v19, %v2939_v16 }
0x2198   :  { %v2950_v60 = vmul.f32 0.7978846, %v2948_v20  ;;  %v2947_v36 = vmul.f32 0.044715, %v2945_v58 }
0x219a   :  { %3881 = vtanh.f32 %v2950_v60  ;;  %v2949_v0 = vadd.f32 %v2947_v36, %v2939_v16 }
0x219c   :  { %v2951_v3 = vmul.f32 0.7978846, %v2949_v0 }
0x219e   :  { %3883 = vtanh.f32 %v2951_v3 }
0x21a7   :  { %v3882_v21 = vpop.eup %3881 }
0x21a8   :  { %v2954_v22 = vadd.f32 1.0, %v3882_v21 }
0x21aa   :  { %v2956_v24 = vmul.f32 0.5, %v2954_v22 }
0x21ab   :  { %v3884_v23 = vpop.eup %3883 }
0x21ac   :  { %v2955_v25 = vadd.f32 1.0, %v3884_v23  ;;  %v2958_v27 = vmul.f32 %v2956_v24, %v2936_v11 }
0x21ae   :  { %v2957_v26 = vmul.f32 0.5, %v2955_v25 }
0x21b0   :  { %v2959_v28 = vmul.f32 %v2957_v26, %v2939_v16 }
0x21b2   :  { %v2977_v29 = vpack.c.bf16 %v2959_v28, %v2958_v27 }
0x21b4   :  { %3711 = vmatmul.mubr.bf16.vlgmr.msra.gmra.mxu0 %v2977_v29 }
0x2274   :  { %v3060_v30 = vpop.f32.mrf.mxu0 }
0x2275   :  { %v3067_v34 = vadd.f32 %v3060_v30, %v4768_v13 }
0x2276   :  { %v3712_v37 = vpop.f32.mrf.mxu0 }
0x2277   :  { %v3077_v38 = vadd.f32 %v3288_v32, %v3067_v34 }
0x2278   :  { %v3063_v40 = vpop.f32.mrf.mxu0 }
0x2279   :  { %v3068_v41 = vadd.f32 %v3063_v40, %v4773_v17  ;;  %v3081_v33 = vsel %vm216_vm0, %v3077_v38, 0.0 }
0x227a   :  { %3082 = vadd.xlane.f32.xlu1 %v3081_v33  ;;  %v3713_v42 = vpop.f32.mrf.mxu0 }
0x227b   :  { %v3078_v43 = vadd.f32 %v3288_v32, %v3068_v41 }
0x227d   :  { %v3084_v44 = vsel %vm216_vm0, %v3078_v43, 0.0 }
0x227e   :  { %3085 = vadd.xlane.f32.xlu0 %v3084_v44 }
0x2303   :  { %v3083_v45 = vpop.xlane.xlu1 %3082 }
0x2304   :  { %v3087_v39 = vmul.f32 0.03125, %v3083_v45 }
0x2306   :  { %v3089_v46 = vsub.f32 %v3077_v38, %v3087_v39 }
0x2307   :  { %v3086_v48 = vpop.xlane.xlu0 %3085 }
0x2308   :  { %v3088_v7 = vmul.f32 0.03125, %v3086_v48  ;;  %v3091_v49 = vmul.f32 %v3089_v46, %v3089_v46 }
0x230a   :  { %v3090_v13 = vsub.f32 %v3078_v43, %v3088_v7  ;;  %v3093_v31 = vsel %vm216_vm0, %v3091_v49, 0.0 }
0x230b   :  { %3094 = vadd.xlane.f32.xlu0 %v3093_v31 }
0x230c   :  { %v3092_v35 = vmul.f32 %v3090_v13, %v3090_v13 }
0x230e   :  { %v3096_v17 = vsel %vm216_vm0, %v3092_v35, 0.0 }
0x230f   :  { %3097 = vadd.xlane.f32.xlu0 %v3096_v17 }
0x2394   :  { %v3095_v50 = vpop.xlane.xlu0 %3094 }
0x2395   :  { %v3099_v51 = vmul.f32 0.03125, %v3095_v50 }
0x2397   :  { %v3101_v52 = vadd.f32 1e-05, %v3099_v51 }
0x2398   :  { %v3098_v53 = vpop.xlane.xlu0 %3097 }
0x2399   :  { %3885 = vrsqrt.f32 %v3101_v52  ;;  %v3100_v54 = vmul.f32 0.03125, %v3098_v53 }
0x239b   :  { %v3102_v55 = vadd.f32 1e-05, %v3100_v54 }
0x239d   :  { %3887 = vrsqrt.f32 %v3102_v55 }
0x23a6   :  { %v3886_v56 = vpop.eup %3885 }
0x23a7   :  { %v3105_v59 = vmul.f32 %v3886_v56, %v3089_v46 }
0x23a9   :  { %v3113_v63 = vmul.f32 %v3289_v57, %v3105_v59 }
0x23aa   :  { %v3888_v1 = vpop.eup %3887 }
0x23ab   :  { %v3106_v4 = vmul.f32 %v3888_v1, %v3090_v13  ;;  %v3121_v5 = vadd.f32 %v3290_v62, %v3113_v63 }
0x23ad   :  { %v3114_v47 = vmul.f32 %v3289_v57, %v3106_v4  ;;  %3123 = vst.msk [vmem:[#allocation19] sm:$0xff] %vm216_vm0, %v3121_v5 }
0x23af   :  { %v3122_v6 = vadd.f32 %v3290_v62, %v3114_v47 }
0x23b1   :  { %3124 = vst.msk [vmem:[#allocation19 + $0x8] sm:$0xff] %vm216_vm0, %v3122_v6 }
0x23b2   :  { %4102 = shalt.err (!%p4099_p12)
}
0x23b3   :  { %3136 = dma.vmem_to_hbm [thread:$0]  %s3131_s1, 256, %s4859_s19, [#allocation4], %s4128_s30, %s4128_s30, %s4129_s20  }
0x23b4   :  { %4123 = dma.done.wait [#allocation4], 256  }
0x23b5   :  { %4124 = vsyncadd [#allocation4], 4294967040 }
0x23b6   :  { %3140 = vsyncpa [#allocation3], 1 }
0x23b7   :  { %3141 = vsyncpa [#allocation6], 1 }
0x23b8   :  { %3142 = vsyncpa [#allocation9], 1 }
0x23b9   :  { %3143 = vsyncpa [#allocation12], 1 }
0x23ba   :  { %3144 = vsyncpa [#allocation15], 1 }
0x23bb   :  { %3145 = vsyncpa [#allocation18], 1 }
0x23bc   :  { %3146 = vsyncpa [#allocation4], 1 }

</bundles_post_ra>
